<compile_context>
chip_gen: v7x
topology: tpu7x:2x2x1
jax: 0.10.0
libtpu: 0.0.40
codegen_flags: <defaults>
</compile_context>

<pallas_src>
import functools

import jax
import jax.numpy as jnp
import numpy as np
from jax import lax
from jax.experimental import pallas as pl
from jax.experimental.pallas import tpu as pltpu

EPS = 1e-5
LANE = 128
F32 = jnp.float32
BF16 = jnp.bfloat16


def _round_up(x, m):
    return (x + m - 1) // m * m


def _interior_mask(Hp, Wp):
    """(Mp, 1) bool mask of the valid (non conv-padding) rows of the flat frame."""
    PH, PW = Hp + 2, Wp + 2
    Mp = PH * PW
    # Float div/floor instead of int div/mod (exact: Mp << 2^23).
    idx = lax.broadcasted_iota(jnp.int32, (Mp, 1), 0).astype(F32)
    r = jnp.floor(idx / float(PW))
    c = idx - r * float(PW)
    return (r >= 1.0) & (r <= float(Hp)) & (c >= 1.0) & (c <= float(Wp))


def _conv3x3_taps(ext_ref, w_ref, Mp, PW, B):
    """Sum of 9 shifted-row MXU dots (bf16 operands, f32 accumulation)."""
    acc = None
    for t in range(9):
        dy, dx = divmod(t, 3)
        start = B + (dy - 1) * PW + (dx - 1)          # flat frame-row shift
        lhs = ext_ref[start:start + Mp, :].astype(BF16)
        d = jnp.dot(lhs, w_ref[t], preferred_element_type=F32)
        acc = d if acc is None else acc + d
    return acc


# ---------------------------------------------------------------------------
# Kernel 1: MaxPool2d(2) + Conv3x3 #1 (+bias) + per-image BN1 partial stats
# ---------------------------------------------------------------------------
def _pool_conv1_kernel(x_ref, w_ref, b_ref, y_ref, st_ref, ext_ref,
                       *, Hp, Wp, Cin):
    PH, PW = Hp + 2, Wp + 2
    Mp, B = PH * PW, PW + 1

    # MaxPool2d(2): wrapper packed the 2x2 window window-major into the lane
    # dim (zero ring included), so pooling is a max over 4 lane groups.
    xb = x_ref[0]                                              # (Mp, 4*Cin) bf16
    pool = jnp.maximum(
        jnp.maximum(xb[:, 0 * Cin:1 * Cin], xb[:, 1 * Cin:2 * Cin]),
        jnp.maximum(xb[:, 2 * Cin:3 * Cin], xb[:, 3 * Cin:4 * Cin]))

    # Zero-halo frame scratch: B halo rows each side let the 9 flat tap slices
    # run past the frame; interior (incl. the zero conv-padding ring) is one
    # contiguous store.
    zh = jnp.zeros((B, Cin), F32)
    ext_ref[0:B, :] = zh
    ext_ref[B + Mp:2 * B + Mp, :] = zh
    ext_ref[B:B + Mp, :] = pool.astype(F32)

    inner = _interior_mask(Hp, Wp)
    acc = _conv3x3_taps(ext_ref, w_ref, Mp, PW, B) + b_ref[...]
    acc = jnp.where(inner, acc, 0.0)        # ring rows are wrap-around garbage

    y_ref[0] = acc.astype(BF16)
    st_ref[0, 0:1, :] = jnp.sum(acc, axis=0, keepdims=True)
    st_ref[0, 1:2, :] = jnp.sum(acc * acc, axis=0, keepdims=True)


# ---------------------------------------------------------------------------
# Kernel 2: BN1 (precomputed scale/shift) + ReLU + Conv3x3 #2 + BN2 partials
# ---------------------------------------------------------------------------
def _bn_relu_conv2_kernel(y1_ref, sc_ref, sh_ref, w_ref, b_ref,
                          y2_ref, st_ref, ext_ref, *, Hp, Wp, Ck):
    PH, PW = Hp + 2, Wp + 2
    Mp, B = PH * PW, PW + 1
    inner = _interior_mask(Hp, Wp)

    # BN1 + ReLU in f32; keep the conv zero-padding ring exactly 0.
    act = jnp.maximum(y1_ref[0].astype(F32) * sc_ref[...] + sh_ref[...], 0.0)
    act = jnp.where(inner, act, 0.0)

    zh = jnp.zeros((B, Ck), F32)
    ext_ref[0:B, :] = zh
    ext_ref[B + Mp:2 * B + Mp, :] = zh
    ext_ref[B:B + Mp, :] = act

    acc = _conv3x3_taps(ext_ref, w_ref, Mp, PW, B) + b_ref[...]
    acc = jnp.where(inner, acc, 0.0)

    y2_ref[0] = acc.astype(BF16)
    st_ref[0, 0:1, :] = jnp.sum(acc, axis=0, keepdims=True)
    st_ref[0, 1:2, :] = jnp.sum(acc * acc, axis=0, keepdims=True)


# ---------------------------------------------------------------------------
# Kernel 3: BN2 + ReLU (lane-dense elementwise; crop happens in the wrapper)
# ---------------------------------------------------------------------------
def _bn_relu_out_kernel(y2_ref, sc_ref, sh_ref, o_ref):
    o_ref[0] = jnp.maximum(y2_ref[0].astype(F32) * sc_ref[...] + sh_ref[...], 0.0)


# ---------------------------------------------------------------------------
# VMEM budgeting helpers
# ---------------------------------------------------------------------------
def _padded_vmem_bytes(shape, dtype):
    itemsize = int(np.dtype(dtype).itemsize)
    sub = 8 * (4 // itemsize)                    # 8 sublanes f32, 16 for bf16
    dims = list(shape)
    minor = _round_up(dims[-1], LANE) if len(dims) >= 1 else 1
    second = _round_up(dims[-2], sub) if len(dims) >= 2 else 1
    rest = 1
    for d in dims[:-2]:
        rest *= int(d)
    return rest * second * minor * itemsize


def _compiler_params(blocks, scratches):
    block_bytes = sum(_padded_vmem_bytes(s, d) for s, d in blocks)
    scratch_bytes = sum(_padded_vmem_bytes(s, d) for s, d in scratches)
    need = 2 * block_bytes + scratch_bytes + (4 << 20)   # 2x = double buffering
    return pltpu.CompilerParams(
        dimension_semantics=("parallel",),               # megacore-shard batch
        vmem_limit_bytes=int(min(100 << 20, max(need, 16 << 20))),
    )


# ---------------------------------------------------------------------------
# Wrapper
# ---------------------------------------------------------------------------
def down_forward(x_nchw, params):
    """Down forward: (N, Cin, H, W) f32 -> (N, Cout, H//2, W//2) f32."""
    w1, b1, g1, bt1, w2, b2, g2, bt2 = params
    N, Cin, H, W = x_nchw.shape
    assert H % 2 == 0 and W % 2 == 0, "MaxPool2d(2) path assumes even H, W"
    Hp, Wp = H // 2, W // 2
    PH, PW = Hp + 2, Wp + 2
    Mp, B = PH * PW, PW + 1
    Cmid, Cout = w1.shape[3], w2.shape[3]
    Cmid_p = _round_up(Cmid, LANE)
    Cout_p = _round_up(Cout, LANE)
    C4 = 4 * Cin
    count = N * Hp * Wp

    # ---- layout glue: space-to-depth pack the 2x2 pool window into lanes,
    # pre-embed the zero conv-padding ring, flatten the frame (all XLA). ----
    xw = x_nchw.astype(F32).reshape(N, Cin, Hp, 2, Wp, 2)
    xw = xw.transpose(0, 2, 4, 3, 5, 1).reshape(N, Hp, Wp, C4)
    xw = jnp.pad(xw, ((0, 0), (1, 1), (1, 1), (0, 0)))
    xpk = xw.reshape(N, Mp, C4).astype(BF16)

    # weights -> (9, K, C_pad) bf16; bias/gamma/beta -> (1, C_pad) f32.
    w1p = jnp.pad(w1.astype(F32), ((0, 0), (0, 0), (0, 0), (0, Cmid_p - Cmid)))
    w1p = w1p.reshape(9, Cin, Cmid_p).astype(BF16)
    w2p = jnp.pad(w2.astype(F32),
                  ((0, 0), (0, 0), (0, Cmid_p - Cmid), (0, Cout_p - Cout)))
    w2p = w2p.reshape(9, Cmid_p, Cout_p).astype(BF16)

    def cpad(v, cp):
        return jnp.pad(v.astype(F32), (0, cp - v.shape[0])).reshape(1, cp)

    # NOTE: padded gamma/beta lanes must stay zero so padded-channel
    # scale/shift are exactly zero (their batch var is 0).
    b1p, g1p, bt1p = cpad(b1, Cmid_p), cpad(g1, Cmid_p), cpad(bt1, Cmid_p)
    b2p, g2p, bt2p = cpad(b2, Cout_p), cpad(g2, Cout_p), cpad(bt2, Cout_p)

    # ---- pass 1: pool + conv1 (+bias) + BN1 partial stats ----
    cp1 = _compiler_params(
        blocks=[((1, Mp, C4), BF16), ((9, Cin, Cmid_p), BF16), ((1, Cmid_p), F32),
                ((1, Mp, Cmid_p), BF16), ((1, 2, Cmid_p), F32)],
        scratches=[((Mp + 2 * B, Cin), F32)])
    y1, st1 = pl.pallas_call(
        functools.partial(_pool_conv1_kernel, Hp=Hp, Wp=Wp, Cin=Cin),
        grid=(N,),
        in_specs=[
            pl.BlockSpec((1, Mp, C4), lambda n: (n, 0, 0)),
            pl.BlockSpec((9, Cin, Cmid_p), lambda n: (0, 0, 0)),
            pl.BlockSpec((1, Cmid_p), lambda n: (0, 0)),
        ],
        out_specs=(
            pl.BlockSpec((1, Mp, Cmid_p), lambda n: (n, 0, 0)),
            pl.BlockSpec((1, 2, Cmid_p), lambda n: (n, 0, 0)),
        ),
        out_shape=(
            jax.ShapeDtypeStruct((N, Mp, Cmid_p), BF16),
            jax.ShapeDtypeStruct((N, 2, Cmid_p), F32),
        ),
        scratch_shapes=[pltpu.VMEM((Mp + 2 * B, Cin), F32)],
        compiler_params=cp1,
        cost_estimate=pl.CostEstimate(
            flops=2 * N * Mp * 9 * Cin * Cmid_p,
            transcendentals=0,
            bytes_accessed=2 * N * Mp * C4 + 2 * 9 * Cin * Cmid_p
                           + 2 * N * Mp * Cmid_p + 8 * N * Cmid_p),
    )(xpk, w1p, b1p)

    # ---- BN1 finalize (tiny reduction; training-mode batch stats) ----
    mean1 = jnp.sum(st1[:, 0, :], axis=0) / count
    var1 = jnp.maximum(jnp.sum(st1[:, 1, :], axis=0) / count - mean1 * mean1, 0.0)
    scale1 = (g1p[0] * lax.rsqrt(var1 + EPS)).reshape(1, Cmid_p)
    shift1 = (bt1p[0] - mean1 * scale1[0]).reshape(1, Cmid_p)

    # ---- pass 2: BN1 + ReLU + conv2 (+bias) + BN2 partial stats ----
    cp2 = _compiler_params(
        blocks=[((1, Mp, Cmid_p), BF16), ((1, Cmid_p), F32), ((1, Cmid_p), F32),
                ((9, Cmid_p, Cout_p), BF16), ((1, Cout_p), F32),
                ((1, Mp, Cout_p), BF16), ((1, 2, Cout_p), F32)],
        scratches=[((Mp + 2 * B, Cmid_p), F32)])
    y2, st2 = pl.pallas_call(
        functools.partial(_bn_relu_conv2_kernel, Hp=Hp, Wp=Wp, Ck=Cmid_p),
        grid=(N,),
        in_specs=[
            pl.BlockSpec((1, Mp, Cmid_p), lambda n: (n, 0, 0)),
            pl.BlockSpec((1, Cmid_p), lambda n: (0, 0)),
            pl.BlockSpec((1, Cmid_p), lambda n: (0, 0)),
            pl.BlockSpec((9, Cmid_p, Cout_p), lambda n: (0, 0, 0)),
            pl.BlockSpec((1, Cout_p), lambda n: (0, 0)),
        ],
        out_specs=(
            pl.BlockSpec((1, Mp, Cout_p), lambda n: (n, 0, 0)),
            pl.BlockSpec((1, 2, Cout_p), lambda n: (n, 0, 0)),
        ),
        out_shape=(
            jax.ShapeDtypeStruct((N, Mp, Cout_p), BF16),
            jax.ShapeDtypeStruct((N, 2, Cout_p), F32),
        ),
        scratch_shapes=[pltpu.VMEM((Mp + 2 * B, Cmid_p), F32)],
        compiler_params=cp2,
        cost_estimate=pl.CostEstimate(
            flops=2 * N * Mp * 9 * Cmid_p * Cout_p,
            transcendentals=0,
            bytes_accessed=2 * N * Mp * Cmid_p + 2 * 9 * Cmid_p * Cout_p
                           + 2 * N * Mp * Cout_p + 8 * N * Cout_p),
    )(y1, scale1, shift1, w2p, b2p)

    # ---- BN2 finalize ----
    mean2 = jnp.sum(st2[:, 0, :], axis=0) / count
    var2 = jnp.maximum(jnp.sum(st2[:, 1, :], axis=0) / count - mean2 * mean2, 0.0)
    scale2 = (g2p[0] * lax.rsqrt(var2 + EPS)).reshape(1, Cout_p)
    shift2 = (bt2p[0] - mean2 * scale2[0]).reshape(1, Cout_p)

    # ---- pass 3: BN2 + ReLU (lane-dense elementwise) ----
    cp3 = _compiler_params(
        blocks=[((1, Mp, Cout_p), BF16), ((1, Cout_p), F32), ((1, Cout_p), F32),
                ((1, Mp, Cout_p), F32)],
        scratches=[])
    out_f = pl.pallas_call(
        _bn_relu_out_kernel,
        grid=(N,),
        in_specs=[
            pl.BlockSpec((1, Mp, Cout_p), lambda n: (n, 0, 0)),
            pl.BlockSpec((1, Cout_p), lambda n: (0, 0)),
            pl.BlockSpec((1, Cout_p), lambda n: (0, 0)),
        ],
        out_specs=pl.BlockSpec((1, Mp, Cout_p), lambda n: (n, 0, 0)),
        out_shape=jax.ShapeDtypeStruct((N, Mp, Cout_p), F32),
        compiler_params=cp3,
    )(y2, scale2, shift2)

    # ---- layout glue: interior crop + channel strip, NHWC -> NCHW ----
    out = out_f.reshape(N, PH, PW, Cout_p)[:, 1:1 + Hp, 1:1 + Wp, :Cout]
    return jnp.transpose(out, (0, 3, 1, 2))


# ---------------------------------------------------------------------------
# Pure-JAX reference mirroring the PyTorch forward (training-mode BN)
# ---------------------------------------------------------------------------
def ref_forward(x_nchw, params):
    w1, b1, g1, bt1, w2, b2, g2, bt2 = params
    x = jnp.transpose(x_nchw, (0, 2, 3, 1)).astype(jnp.float32)
    p = lax.reduce_window(x, -jnp.inf, lax.max,
                          (1, 2, 2, 1), (1, 2, 2, 1), 'VALID')

    def conv_bn_relu(h, w, b, g, bt):
        y = lax.conv_general_dilated(
            h, w, window_strides=(1, 1), padding=((1, 1), (1, 1)),
            dimension_numbers=('NHWC', 'HWIO', 'NHWC')) + b
        mean = jnp.mean(y, axis=(0, 1, 2))
        var = jnp.mean((y - mean) ** 2, axis=(0, 1, 2))
        y = (y - mean) / jnp.sqrt(var + EPS) * g + bt
        return jnp.maximum(y, 0.0)

    h = conv_bn_relu(p, w1, b1, g1, bt1)
    h = conv_bn_relu(h, w2, b2, g2, bt2)
    return jnp.transpose(h, (0, 3, 1, 2))


def init_params(key, c_in, c_out, k=3):
    c_mid = c_out  # channels_mid defaults to channels_out
    k1, k2, k3, k4 = jax.random.split(key, 4)
    w1 = jax.random.normal(k1, (k, k, c_in, c_mid), jnp.float32) * 0.1   # HWIO
    b1 = jax.random.normal(k2, (c_mid,), jnp.float32) * 0.1
    g1 = jnp.ones((c_mid,), jnp.float32)    # BatchNorm weight init
    bt1 = jnp.zeros((c_mid,), jnp.float32)  # BatchNorm bias init
    w2 = jax.random.normal(k3, (k, k, c_mid, c_out), jnp.float32) * 0.1
    b2 = jax.random.normal(k4, (c_out,), jnp.float32) * 0.1
    g2 = jnp.ones((c_out,), jnp.float32)
    bt2 = jnp.zeros((c_out,), jnp.float32)
    return (w1, b1, g1, bt1, w2, b2, g2, bt2)


if __name__ == "__main__":
    key = jax.random.PRNGKey(0)
    kx, kp = jax.random.split(key)
    N, C_IN, H, W = 2, 4, 16, 16
    C_OUT = 8
    x = jax.random.normal(kx, (N, C_IN, H, W), jnp.float32)
    params = init_params(kp, C_IN, C_OUT)

    out = jax.block_until_ready(jax.jit(down_forward)(x, params))
    ref = jax.block_until_ready(ref_forward(x, params))

    assert out.shape == (N, C_OUT, H // 2, W // 2), out.shape
    # bf16 MXU operands + bf16 intermediates vs. an all-f32 reference.
    np.testing.assert_allclose(np.asarray(out), np.asarray(ref),
                               rtol=8e-2, atol=8e-2)
    print("KERNEL_OK")
</pallas_src>

<mosaic_0001>
module attributes {stable_mosaic.version = 11 : i64} {
  func.func @_pool_conv1_kernel(%arg0: i32, %arg1: memref<1x100x16xbf16, #tpu.memory_space<vmem>>, %arg2: memref<9x4x128xbf16, #tpu.memory_space<vmem>>, %arg3: memref<1x128xf32, #tpu.memory_space<vmem>>, %arg4: memref<1x100x128xbf16, #tpu.memory_space<vmem>>, %arg5: memref<1x2x128xf32, #tpu.memory_space<vmem>>, %arg6: memref<122x4xf32, #tpu.memory_space<vmem>>) attributes {dimension_semantics = [#tpu.dimension_semantics<parallel>], iteration_bounds = array<i64: 2>, scalar_prefetch = 0 : i64, scratch_operands = 1 : i64, tpu.core_type = #tpu.core_type<tc>, window_params = [{transform_indices = @transform_0, window_bounds = array<i64: 1, 100, 16>}, {pipeline_mode = #tpu.pipeline_mode<synchronous>, transform_indices = @transform_1, window_bounds = array<i64: 9, 4, 128>}, {pipeline_mode = #tpu.pipeline_mode<synchronous>, transform_indices = @transform_2, window_bounds = array<i64: 1, 128>}, {transform_indices = @transform_3, window_bounds = array<i64: 1, 100, 128>}, {transform_indices = @transform_4, window_bounds = array<i64: 1, 2, 128>}]} {
    %c0 = arith.constant 0 : index
    %c0_0 = arith.constant 0 : index
    %c0_1 = arith.constant 0 : index
    %0 = vector.load %arg1[%c0, %c0_0, %c0_1] : memref<1x100x16xbf16, #tpu.memory_space<vmem>>, vector<1x100x16xbf16>
    %1 = vector.shape_cast %0 : vector<1x100x16xbf16> to vector<100x16xbf16>
    %2 = vector.extract_strided_slice %1 {offsets = [0, 0], sizes = [100, 4], strides = [1, 1]} : vector<100x16xbf16> to vector<100x4xbf16>
    %3 = vector.extract_strided_slice %1 {offsets = [0, 4], sizes = [100, 4], strides = [1, 1]} : vector<100x16xbf16> to vector<100x4xbf16>
    %4 = arith.maximumf %2, %3 : vector<100x4xbf16>
    %5 = vector.extract_strided_slice %1 {offsets = [0, 8], sizes = [100, 4], strides = [1, 1]} : vector<100x16xbf16> to vector<100x4xbf16>
    %6 = vector.extract_strided_slice %1 {offsets = [0, 12], sizes = [100, 4], strides = [1, 1]} : vector<100x16xbf16> to vector<100x4xbf16>
    %7 = arith.maximumf %5, %6 : vector<100x4xbf16>
    %8 = arith.maximumf %4, %7 : vector<100x4xbf16>
    %cst = arith.constant 0.000000e+00 : f32
    %9 = vector.broadcast %cst : f32 to vector<11x4xf32>
    %c0_2 = arith.constant 0 : index
    %c0_3 = arith.constant 0 : index
    %10 = vector.load %arg6[%c0_2, %c0_3] : memref<122x4xf32, #tpu.memory_space<vmem>>, vector<11x4xf32>
    tpu.vector_store %arg6[%c0_2, %c0_3], %9 {strides = array<i32>} : memref<122x4xf32, #tpu.memory_space<vmem>>, vector<11x4xf32>,
    %c111 = arith.constant 111 : index
    %c0_4 = arith.constant 0 : index
    %11 = vector.load %arg6[%c111, %c0_4] : memref<122x4xf32, #tpu.memory_space<vmem>>, vector<11x4xf32>
    tpu.vector_store %arg6[%c111, %c0_4], %9 {strides = array<i32>} : memref<122x4xf32, #tpu.memory_space<vmem>>, vector<11x4xf32>,
    %12 = arith.extf %8 : vector<100x4xbf16> to vector<100x4xf32>
    %c11 = arith.constant 11 : index
    %c0_5 = arith.constant 0 : index
    %13 = vector.load %arg6[%c11, %c0_5] : memref<122x4xf32, #tpu.memory_space<vmem>>, vector<100x4xf32>
    tpu.vector_store %arg6[%c11, %c0_5], %12 {strides = array<i32>} : memref<122x4xf32, #tpu.memory_space<vmem>>, vector<100x4xf32>,
    %14 = tpu.iota {dimensions = array<i32: 0>} : vector<100x1xi32>
    %15 = arith.sitofp %14 : vector<100x1xi32> to vector<100x1xf32>
    %cst_6 = arith.constant 1.000000e+01 : f32
    %16 = vector.broadcast %cst_6 : f32 to vector<100x1xf32>
    %17 = arith.divf %15, %16 : vector<100x1xf32>
    %18 = math.floor %17 : vector<100x1xf32>
    %cst_7 = arith.constant 1.000000e+01 : f32
    %19 = vector.broadcast %cst_7 : f32 to vector<100x1xf32>
    %20 = arith.mulf %18, %19 : vector<100x1xf32>
    %21 = arith.subf %15, %20 : vector<100x1xf32>
    %cst_8 = arith.constant 1.000000e+00 : f32
    %22 = vector.broadcast %cst_8 : f32 to vector<100x1xf32>
    %23 = arith.cmpf oge, %18, %22 : vector<100x1xf32>
    %cst_9 = arith.constant 8.000000e+00 : f32
    %24 = vector.broadcast %cst_9 : f32 to vector<100x1xf32>
    %25 = arith.cmpf ole, %18, %24 : vector<100x1xf32>
    %26 = arith.andi %23, %25 : vector<100x1xi1>
    %cst_10 = arith.constant 1.000000e+00 : f32
    %27 = vector.broadcast %cst_10 : f32 to vector<100x1xf32>
    %28 = arith.cmpf oge, %21, %27 : vector<100x1xf32>
    %29 = arith.andi %26, %28 : vector<100x1xi1>
    %cst_11 = arith.constant 8.000000e+00 : f32
    %30 = vector.broadcast %cst_11 : f32 to vector<100x1xf32>
    %31 = arith.cmpf ole, %21, %30 : vector<100x1xf32>
    %32 = arith.andi %29, %31 : vector<100x1xi1>
    %c0_12 = arith.constant 0 : index
    %c0_13 = arith.constant 0 : index
    %33 = vector.load %arg6[%c0_12, %c0_13] : memref<122x4xf32, #tpu.memory_space<vmem>>, vector<100x4xf32>
    %34 = arith.truncf %33 : vector<100x4xf32> to vector<100x4xbf16>
    %c0_14 = arith.constant 0 : index
    %c0_15 = arith.constant 0 : index
    %c0_16 = arith.constant 0 : index
    %35 = vector.load %arg2[%c0_14, %c0_15, %c0_16] : memref<9x4x128xbf16, #tpu.memory_space<vmem>>, vector<1x4x128xbf16>
    %36 = vector.shape_cast %35 : vector<1x4x128xbf16> to vector<4x128xbf16>
    %cst_17 = arith.constant dense<0.000000e+00> : vector<100x128xf32>
    %37 = tpu.matmul %34, %36, %cst_17 {dimension_numbers = #tpu.dot_dimension_numbers<[1], [0], [0], [1], [0, 0, 1, 1], [], []>} : vector<100x4xbf16>, vector<4x128xbf16>, vector<100x128xf32> -> vector<100x128xf32>
    %c1 = arith.constant 1 : index
    %c0_18 = arith.constant 0 : index
    %38 = vector.load %arg6[%c1, %c0_18] : memref<122x4xf32, #tpu.memory_space<vmem>>, vector<100x4xf32>
    %39 = arith.truncf %38 : vector<100x4xf32> to vector<100x4xbf16>
    %c1_19 = arith.constant 1 : index
    %c0_20 = arith.constant 0 : index
    %c0_21 = arith.constant 0 : index
    %40 = vector.load %arg2[%c1_19, %c0_20, %c0_21] : memref<9x4x128xbf16, #tpu.memory_space<vmem>>, vector<1x4x128xbf16>
    %41 = vector.shape_cast %40 : vector<1x4x128xbf16> to vector<4x128xbf16>
    %cst_22 = arith.constant dense<0.000000e+00> : vector<100x128xf32>
    %42 = tpu.matmul %39, %41, %cst_22 {dimension_numbers = #tpu.dot_dimension_numbers<[1], [0], [0], [1], [0, 0, 1, 1], [], []>} : vector<100x4xbf16>, vector<4x128xbf16>, vector<100x128xf32> -> vector<100x128xf32>
    %43 = arith.addf %37, %42 : vector<100x128xf32>
    %c2 = arith.constant 2 : index
    %c0_23 = arith.constant 0 : index
    %44 = vector.load %arg6[%c2, %c0_23] : memref<122x4xf32, #tpu.memory_space<vmem>>, vector<100x4xf32>
    %45 = arith.truncf %44 : vector<100x4xf32> to vector<100x4xbf16>
    %c2_24 = arith.constant 2 : index
    %c0_25 = arith.constant 0 : index
    %c0_26 = arith.constant 0 : index
    %46 = vector.load %arg2[%c2_24, %c0_25, %c0_26] : memref<9x4x128xbf16, #tpu.memory_space<vmem>>, vector<1x4x128xbf16>
    %47 = vector.shape_cast %46 : vector<1x4x128xbf16> to vector<4x128xbf16>
    %cst_27 = arith.constant dense<0.000000e+00> : vector<100x128xf32>
    %48 = tpu.matmul %45, %47, %cst_27 {dimension_numbers = #tpu.dot_dimension_numbers<[1], [0], [0], [1], [0, 0, 1, 1], [], []>} : vector<100x4xbf16>, vector<4x128xbf16>, vector<100x128xf32> -> vector<100x128xf32>
    %49 = arith.addf %43, %48 : vector<100x128xf32>
    %c10 = arith.constant 10 : index
    %c0_28 = arith.constant 0 : index
    %50 = vector.load %arg6[%c10, %c0_28] : memref<122x4xf32, #tpu.memory_space<vmem>>, vector<100x4xf32>
    %51 = arith.truncf %50 : vector<100x4xf32> to vector<100x4xbf16>
    %c3 = arith.constant 3 : index
    %c0_29 = arith.constant 0 : index
    %c0_30 = arith.constant 0 : index
    %52 = vector.load %arg2[%c3, %c0_29, %c0_30] : memref<9x4x128xbf16, #tpu.memory_space<vmem>>, vector<1x4x128xbf16>
    %53 = vector.shape_cast %52 : vector<1x4x128xbf16> to vector<4x128xbf16>
    %cst_31 = arith.constant dense<0.000000e+00> : vector<100x128xf32>
    %54 = tpu.matmul %51, %53, %cst_31 {dimension_numbers = #tpu.dot_dimension_numbers<[1], [0], [0], [1], [0, 0, 1, 1], [], []>} : vector<100x4xbf16>, vector<4x128xbf16>, vector<100x128xf32> -> vector<100x128xf32>
    %55 = arith.addf %49, %54 : vector<100x128xf32>
    %c11_32 = arith.constant 11 : index
    %c0_33 = arith.constant 0 : index
    %56 = vector.load %arg6[%c11_32, %c0_33] : memref<122x4xf32, #tpu.memory_space<vmem>>, vector<100x4xf32>
    %57 = arith.truncf %56 : vector<100x4xf32> to vector<100x4xbf16>
    %c4 = arith.constant 4 : index
    %c0_34 = arith.constant 0 : index
    %c0_35 = arith.constant 0 : index
    %58 = vector.load %arg2[%c4, %c0_34, %c0_35] : memref<9x4x128xbf16, #tpu.memory_space<vmem>>, vector<1x4x128xbf16>
    %59 = vector.shape_cast %58 : vector<1x4x128xbf16> to vector<4x128xbf16>
    %cst_36 = arith.constant dense<0.000000e+00> : vector<100x128xf32>
    %60 = tpu.matmul %57, %59, %cst_36 {dimension_numbers = #tpu.dot_dimension_numbers<[1], [0], [0], [1], [0, 0, 1, 1], [], []>} : vector<100x4xbf16>, vector<4x128xbf16>, vector<100x128xf32> -> vector<100x128xf32>
    %61 = arith.addf %55, %60 : vector<100x128xf32>
    %c12 = arith.constant 12 : index
    %c0_37 = arith.constant 0 : index
    %62 = vector.load %arg6[%c12, %c0_37] : memref<122x4xf32, #tpu.memory_space<vmem>>, vector<100x4xf32>
    %63 = arith.truncf %62 : vector<100x4xf32> to vector<100x4xbf16>
    %c5 = arith.constant 5 : index
    %c0_38 = arith.constant 0 : index
    %c0_39 = arith.constant 0 : index
    %64 = vector.load %arg2[%c5, %c0_38, %c0_39] : memref<9x4x128xbf16, #tpu.memory_space<vmem>>, vector<1x4x128xbf16>
    %65 = vector.shape_cast %64 : vector<1x4x128xbf16> to vector<4x128xbf16>
    %cst_40 = arith.constant dense<0.000000e+00> : vector<100x128xf32>
    %66 = tpu.matmul %63, %65, %cst_40 {dimension_numbers = #tpu.dot_dimension_numbers<[1], [0], [0], [1], [0, 0, 1, 1], [], []>} : vector<100x4xbf16>, vector<4x128xbf16>, vector<100x128xf32> -> vector<100x128xf32>
    %67 = arith.addf %61, %66 : vector<100x128xf32>
    %c20 = arith.constant 20 : index
    %c0_41 = arith.constant 0 : index
    %68 = vector.load %arg6[%c20, %c0_41] : memref<122x4xf32, #tpu.memory_space<vmem>>, vector<100x4xf32>
    %69 = arith.truncf %68 : vector<100x4xf32> to vector<100x4xbf16>
    %c6 = arith.constant 6 : index
    %c0_42 = arith.constant 0 : index
    %c0_43 = arith.constant 0 : index
    %70 = vector.load %arg2[%c6, %c0_42, %c0_43] : memref<9x4x128xbf16, #tpu.memory_space<vmem>>, vector<1x4x128xbf16>
    %71 = vector.shape_cast %70 : vector<1x4x128xbf16> to vector<4x128xbf16>
    %cst_44 = arith.constant dense<0.000000e+00> : vector<100x128xf32>
    %72 = tpu.matmul %69, %71, %cst_44 {dimension_numbers = #tpu.dot_dimension_numbers<[1], [0], [0], [1], [0, 0, 1, 1], [], []>} : vector<100x4xbf16>, vector<4x128xbf16>, vector<100x128xf32> -> vector<100x128xf32>
    %73 = arith.addf %67, %72 : vector<100x128xf32>
    %c21 = arith.constant 21 : index
    %c0_45 = arith.constant 0 : index
    %74 = vector.load %arg6[%c21, %c0_45] : memref<122x4xf32, #tpu.memory_space<vmem>>, vector<100x4xf32>
    %75 = arith.truncf %74 : vector<100x4xf32> to vector<100x4xbf16>
    %c7 = arith.constant 7 : index
    %c0_46 = arith.constant 0 : index
    %c0_47 = arith.constant 0 : index
    %76 = vector.load %arg2[%c7, %c0_46, %c0_47] : memref<9x4x128xbf16, #tpu.memory_space<vmem>>, vector<1x4x128xbf16>
    %77 = vector.shape_cast %76 : vector<1x4x128xbf16> to vector<4x128xbf16>
    %cst_48 = arith.constant dense<0.000000e+00> : vector<100x128xf32>
    %78 = tpu.matmul %75, %77, %cst_48 {dimension_numbers = #tpu.dot_dimension_numbers<[1], [0], [0], [1], [0, 0, 1, 1], [], []>} : vector<100x4xbf16>, vector<4x128xbf16>, vector<100x128xf32> -> vector<100x128xf32>
    %79 = arith.addf %73, %78 : vector<100x128xf32>
    %c22 = arith.constant 22 : index
    %c0_49 = arith.constant 0 : index
    %80 = vector.load %arg6[%c22, %c0_49] : memref<122x4xf32, #tpu.memory_space<vmem>>, vector<100x4xf32>
    %81 = arith.truncf %80 : vector<100x4xf32> to vector<100x4xbf16>
    %c8 = arith.constant 8 : index
    %c0_50 = arith.constant 0 : index
    %c0_51 = arith.constant 0 : index
    %82 = vector.load %arg2[%c8, %c0_50, %c0_51] : memref<9x4x128xbf16, #tpu.memory_space<vmem>>, vector<1x4x128xbf16>
    %83 = vector.shape_cast %82 : vector<1x4x128xbf16> to vector<4x128xbf16>
    %cst_52 = arith.constant dense<0.000000e+00> : vector<100x128xf32>
    %84 = tpu.matmul %81, %83, %cst_52 {dimension_numbers = #tpu.dot_dimension_numbers<[1], [0], [0], [1], [0, 0, 1, 1], [], []>} : vector<100x4xbf16>, vector<4x128xbf16>, vector<100x128xf32> -> vector<100x128xf32>
    %85 = arith.addf %79, %84 : vector<100x128xf32>
    %c0_53 = arith.constant 0 : index
    %c0_54 = arith.constant 0 : index
    %86 = vector.load %arg3[%c0_53, %c0_54] : memref<1x128xf32, #tpu.memory_space<vmem>>, vector<1x128xf32>
    %87 = vector.broadcast %86 : vector<1x128xf32> to vector<100x128xf32>
    %88 = arith.addf %85, %87 : vector<100x128xf32>
    %cst_55 = arith.constant 0.000000e+00 : f32
    %89 = vector.shape_cast %32 : vector<100x1xi1> to vector<100x1xi1>
    %90 = vector.broadcast %89 : vector<100x1xi1> to vector<100x128xi1>
    %91 = vector.broadcast %cst_55 : f32 to vector<100x128xf32>
    %92 = arith.select %90, %88, %91 : vector<100x128xi1>, vector<100x128xf32>
    %93 = arith.truncf %92 : vector<100x128xf32> to vector<100x128xbf16>
    %c0_56 = arith.constant 0 : index
    %c0_57 = arith.constant 0 : index
    %c0_58 = arith.constant 0 : index
    %94 = vector.load %arg4[%c0_56, %c0_57, %c0_58] : memref<1x100x128xbf16, #tpu.memory_space<vmem>>, vector<1x100x128xbf16>
    %95 = vector.shape_cast %94 : vector<1x100x128xbf16> to vector<100x128xbf16>
    %96 = vector.shape_cast %93 : vector<100x128xbf16> to vector<1x100x128xbf16>
    tpu.vector_store %arg4[%c0_56, %c0_57, %c0_58], %96 {strides = array<i32>} : memref<1x100x128xbf16, #tpu.memory_space<vmem>>, vector<1x100x128xbf16>,
    %cst_59 = arith.constant dense<0.000000e+00> : vector<128xf32>
    %97 = vector.multi_reduction <add>, %92, %cst_59 [0] : vector<100x128xf32> to vector<128xf32>
    %98 = vector.shape_cast %97 : vector<128xf32> to vector<1x128xf32>
    %c0_60 = arith.constant 0 : index
    %c0_61 = arith.constant 0 : index
    %c0_62 = arith.constant 0 : index
    %99 = vector.load %arg5[%c0_60, %c0_61, %c0_62] : memref<1x2x128xf32, #tpu.memory_space<vmem>>, vector<1x1x128xf32>
    %100 = vector.shape_cast %99 : vector<1x1x128xf32> to vector<1x128xf32>
    %101 = vector.shape_cast %98 : vector<1x128xf32> to vector<1x1x128xf32>
    tpu.vector_store %arg5[%c0_60, %c0_61, %c0_62], %101 {strides = array<i32>} : memref<1x2x128xf32, #tpu.memory_space<vmem>>, vector<1x1x128xf32>,
    %102 = arith.mulf %92, %92 : vector<100x128xf32>
    %cst_63 = arith.constant dense<0.000000e+00> : vector<128xf32>
    %103 = vector.multi_reduction <add>, %102, %cst_63 [0] : vector<100x128xf32> to vector<128xf32>
    %104 = vector.shape_cast %103 : vector<128xf32> to vector<1x128xf32>
    %c0_64 = arith.constant 0 : index
    %c1_65 = arith.constant 1 : index
    %c0_66 = arith.constant 0 : index
    %105 = vector.load %arg5[%c0_64, %c1_65, %c0_66] : memref<1x2x128xf32, #tpu.memory_space<vmem>>, vector<1x1x128xf32>
    %106 = vector.shape_cast %105 : vector<1x1x128xf32> to vector<1x128xf32>
    %107 = vector.shape_cast %104 : vector<1x128xf32> to vector<1x1x128xf32>
    tpu.vector_store %arg5[%c0_64, %c1_65, %c0_66], %107 {strides = array<i32>} : memref<1x2x128xf32, #tpu.memory_space<vmem>>, vector<1x1x128xf32>,
    return
  }
  func.func @transform_0(%arg0: i32) -> (i32, i32, i32) {
    %c0_i32 = arith.constant 0 : i32
    %c0_i32_0 = arith.constant 0 : i32
    %c0_i32_1 = arith.constant 0 : i32
    return %arg0, %c0_i32, %c0_i32_0 : i32, i32, i32
  }
  func.func @transform_1(%arg0: i32) -> (i32, i32, i32) {
    %c0_i32 = arith.constant 0 : i32
    %c0_i32_0 = arith.constant 0 : i32
    %c0_i32_1 = arith.constant 0 : i32
    %c0_i32_2 = arith.constant 0 : i32
    return %c0_i32, %c0_i32_0, %c0_i32_1 : i32, i32, i32
  }
  func.func @transform_2(%arg0: i32) -> (i32, i32) {
    %c0_i32 = arith.constant 0 : i32
    %c0_i32_0 = arith.constant 0 : i32
    %c0_i32_1 = arith.constant 0 : i32
    return %c0_i32, %c0_i32_0 : i32, i32
  }
  func.func @transform_3(%arg0: i32) -> (i32, i32, i32) {
    %c0_i32 = arith.constant 0 : i32
    %c0_i32_0 = arith.constant 0 : i32
    %c0_i32_1 = arith.constant 0 : i32
    return %arg0, %c0_i32, %c0_i32_0 : i32, i32, i32
  }
  func.func @transform_4(%arg0: i32) -> (i32, i32, i32) {
    %c0_i32 = arith.constant 0 : i32
    %c0_i32_0 = arith.constant 0 : i32
    %c0_i32_1 = arith.constant 0 : i32
    return %arg0, %c0_i32, %c0_i32_0 : i32, i32, i32
  }
}

module attributes {stable_mosaic.version = 11 : i64} {
  func.func @_bn_relu_out_kernel(%arg0: i32, %arg1: memref<1x100x128xbf16, #tpu.memory_space<vmem>>, %arg2: memref<1x128xf32, #tpu.memory_space<vmem>>, %arg3: memref<1x128xf32, #tpu.memory_space<vmem>>, %arg4: memref<1x100x128xf32, #tpu.memory_space<vmem>>) attributes {dimension_semantics = [#tpu.dimension_semantics<parallel>], iteration_bounds = array<i64: 2>, scalar_prefetch = 0 : i64, scratch_operands = 0 : i64, tpu.core_type = #tpu.core_type<tc>, window_params = [{transform_indices = @transform_0, window_bounds = array<i64: 1, 100, 128>}, {pipeline_mode = #tpu.pipeline_mode<synchronous>, transform_indices = @transform_1, window_bounds = array<i64: 1, 128>}, {pipeline_mode = #tpu.pipeline_mode<synchronous>, transform_indices = @transform_2, window_bounds = array<i64: 1, 128>}, {transform_indices = @transform_3, window_bounds = array<i64: 1, 100, 128>}]} {
    %c0 = arith.constant 0 : index
    %c0_0 = arith.constant 0 : index
    %c0_1 = arith.constant 0 : index
    %0 = vector.load %arg1[%c0, %c0_0, %c0_1] : memref<1x100x128xbf16, #tpu.memory_space<vmem>>, vector<1x100x128xbf16>
    %1 = vector.shape_cast %0 : vector<1x100x128xbf16> to vector<100x128xbf16>
    %2 = arith.extf %1 : vector<100x128xbf16> to vector<100x128xf32>
    %c0_2 = arith.constant 0 : index
    %c0_3 = arith.constant 0 : index
    %3 = vector.load %arg2[%c0_2, %c0_3] : memref<1x128xf32, #tpu.memory_space<vmem>>, vector<1x128xf32>
    %4 = vector.broadcast %3 : vector<1x128xf32> to vector<100x128xf32>
    %5 = arith.mulf %2, %4 : vector<100x128xf32>
    %c0_4 = arith.constant 0 : index
    %c0_5 = arith.constant 0 : index
    %6 = vector.load %arg3[%c0_4, %c0_5] : memref<1x128xf32, #tpu.memory_space<vmem>>, vector<1x128xf32>
    %7 = vector.broadcast %6 : vector<1x128xf32> to vector<100x128xf32>
    %8 = arith.addf %5, %7 : vector<100x128xf32>
    %cst = arith.constant 0.000000e+00 : f32
    %9 = vector.broadcast %cst : f32 to vector<100x128xf32>
    %10 = arith.maximumf %8, %9 : vector<100x128xf32>
    %c0_6 = arith.constant 0 : index
    %c0_7 = arith.constant 0 : index
    %c0_8 = arith.constant 0 : index
    %11 = vector.load %arg4[%c0_6, %c0_7, %c0_8] : memref<1x100x128xf32, #tpu.memory_space<vmem>>, vector<1x100x128xf32>
    %12 = vector.shape_cast %11 : vector<1x100x128xf32> to vector<100x128xf32>
    %13 = vector.shape_cast %10 : vector<100x128xf32> to vector<1x100x128xf32>
    tpu.vector_store %arg4[%c0_6, %c0_7, %c0_8], %13 {strides = array<i32>} : memref<1x100x128xf32, #tpu.memory_space<vmem>>, vector<1x100x128xf32>,
    return
  }
  func.func @transform_0(%arg0: i32) -> (i32, i32, i32) {
    %c0_i32 = arith.constant 0 : i32
    %c0_i32_0 = arith.constant 0 : i32
    %c0_i32_1 = arith.constant 0 : i32
    return %arg0, %c0_i32, %c0_i32_0 : i32, i32, i32
  }
  func.func @transform_1(%arg0: i32) -> (i32, i32) {
    %c0_i32 = arith.constant 0 : i32
    %c0_i32_0 = arith.constant 0 : i32
    %c0_i32_1 = arith.constant 0 : i32
    return %c0_i32, %c0_i32_0 : i32, i32
  }
  func.func @transform_2(%arg0: i32) -> (i32, i32) {
    %c0_i32 = arith.constant 0 : i32
    %c0_i32_0 = arith.constant 0 : i32
    %c0_i32_1 = arith.constant 0 : i32
    return %c0_i32, %c0_i32_0 : i32, i32
  }
  func.func @transform_3(%arg0: i32) -> (i32, i32, i32) {
    %c0_i32 = arith.constant 0 : i32
    %c0_i32_0 = arith.constant 0 : i32
    %c0_i32_1 = arith.constant 0 : i32
    return %arg0, %c0_i32, %c0_i32_0 : i32, i32, i32
  }
}

module attributes {stable_mosaic.version = 11 : i64} {
  func.func @_bn_relu_conv2_kernel(%arg0: i32, %arg1: memref<1x100x128xbf16, #tpu.memory_space<vmem>>, %arg2: memref<1x128xf32, #tpu.memory_space<vmem>>, %arg3: memref<1x128xf32, #tpu.memory_space<vmem>>, %arg4: memref<9x128x128xbf16, #tpu.memory_space<vmem>>, %arg5: memref<1x128xf32, #tpu.memory_space<vmem>>, %arg6: memref<1x100x128xbf16, #tpu.memory_space<vmem>>, %arg7: memref<1x2x128xf32, #tpu.memory_space<vmem>>, %arg8: memref<122x128xf32, #tpu.memory_space<vmem>>) attributes {dimension_semantics = [#tpu.dimension_semantics<parallel>], iteration_bounds = array<i64: 2>, scalar_prefetch = 0 : i64, scratch_operands = 1 : i64, tpu.core_type = #tpu.core_type<tc>, window_params = [{transform_indices = @transform_0, window_bounds = array<i64: 1, 100, 128>}, {pipeline_mode = #tpu.pipeline_mode<synchronous>, transform_indices = @transform_1, window_bounds = array<i64: 1, 128>}, {pipeline_mode = #tpu.pipeline_mode<synchronous>, transform_indices = @transform_2, window_bounds = array<i64: 1, 128>}, {pipeline_mode = #tpu.pipeline_mode<synchronous>, transform_indices = @transform_3, window_bounds = array<i64: 9, 128, 128>}, {pipeline_mode = #tpu.pipeline_mode<synchronous>, transform_indices = @transform_4, window_bounds = array<i64: 1, 128>}, {transform_indices = @transform_5, window_bounds = array<i64: 1, 100, 128>}, {transform_indices = @transform_6, window_bounds = array<i64: 1, 2, 128>}]} {
    %0 = tpu.iota {dimensions = array<i32: 0>} : vector<100x1xi32>
    %1 = arith.sitofp %0 : vector<100x1xi32> to vector<100x1xf32>
    %cst = arith.constant 1.000000e+01 : f32
    %2 = vector.broadcast %cst : f32 to vector<100x1xf32>
    %3 = arith.divf %1, %2 : vector<100x1xf32>
    %4 = math.floor %3 : vector<100x1xf32>
    %cst_0 = arith.constant 1.000000e+01 : f32
    %5 = vector.broadcast %cst_0 : f32 to vector<100x1xf32>
    %6 = arith.mulf %4, %5 : vector<100x1xf32>
    %7 = arith.subf %1, %6 : vector<100x1xf32>
    %cst_1 = arith.constant 1.000000e+00 : f32
    %8 = vector.broadcast %cst_1 : f32 to vector<100x1xf32>
    %9 = arith.cmpf oge, %4, %8 : vector<100x1xf32>
    %cst_2 = arith.constant 8.000000e+00 : f32
    %10 = vector.broadcast %cst_2 : f32 to vector<100x1xf32>
    %11 = arith.cmpf ole, %4, %10 : vector<100x1xf32>
    %12 = arith.andi %9, %11 : vector<100x1xi1>
    %cst_3 = arith.constant 1.000000e+00 : f32
    %13 = vector.broadcast %cst_3 : f32 to vector<100x1xf32>
    %14 = arith.cmpf oge, %7, %13 : vector<100x1xf32>
    %15 = arith.andi %12, %14 : vector<100x1xi1>
    %cst_4 = arith.constant 8.000000e+00 : f32
    %16 = vector.broadcast %cst_4 : f32 to vector<100x1xf32>
    %17 = arith.cmpf ole, %7, %16 : vector<100x1xf32>
    %18 = arith.andi %15, %17 : vector<100x1xi1>
    %c0 = arith.constant 0 : index
    %c0_5 = arith.constant 0 : index
    %c0_6 = arith.constant 0 : index
    %19 = vector.load %arg1[%c0, %c0_5, %c0_6] : memref<1x100x128xbf16, #tpu.memory_space<vmem>>, vector<1x100x128xbf16>
    %20 = vector.shape_cast %19 : vector<1x100x128xbf16> to vector<100x128xbf16>
    %21 = arith.extf %20 : vector<100x128xbf16> to vector<100x128xf32>
    %c0_7 = arith.constant 0 : index
    %c0_8 = arith.constant 0 : index
    %22 = vector.load %arg2[%c0_7, %c0_8] : memref<1x128xf32, #tpu.memory_space<vmem>>, vector<1x128xf32>
    %23 = vector.broadcast %22 : vector<1x128xf32> to vector<100x128xf32>
    %24 = arith.mulf %21, %23 : vector<100x128xf32>
    %c0_9 = arith.constant 0 : index
    %c0_10 = arith.constant 0 : index
    %25 = vector.load %arg3[%c0_9, %c0_10] : memref<1x128xf32, #tpu.memory_space<vmem>>, vector<1x128xf32>
    %26 = vector.broadcast %25 : vector<1x128xf32> to vector<100x128xf32>
    %27 = arith.addf %24, %26 : vector<100x128xf32>
    %cst_11 = arith.constant 0.000000e+00 : f32
    %28 = vector.broadcast %cst_11 : f32 to vector<100x128xf32>
    %29 = arith.maximumf %27, %28 : vector<100x128xf32>
    %cst_12 = arith.constant 0.000000e+00 : f32
    %30 = vector.shape_cast %18 : vector<100x1xi1> to vector<100x1xi1>
    %31 = vector.broadcast %30 : vector<100x1xi1> to vector<100x128xi1>
    %32 = vector.broadcast %cst_12 : f32 to vector<100x128xf32>
    %33 = arith.select %31, %29, %32 : vector<100x128xi1>, vector<100x128xf32>
    %cst_13 = arith.constant 0.000000e+00 : f32
    %34 = vector.broadcast %cst_13 : f32 to vector<11x128xf32>
    %c0_14 = arith.constant 0 : index
    %c0_15 = arith.constant 0 : index
    %35 = vector.load %arg8[%c0_14, %c0_15] : memref<122x128xf32, #tpu.memory_space<vmem>>, vector<11x128xf32>
    tpu.vector_store %arg8[%c0_14, %c0_15], %34 {strides = array<i32>} : memref<122x128xf32, #tpu.memory_space<vmem>>, vector<11x128xf32>,
    %c111 = arith.constant 111 : index
    %c0_16 = arith.constant 0 : index
    %36 = vector.load %arg8[%c111, %c0_16] : memref<122x128xf32, #tpu.memory_space<vmem>>, vector<11x128xf32>
    tpu.vector_store %arg8[%c111, %c0_16], %34 {strides = array<i32>} : memref<122x128xf32, #tpu.memory_space<vmem>>, vector<11x128xf32>,
    %c11 = arith.constant 11 : index
    %c0_17 = arith.constant 0 : index
    %37 = vector.load %arg8[%c11, %c0_17] : memref<122x128xf32, #tpu.memory_space<vmem>>, vector<100x128xf32>
    tpu.vector_store %arg8[%c11, %c0_17], %33 {strides = array<i32>} : memref<122x128xf32, #tpu.memory_space<vmem>>, vector<100x128xf32>,
    %c0_18 = arith.constant 0 : index
    %c0_19 = arith.constant 0 : index
    %38 = vector.load %arg8[%c0_18, %c0_19] : memref<122x128xf32, #tpu.memory_space<vmem>>, vector<100x128xf32>
    %39 = arith.truncf %38 : vector<100x128xf32> to vector<100x128xbf16>
    %c0_20 = arith.constant 0 : index
    %c0_21 = arith.constant 0 : index
    %c0_22 = arith.constant 0 : index
    %40 = vector.load %arg4[%c0_20, %c0_21, %c0_22] : memref<9x128x128xbf16, #tpu.memory_space<vmem>>, vector<1x128x128xbf16>
    %41 = vector.shape_cast %40 : vector<1x128x128xbf16> to vector<128x128xbf16>
    %cst_23 = arith.constant dense<0.000000e+00> : vector<100x128xf32>
    %42 = tpu.matmul %39, %41, %cst_23 {dimension_numbers = #tpu.dot_dimension_numbers<[1], [0], [0], [1], [0, 0, 1, 1], [], []>} : vector<100x128xbf16>, vector<128x128xbf16>, vector<100x128xf32> -> vector<100x128xf32>
    %c1 = arith.constant 1 : index
    %c0_24 = arith.constant 0 : index
    %43 = vector.load %arg8[%c1, %c0_24] : memref<122x128xf32, #tpu.memory_space<vmem>>, vector<100x128xf32>
    %44 = arith.truncf %43 : vector<100x128xf32> to vector<100x128xbf16>
    %c1_25 = arith.constant 1 : index
    %c0_26 = arith.constant 0 : index
    %c0_27 = arith.constant 0 : index
    %45 = vector.load %arg4[%c1_25, %c0_26, %c0_27] : memref<9x128x128xbf16, #tpu.memory_space<vmem>>, vector<1x128x128xbf16>
    %46 = vector.shape_cast %45 : vector<1x128x128xbf16> to vector<128x128xbf16>
    %cst_28 = arith.constant dense<0.000000e+00> : vector<100x128xf32>
    %47 = tpu.matmul %44, %46, %cst_28 {dimension_numbers = #tpu.dot_dimension_numbers<[1], [0], [0], [1], [0, 0, 1, 1], [], []>} : vector<100x128xbf16>, vector<128x128xbf16>, vector<100x128xf32> -> vector<100x128xf32>
    %48 = arith.addf %42, %47 : vector<100x128xf32>
    %c2 = arith.constant 2 : index
    %c0_29 = arith.constant 0 : index
    %49 = vector.load %arg8[%c2, %c0_29] : memref<122x128xf32, #tpu.memory_space<vmem>>, vector<100x128xf32>
    %50 = arith.truncf %49 : vector<100x128xf32> to vector<100x128xbf16>
    %c2_30 = arith.constant 2 : index
    %c0_31 = arith.constant 0 : index
    %c0_32 = arith.constant 0 : index
    %51 = vector.load %arg4[%c2_30, %c0_31, %c0_32] : memref<9x128x128xbf16, #tpu.memory_space<vmem>>, vector<1x128x128xbf16>
    %52 = vector.shape_cast %51 : vector<1x128x128xbf16> to vector<128x128xbf16>
    %cst_33 = arith.constant dense<0.000000e+00> : vector<100x128xf32>
    %53 = tpu.matmul %50, %52, %cst_33 {dimension_numbers = #tpu.dot_dimension_numbers<[1], [0], [0], [1], [0, 0, 1, 1], [], []>} : vector<100x128xbf16>, vector<128x128xbf16>, vector<100x128xf32> -> vector<100x128xf32>
    %54 = arith.addf %48, %53 : vector<100x128xf32>
    %c10 = arith.constant 10 : index
    %c0_34 = arith.constant 0 : index
    %55 = vector.load %arg8[%c10, %c0_34] : memref<122x128xf32, #tpu.memory_space<vmem>>, vector<100x128xf32>
    %56 = arith.truncf %55 : vector<100x128xf32> to vector<100x128xbf16>
    %c3 = arith.constant 3 : index
    %c0_35 = arith.constant 0 : index
    %c0_36 = arith.constant 0 : index
    %57 = vector.load %arg4[%c3, %c0_35, %c0_36] : memref<9x128x128xbf16, #tpu.memory_space<vmem>>, vector<1x128x128xbf16>
    %58 = vector.shape_cast %57 : vector<1x128x128xbf16> to vector<128x128xbf16>
    %cst_37 = arith.constant dense<0.000000e+00> : vector<100x128xf32>
    %59 = tpu.matmul %56, %58, %cst_37 {dimension_numbers = #tpu.dot_dimension_numbers<[1], [0], [0], [1], [0, 0, 1, 1], [], []>} : vector<100x128xbf16>, vector<128x128xbf16>, vector<100x128xf32> -> vector<100x128xf32>
    %60 = arith.addf %54, %59 : vector<100x128xf32>
    %c11_38 = arith.constant 11 : index
    %c0_39 = arith.constant 0 : index
    %61 = vector.load %arg8[%c11_38, %c0_39] : memref<122x128xf32, #tpu.memory_space<vmem>>, vector<100x128xf32>
    %62 = arith.truncf %61 : vector<100x128xf32> to vector<100x128xbf16>
    %c4 = arith.constant 4 : index
    %c0_40 = arith.constant 0 : index
    %c0_41 = arith.constant 0 : index
    %63 = vector.load %arg4[%c4, %c0_40, %c0_41] : memref<9x128x128xbf16, #tpu.memory_space<vmem>>, vector<1x128x128xbf16>
    %64 = vector.shape_cast %63 : vector<1x128x128xbf16> to vector<128x128xbf16>
    %cst_42 = arith.constant dense<0.000000e+00> : vector<100x128xf32>
    %65 = tpu.matmul %62, %64, %cst_42 {dimension_numbers = #tpu.dot_dimension_numbers<[1], [0], [0], [1], [0, 0, 1, 1], [], []>} : vector<100x128xbf16>, vector<128x128xbf16>, vector<100x128xf32> -> vector<100x128xf32>
    %66 = arith.addf %60, %65 : vector<100x128xf32>
    %c12 = arith.constant 12 : index
    %c0_43 = arith.constant 0 : index
    %67 = vector.load %arg8[%c12, %c0_43] : memref<122x128xf32, #tpu.memory_space<vmem>>, vector<100x128xf32>
    %68 = arith.truncf %67 : vector<100x128xf32> to vector<100x128xbf16>
    %c5 = arith.constant 5 : index
    %c0_44 = arith.constant 0 : index
    %c0_45 = arith.constant 0 : index
    %69 = vector.load %arg4[%c5, %c0_44, %c0_45] : memref<9x128x128xbf16, #tpu.memory_space<vmem>>, vector<1x128x128xbf16>
    %70 = vector.shape_cast %69 : vector<1x128x128xbf16> to vector<128x128xbf16>
    %cst_46 = arith.constant dense<0.000000e+00> : vector<100x128xf32>
    %71 = tpu.matmul %68, %70, %cst_46 {dimension_numbers = #tpu.dot_dimension_numbers<[1], [0], [0], [1], [0, 0, 1, 1], [], []>} : vector<100x128xbf16>, vector<128x128xbf16>, vector<100x128xf32> -> vector<100x128xf32>
    %72 = arith.addf %66, %71 : vector<100x128xf32>
    %c20 = arith.constant 20 : index
    %c0_47 = arith.constant 0 : index
    %73 = vector.load %arg8[%c20, %c0_47] : memref<122x128xf32, #tpu.memory_space<vmem>>, vector<100x128xf32>
    %74 = arith.truncf %73 : vector<100x128xf32> to vector<100x128xbf16>
    %c6 = arith.constant 6 : index
    %c0_48 = arith.constant 0 : index
    %c0_49 = arith.constant 0 : index
    %75 = vector.load %arg4[%c6, %c0_48, %c0_49] : memref<9x128x128xbf16, #tpu.memory_space<vmem>>, vector<1x128x128xbf16>
    %76 = vector.shape_cast %75 : vector<1x128x128xbf16> to vector<128x128xbf16>
    %cst_50 = arith.constant dense<0.000000e+00> : vector<100x128xf32>
    %77 = tpu.matmul %74, %76, %cst_50 {dimension_numbers = #tpu.dot_dimension_numbers<[1], [0], [0], [1], [0, 0, 1, 1], [], []>} : vector<100x128xbf16>, vector<128x128xbf16>, vector<100x128xf32> -> vector<100x128xf32>
    %78 = arith.addf %72, %77 : vector<100x128xf32>
    %c21 = arith.constant 21 : index
    %c0_51 = arith.constant 0 : index
    %79 = vector.load %arg8[%c21, %c0_51] : memref<122x128xf32, #tpu.memory_space<vmem>>, vector<100x128xf32>
    %80 = arith.truncf %79 : vector<100x128xf32> to vector<100x128xbf16>
    %c7 = arith.constant 7 : index
    %c0_52 = arith.constant 0 : index
    %c0_53 = arith.constant 0 : index
    %81 = vector.load %arg4[%c7, %c0_52, %c0_53] : memref<9x128x128xbf16, #tpu.memory_space<vmem>>, vector<1x128x128xbf16>
    %82 = vector.shape_cast %81 : vector<1x128x128xbf16> to vector<128x128xbf16>
    %cst_54 = arith.constant dense<0.000000e+00> : vector<100x128xf32>
    %83 = tpu.matmul %80, %82, %cst_54 {dimension_numbers = #tpu.dot_dimension_numbers<[1], [0], [0], [1], [0, 0, 1, 1], [], []>} : vector<100x128xbf16>, vector<128x128xbf16>, vector<100x128xf32> -> vector<100x128xf32>
    %84 = arith.addf %78, %83 : vector<100x128xf32>
    %c22 = arith.constant 22 : index
    %c0_55 = arith.constant 0 : index
    %85 = vector.load %arg8[%c22, %c0_55] : memref<122x128xf32, #tpu.memory_space<vmem>>, vector<100x128xf32>
    %86 = arith.truncf %85 : vector<100x128xf32> to vector<100x128xbf16>
    %c8 = arith.constant 8 : index
    %c0_56 = arith.constant 0 : index
    %c0_57 = arith.constant 0 : index
    %87 = vector.load %arg4[%c8, %c0_56, %c0_57] : memref<9x128x128xbf16, #tpu.memory_space<vmem>>, vector<1x128x128xbf16>
    %88 = vector.shape_cast %87 : vector<1x128x128xbf16> to vector<128x128xbf16>
    %cst_58 = arith.constant dense<0.000000e+00> : vector<100x128xf32>
    %89 = tpu.matmul %86, %88, %cst_58 {dimension_numbers = #tpu.dot_dimension_numbers<[1], [0], [0], [1], [0, 0, 1, 1], [], []>} : vector<100x128xbf16>, vector<128x128xbf16>, vector<100x128xf32> -> vector<100x128xf32>
    %90 = arith.addf %84, %89 : vector<100x128xf32>
    %c0_59 = arith.constant 0 : index
    %c0_60 = arith.constant 0 : index
    %91 = vector.load %arg5[%c0_59, %c0_60] : memref<1x128xf32, #tpu.memory_space<vmem>>, vector<1x128xf32>
    %92 = vector.broadcast %91 : vector<1x128xf32> to vector<100x128xf32>
    %93 = arith.addf %90, %92 : vector<100x128xf32>
    %cst_61 = arith.constant 0.000000e+00 : f32
    %94 = vector.shape_cast %18 : vector<100x1xi1> to vector<100x1xi1>
    %95 = vector.broadcast %94 : vector<100x1xi1> to vector<100x128xi1>
    %96 = vector.broadcast %cst_61 : f32 to vector<100x128xf32>
    %97 = arith.select %95, %93, %96 : vector<100x128xi1>, vector<100x128xf32>
    %98 = arith.truncf %97 : vector<100x128xf32> to vector<100x128xbf16>
    %c0_62 = arith.constant 0 : index
    %c0_63 = arith.constant 0 : index
    %c0_64 = arith.constant 0 : index
    %99 = vector.load %arg6[%c0_62, %c0_63, %c0_64] : memref<1x100x128xbf16, #tpu.memory_space<vmem>>, vector<1x100x128xbf16>
    %100 = vector.shape_cast %99 : vector<1x100x128xbf16> to vector<100x128xbf16>
    %101 = vector.shape_cast %98 : vector<100x128xbf16> to vector<1x100x128xbf16>
    tpu.vector_store %arg6[%c0_62, %c0_63, %c0_64], %101 {strides = array<i32>} : memref<1x100x128xbf16, #tpu.memory_space<vmem>>, vector<1x100x128xbf16>,
    %cst_65 = arith.constant dense<0.000000e+00> : vector<128xf32>
    %102 = vector.multi_reduction <add>, %97, %cst_65 [0] : vector<100x128xf32> to vector<128xf32>
    %103 = vector.shape_cast %102 : vector<128xf32> to vector<1x128xf32>
    %c0_66 = arith.constant 0 : index
    %c0_67 = arith.constant 0 : index
    %c0_68 = arith.constant 0 : index
    %104 = vector.load %arg7[%c0_66, %c0_67, %c0_68] : memref<1x2x128xf32, #tpu.memory_space<vmem>>, vector<1x1x128xf32>
    %105 = vector.shape_cast %104 : vector<1x1x128xf32> to vector<1x128xf32>
    %106 = vector.shape_cast %103 : vector<1x128xf32> to vector<1x1x128xf32>
    tpu.vector_store %arg7[%c0_66, %c0_67, %c0_68], %106 {strides = array<i32>} : memref<1x2x128xf32, #tpu.memory_space<vmem>>, vector<1x1x128xf32>,
    %107 = arith.mulf %97, %97 : vector<100x128xf32>
    %cst_69 = arith.constant dense<0.000000e+00> : vector<128xf32>
    %108 = vector.multi_reduction <add>, %107, %cst_69 [0] : vector<100x128xf32> to vector<128xf32>
    %109 = vector.shape_cast %108 : vector<128xf32> to vector<1x128xf32>
    %c0_70 = arith.constant 0 : index
    %c1_71 = arith.constant 1 : index
    %c0_72 = arith.constant 0 : index
    %110 = vector.load %arg7[%c0_70, %c1_71, %c0_72] : memref<1x2x128xf32, #tpu.memory_space<vmem>>, vector<1x1x128xf32>
    %111 = vector.shape_cast %110 : vector<1x1x128xf32> to vector<1x128xf32>
    %112 = vector.shape_cast %109 : vector<1x128xf32> to vector<1x1x128xf32>
    tpu.vector_store %arg7[%c0_70, %c1_71, %c0_72], %112 {strides = array<i32>} : memref<1x2x128xf32, #tpu.memory_space<vmem>>, vector<1x1x128xf32>,
    return
  }
  func.func @transform_0(%arg0: i32) -> (i32, i32, i32) {
    %c0_i32 = arith.constant 0 : i32
    %c0_i32_0 = arith.constant 0 : i32
    %c0_i32_1 = arith.constant 0 : i32
    return %arg0, %c0_i32, %c0_i32_0 : i32, i32, i32
  }
  func.func @transform_1(%arg0: i32) -> (i32, i32) {
    %c0_i32 = arith.constant 0 : i32
    %c0_i32_0 = arith.constant 0 : i32
    %c0_i32_1 = arith.constant 0 : i32
    return %c0_i32, %c0_i32_0 : i32, i32
  }
  func.func @transform_2(%arg0: i32) -> (i32, i32) {
    %c0_i32 = arith.constant 0 : i32
    %c0_i32_0 = arith.constant 0 : i32
    %c0_i32_1 = arith.constant 0 : i32
    return %c0_i32, %c0_i32_0 : i32, i32
  }
  func.func @transform_3(%arg0: i32) -> (i32, i32, i32) {
    %c0_i32 = arith.constant 0 : i32
    %c0_i32_0 = arith.constant 0 : i32
    %c0_i32_1 = arith.constant 0 : i32
    %c0_i32_2 = arith.constant 0 : i32
    return %c0_i32, %c0_i32_0, %c0_i32_1 : i32, i32, i32
  }
  func.func @transform_4(%arg0: i32) -> (i32, i32) {
    %c0_i32 = arith.constant 0 : i32
    %c0_i32_0 = arith.constant 0 : i32
    %c0_i32_1 = arith.constant 0 : i32
    return %c0_i32, %c0_i32_0 : i32, i32
  }
  func.func @transform_5(%arg0: i32) -> (i32, i32, i32) {
    %c0_i32 = arith.constant 0 : i32
    %c0_i32_0 = arith.constant 0 : i32
    %c0_i32_1 = arith.constant 0 : i32
    return %arg0, %c0_i32, %c0_i32_0 : i32, i32, i32
  }
  func.func @transform_6(%arg0: i32) -> (i32, i32, i32) {
    %c0_i32 = arith.constant 0 : i32
    %c0_i32_0 = arith.constant 0 : i32
    %c0_i32_1 = arith.constant 0 : i32
    return %arg0, %c0_i32, %c0_i32_0 : i32, i32, i32
  }
}

</mosaic_0001>

<bundles_post_ra>
// kernel: down_forward.5
= control target key start
LH: loop header
LB: loop body
LE: loop exit
PB: predicated region body
PF: predicated region fallthrough
CT: control target
= control target key end

     0   :  { %s396_s12 = smov 0   ;;  %s447_s0 = inlined_call_operand.vmem [shape: bf16[2,100,128], index: 0, kind: input, shape index: {}]   ;;  %s448_s1 = inlined_call_operand.vmem [shape: f32[1,128], index: 1, kind: input, shape index: {}]   ;;  %s449_s2 = inlined_call_operand.vmem [shape: f32[1,128], index: 2, kind: input, shape index: {}]   ;;  %s450_s3 = inlined_call_operand.vmem [shape: f32[2,100,128], index: 3, kind: output, shape index: {}]  }
   0x1 LB: > { %s318_s13 = sadd.s32 4294967295, %s374_s12   ;;  %p322_p0 = scmp.ge.s32.totalorder %s374_s12, 1  ;;  %s374_s12 = sphi %s396_s12, %s13_s12  }
   0x2   : > { %p137_p1 = scmp.lt.s32.totalorder %s374_s12, 3 }
   0x4   : > { %p138_p2 = pnand %p322_p0, %p137_p1 }
   0x5   : > { %p161_p3 = scmp.lt.s32.totalorder (!%p138_p2), %s318_s13, 1  ;;  %v325_v0 = vld [vmem:[%s448_s1] ss:$0 sm:$0xff] (!%p138_p2) }
   0x6   : > { %141 = sbr.rel (%p138_p2) target bundleno = 37 (0x25), region = 32  ;;  %v326_v9 = vld [vmem:[%s449_s2] ss:$0 sm:$0xff] (!%p138_p2) }
   0xd   : > { %s452_s13 = smov (!%p161_p3, %s318_s13), 1 }
   0xe   : > { %s358_s14 = smul.u32 52, %s452_s13 }
   0xf   : > { %s359_s20 = smul.u32 104, %s452_s13 }
  0x10   : > { %s410_s17 = scalar_lea.vmem %s447_s0, %s358_s14 }
  0x11   : > { %v330_v1 = vld [vmem:[%s410_s17] sm:$0xff]   ;;  %v353_v2 = vld [vmem:[%s410_s17 + $0x8] sm:$0xff]   ;;  %v354_v3 = vld [vmem:[%s410_s17 + $0x10] sm:$0xff]   ;;  %s426_s25 = scalar_lea.vmem %s450_s3, %s359_s20 }
  0x12   : > { %v331_v4 = vunpack.c.l.bf16 %v330_v1  ;;  %v332_v5 = vunpack.c.h.bf16 %v330_v1  ;;  %v335_v6 = vunpack.c.l.bf16 %v353_v2  ;;  %v336_v7 = vunpack.c.h.bf16 %v353_v2  ;;  %v355_v8 = vld [vmem:[%s410_s17 + $0x18] sm:$0xff]   ;;  %v356_v30 = vld [vmem:[%s410_s17 + $0x20] sm:$0xff]   ;;  %v357_v31 = vld [vmem:[%s410_s17 + $0x28] sm:$0xff]  }
  0x13   : > { %v339_v10 = vunpack.c.l.bf16 %v354_v3  ;;  %v340_v11 = vunpack.c.h.bf16 %v354_v3  ;;  %v343_v12 = vunpack.c.l.bf16 %v355_v8  ;;  %v344_v13 = vunpack.c.h.bf16 %v355_v8  ;;  %v183_v36 = vld [vmem:[%s410_s17 + $0x30] sm:$0x3] }
  0x14   : > { %v204_v14 = vmul.f32 %v331_v4, %v325_v0  ;;  %v205_v15 = vmul.f32 %v332_v5, %v325_v0  ;;  %v206_v16 = vmul.f32 %v335_v6, %v325_v0  ;;  %v207_v17 = vmul.f32 %v336_v7, %v325_v0 }
  0x15   : > { %v208_v18 = vmul.f32 %v339_v10, %v325_v0  ;;  %v209_v19 = vmul.f32 %v340_v11, %v325_v0  ;;  %v210_v20 = vmul.f32 %v343_v12, %v325_v0  ;;  %v211_v21 = vmul.f32 %v344_v13, %v325_v0 }
  0x16   : > { %v224_v22 = vadd.f32 %v326_v9, %v204_v14  ;;  %v225_v23 = vadd.f32 %v326_v9, %v205_v15  ;;  %v226_v24 = vadd.f32 %v326_v9, %v206_v16  ;;  %v227_v25 = vadd.f32 %v326_v9, %v207_v17 }
  0x17   : > { %v228_v26 = vadd.f32 %v326_v9, %v208_v18  ;;  %v229_v27 = vadd.f32 %v326_v9, %v209_v19  ;;  %v230_v28 = vadd.f32 %v326_v9, %v210_v20  ;;  %v231_v29 = vadd.f32 %v326_v9, %v211_v21 }
  0x18   : > { %v237_v32 = vmax.f32 %v224_v22, 0.0  ;;  %v238_v33 = vmax.f32 %v225_v23, 0.0  ;;  %v239_v34 = vmax.f32 %v226_v24, 0.0  ;;  %v240_v35 = vmax.f32 %v227_v25, 0.0 }
  0x19   : > { %v241_v37 = vmax.f32 %v228_v26, 0.0  ;;  %v242_v38 = vmax.f32 %v229_v27, 0.0  ;;  %v243_v39 = vmax.f32 %v230_v28, 0.0  ;;  %v244_v40 = vmax.f32 %v231_v29, 0.0 }
  0x1a   : > { %250 = vst [vmem:[%s426_s25] sm:$0xff] %v237_v32  ;;  %251 = vst [vmem:[%s426_s25 + $0x8] sm:$0xff] %v238_v33  ;;  %v347_v41 = vunpack.c.l.bf16 %v356_v30  ;;  %v348_v42 = vunpack.c.h.bf16 %v356_v30  ;;  %v351_v43 = vunpack.c.l.bf16 %v357_v31  ;;  %v352_v44 = vunpack.c.h.bf16 %v357_v31 }
  0x1b   : > { %252 = vst [vmem:[%s426_s25 + $0x10] sm:$0xff] %v239_v34  ;;  %253 = vst [vmem:[%s426_s25 + $0x18] sm:$0xff] %v240_v35  ;;  %v196_v45 = vunpack.c.l.bf16 %v183_v36 }
  0x1c   : > { %254 = vst [vmem:[%s426_s25 + $0x20] sm:$0xff] %v241_v37  ;;  %255 = vst [vmem:[%s426_s25 + $0x28] sm:$0xff] %v242_v38  ;;  %v212_v46 = vmul.f32 %v347_v41, %v325_v0  ;;  %v213_v47 = vmul.f32 %v348_v42, %v325_v0  ;;  %v214_v48 = vmul.f32 %v351_v43, %v325_v0 }
  0x1d   : > { %256 = vst [vmem:[%s426_s25 + $0x30] sm:$0xff] %v243_v39  ;;  %257 = vst [vmem:[%s426_s25 + $0x38] sm:$0xff] %v244_v40  ;;  %v215_v49 = vmul.f32 %v352_v44, %v325_v0  ;;  %v216_v50 = vmul.f32 %v325_v0, %v196_v45 }
  0x1e   : > { %v232_v51 = vadd.f32 %v326_v9, %v212_v46  ;;  %v233_v52 = vadd.f32 %v326_v9, %v213_v47  ;;  %v234_v53 = vadd.f32 %v326_v9, %v214_v48 }
  0x1f   : > { %v235_v54 = vadd.f32 %v326_v9, %v215_v49  ;;  %v236_v55 = vadd.f32 %v326_v9, %v216_v50 }
  0x20   : > { %v245_v56 = vmax.f32 %v232_v51, 0.0  ;;  %v246_v57 = vmax.f32 %v233_v52, 0.0  ;;  %v247_v58 = vmax.f32 %v234_v53, 0.0 }
  0x21   : > { %v248_v59 = vmax.f32 %v235_v54, 0.0  ;;  %v249_v60 = vmax.f32 %v236_v55, 0.0 }
  0x22   : > { %258 = vst [vmem:[%s426_s25 + $0x40] sm:$0xff] %v245_v56  ;;  %259 = vst [vmem:[%s426_s25 + $0x48] sm:$0xff] %v246_v57 }
  0x23   : > { %260 = vst [vmem:[%s426_s25 + $0x50] sm:$0xff] %v247_v58  ;;  %261 = vst [vmem:[%s426_s25 + $0x58] sm:$0xff] %v248_v59 }
  0x24   : > { %262 = vst [vmem:[%s426_s25 + $0x60] sm:$0xf] %v249_v60 }
  0x25 PF: > { %s13_s12 = sadd.s32 1, %s374_s12  }
  0x26   : > { %p10_p4 = scmp.ge.s32.totalorder %s13_s12, 4  }
  0x28   :  { %12 = sbr.rel (!%p10_p4) target bundleno = 1 (0x1), region = 62 }

// kernel: down_forward.3
= control target key start
LH: loop header
LB: loop body
LE: loop exit
PB: predicated region body
PF: predicated region fallthrough
CT: control target
= control target key end

     0   :  { %s2656_s15 = smov 0   ;;  %s3544_s0 = inlined_call_operand.vmem [shape: bf16[2,100,16], index: 0, kind: input, shape index: {}]   ;;  %s3545_s1 = inlined_call_operand.vmem [shape: bf16[9,4,128], index: 1, kind: input, shape index: {}]   ;;  %s3546_s2 = inlined_call_operand.vmem [shape: f32[1,128], index: 2, kind: input, shape index: {}]   ;;  %s3547_s3 = inlined_call_operand.vmem [shape: bf16[2,100,128], index: 3, kind: output, shape index: {0}]   ;;  %s3548_s4 = inlined_call_operand.vmem [shape: f32[2,2,128], index: 4, kind: output, shape index: {1}]  }
   0x1 LB: > { %s2119_s16 = sadd.s32 4294967295, %s2625_s15   ;;  %p2123_p0 = scmp.ge.s32.totalorder %s2625_s15, 1  ;;  %s2625_s15 = sphi %s2656_s15, %s15_s15  }
   0x2   : > { %p165_p1 = scmp.lt.s32.totalorder %s2625_s15, 3 }
   0x4   : > { %p166_p2 = pnand %p2123_p0, %p165_p1 }
   0x5   : > { %p195_p3 = scmp.lt.s32.totalorder (!%p166_p2), %s2119_s16, 1  ;;  %s2627_s21 = smov (!%p166_p2), 124   ;;  %vm353_vm0 = vcmask (!%p166_p2), 31744   ;;  %vm355_vm1 = vcmask (!%p166_p2), 26624   ;;  %v2628_v12 = vmov (!%p166_p2), 0.0   ;;  %vm621_vm2 = vcmask (!%p166_p2), 1041408  }
   0x6   : > { %169 = sbr.rel (%p166_p2) target bundleno = 754 (0x2f2), region = 32  ;;  %2334 = vmatprep.subr.bf16.mxu0 (!%p166_p2), %v2628_v12  ;;  %354 = vst.msk [vmem:[#allocation2] sm:$0xff] (!%p166_p2), %vm353_vm0, %v2628_v12  ;;  %357 = vst.msk [vmem:[#allocation2 + $0x6f] sm:$0xff] (!%p166_p2), %vm353_vm0, %v2628_v12  ;;  %2604 = vmatprep.subr.bf16.mxu1 (!%p166_p2), %v2628_v12  ;;  %v2127_v13 = vld [vmem:[%s3545_s1 + $0x2] sm:$0x3] (!%p166_p2)  ;;  %s2629_s24 = smov (!%p166_p2), 120  }
   0x7   : > { %356 = vst.msk [vmem:[#allocation2 + $0x8] sm:$0x7] (!%p166_p2), %vm355_vm1, %v2628_v12  ;;  %358 = vst.msk [vmem:[#allocation2 + $0x77] sm:$0x7] (!%p166_p2), %vm355_vm1, %v2628_v12  ;;  %v623_v16 = vsel (!%p166_p2), %vm621_vm2, %v2127_v13, 0  ;;  %vm2630_vm3 = vmmov (!%p166_p2), 0  }
   0x8   : > { %2335 = vmatpush3.bf16.msra.mxu0 (!%p166_p2), %v623_v16  ;;  %2605 = vmatpush3.bf16.msra.mxu1 (!%p166_p2), %v623_v16  ;;  %v2142_v54 = vld [vmem:[%s3545_s1 + $0x4] sm:$0x3] (!%p166_p2)  ;;  %vm384_vm4 = vcmask (!%p166_p2), 27648  }
   0x9   : > { %2394 = vmatprep.subr.bf16.mxu0 (!%p166_p2), %v2628_v12  ;;  %2364 = vmatprep.subr.bf16.mxu1 (!%p166_p2), %v2628_v12  ;;  %v869_v63 = vsel (!%p166_p2), %vm621_vm2, %v2142_v54, 0 }
   0xa   : > { %2336 = vmatprep.mubr.msk.bf16.mxu0 (!%p166_p2), %vm2630_vm3, %v2628_v12  ;;  %2352 = vmatprep.mubr.msk.bf16.mxu1 (!%p166_p2), %vm2630_vm3, %v2628_v12 }
   0xd   : > { %s3600_s16 = smov (!%p195_p3, %s2119_s16), 1 }
   0xe   : > { %s2606_s17 = smul.u32 52, %s3600_s16  ;;  %v578_v53 = vld [vmem:[#allocation2 + $0x1] sm:$0xff] }
  0x10   : > { %s2672_s20 = scalar_lea.vmem %s3544_s0, %s2606_s17  ;;  %s3253_s22 = scalar_lea.vmem %s3547_s3, %s2606_s17 }
  0x11   : > { %v210_v0 = vld [vmem:[%s2672_s20] sm:$0xf]  ;;  %v217_v1 = vld [vmem:[%s2672_s20 + $0x1c] sm:$0xf]  ;;  %v216_v2 = vld [vmem:[%s2672_s20 + $0x18] sm:$0xf] }
  0x12   : > { %236 = vrot.lane.b32.xlu0 %v210_v0, %s2627_s21  ;;  %250 = vrot.lane.b32.xlu1 %v217_v1, %s2627_s21  ;;  %v218_v3 = vld [vmem:[%s2672_s20 + $0x20] sm:$0xf]  ;;  %v211_v4 = vld [vmem:[%s2672_s20 + $0x4] sm:$0xf]  ;;  %s2126_s17 = sshll.u32 %s3600_s16, 1 }
  0x13   : > { %v212_v5 = vld [vmem:[%s2672_s20 + $0x8] sm:$0xf]  ;;  %v219_v6 = vld [vmem:[%s2672_s20 + $0x24] sm:$0xf]  ;;  %v213_v8 = vld [vmem:[%s2672_s20 + $0xc] sm:$0xf]  ;;  %s208_s25 = scalar_lea.vmem %s3548_s4, %s2126_s17 }
  0x14   : > { %v220_v7 = vld [vmem:[%s2672_s20 + $0x28] sm:$0xf]  ;;  %v214_v9 = vld [vmem:[%s2672_s20 + $0x10] sm:$0xf]  ;;  %v221_v10 = vld [vmem:[%s2672_s20 + $0x2c] sm:$0xf] }
  0x15   : > { %v215_v11 = vld [vmem:[%s2672_s20 + $0x14] sm:$0xf]  ;;  %v2733_v39 = vld [vmem:[%s2672_s20 + $0x30] sm:$0x3] }
  0x16   : > { %248 = vrot.lane.b32.xlu0 %v216_v2, %s2627_s21  ;;  %252 = vrot.lane.b32.xlu1 %v218_v3, %s2627_s21 }
  0x1a   : > { %238 = vrot.lane.b32.xlu0 %v211_v4, %s2627_s21  ;;  %240 = vrot.lane.b32.xlu1 %v212_v5, %s2627_s21 }
  0x1e   : > { %254 = vrot.lane.b32.xlu0 %v219_v6, %s2627_s21  ;;  %256 = vrot.lane.b32.xlu1 %v220_v7, %s2627_s21 }
  0x22   : > { %242 = vrot.lane.b32.xlu0 %v213_v8, %s2627_s21  ;;  %244 = vrot.lane.b32.xlu1 %v214_v9, %s2627_s21 }
  0x26   : > { %258 = vrot.lane.b32.xlu0 %v221_v10, %s2627_s21  ;;  %246 = vrot.lane.b32.xlu1 %v215_v11, %s2627_s21 }
  0x84   : > { %v237_v14 = vpop.permute.xlu0 %236  ;;  %v251_v15 = vpop.permute.xlu1 %250 }
  0x85   : > { %v275_v17 = vmax.bf16 %v237_v14, %v210_v0  ;;  %v282_v18 = vmax.bf16 %v251_v15, %v217_v1 }
  0x87   : > { %301 = vrot.lane.b32.xlu0 %v275_v17, %s2629_s24 }
  0x88   : > { %v249_v19 = vpop.permute.xlu0 %248  ;;  %v253_v20 = vpop.permute.xlu1 %252 }
  0x89   : > { %v281_v21 = vmax.bf16 %v249_v19, %v216_v2  ;;  %v283_v22 = vmax.bf16 %v253_v20, %v218_v3 }
  0x8b   : > { %315 = vrot.lane.b32.xlu0 %v282_v18, %s2629_s24  ;;  %313 = vrot.lane.b32.xlu1 %v281_v21, %s2629_s24 }
  0x8c   : > { %v239_v23 = vpop.permute.xlu0 %238  ;;  %v241_v24 = vpop.permute.xlu1 %240 }
  0x8d   : > { %v276_v25 = vmax.bf16 %v239_v23, %v211_v4  ;;  %v277_v26 = vmax.bf16 %v241_v24, %v212_v5 }
  0x8f   : > { %317 = vrot.lane.b32.xlu1 %v283_v22, %s2629_s24  ;;  %303 = vrot.lane.b32.xlu0 %v276_v25, %s2629_s24 }
  0x90   : > { %v255_v27 = vpop.permute.xlu0 %254  ;;  %v257_v28 = vpop.permute.xlu1 %256 }
  0x91   : > { %v284_v29 = vmax.bf16 %v255_v27, %v219_v6  ;;  %v285_v30 = vmax.bf16 %v257_v28, %v220_v7  ;;  %v577_v6 = vld [vmem:[%s3545_s1] sm:$0x3] }
  0x93   : > { %305 = vrot.lane.b32.xlu1 %v277_v26, %s2629_s24  ;;  %319 = vrot.lane.b32.xlu0 %v284_v29, %s2629_s24 }
  0x94   : > { %v243_v31 = vpop.permute.xlu0 %242  ;;  %v245_v32 = vpop.permute.xlu1 %244 }
  0x95   : > { %v278_v33 = vmax.bf16 %v243_v31, %v213_v8  ;;  %v2725_v34 = vmax.bf16 %v245_v32, %v214_v9 }
  0x97   : > { %321 = vrot.lane.b32.xlu1 %v285_v30, %s2629_s24  ;;  %307 = vrot.lane.b32.xlu0 %v278_v33, %s2629_s24 }
  0x98   : > { %v259_v35 = vpop.permute.xlu0 %258  ;;  %v247_v36 = vpop.permute.xlu1 %246 }
  0x99   : > { %v286_v37 = vmax.bf16 %v259_v35, %v221_v10  ;;  %v2730_v38 = vmax.bf16 %v247_v36, %v215_v11 }
  0x9b   : > { %309 = vrot.lane.b32.xlu1 %v2725_v34, %s2629_s24  ;;  %323 = vrot.lane.b32.xlu0 %v286_v37, %s2629_s24 }
  0x9f   : > { %311 = vrot.lane.b32.xlu1 %v2730_v38, %s2629_s24  ;;  %260 = vrot.lane.b32.xlu0 %v2733_v39, %s2627_s21 }
  0xf9   : > { %v302_v40 = vpop.permute.xlu0 %301 }
  0xfa   : > { %v340_v41 = vmax.bf16 %v302_v40, %v275_v17  ;;  %v735_v17 = vsel %vm621_vm2, %v577_v6, 0 }
  0xfc   : > { %v359_v42 = vunpack.c.l.bf16 %v340_v41  ;;  %v2150_v41 = vld [vmem:[%s3545_s1 + $0x6] sm:$0x3] }
  0xfd   : > { %v314_v43 = vpop.permute.xlu1 %313  ;;  %v316_v44 = vpop.permute.xlu0 %315 }
  0xfe   : > { %372 = vst.msk [vmem:[#allocation2 + $0xb] sm:$0xff] %vm353_vm0, %v359_v42  ;;  %v346_v45 = vmax.bf16 %v314_v43, %v281_v21  ;;  %v347_v46 = vmax.bf16 %v316_v44, %v282_v18  ;;  %v1016_v43 = vsel %vm621_vm2, %v2150_v41, 0  ;;  %v825_v44 = vld [vmem:[#allocation2 + $0x2] sm:$0xff] }
 0x100   : > { %v365_v47 = vunpack.c.l.bf16 %v346_v45  ;;  %v366_v48 = vunpack.c.l.bf16 %v347_v46  ;;  %v2158_v46 = vld [vmem:[%s3545_s1 + $0x8] sm:$0x3] }
 0x101   : > { %v318_v49 = vpop.permute.xlu1 %317  ;;  %v304_v50 = vpop.permute.xlu0 %303 }
 0x102   : > { %378 = vst.msk [vmem:[#allocation2 + $0x3b] sm:$0xff] %vm353_vm0, %v365_v47  ;;  %379 = vst.msk [vmem:[#allocation2 + $0x43] sm:$0xff] %vm353_vm0, %v366_v48  ;;  %v348_v51 = vmax.bf16 %v318_v49, %v283_v22  ;;  %v341_v52 = vmax.bf16 %v304_v50, %v276_v25  ;;  %v1163_v48 = vsel %vm621_vm2, %v2158_v46, 0 }
 0x104   : > { %v367_v55 = vunpack.c.l.bf16 %v348_v51  ;;  %v360_v56 = vunpack.c.l.bf16 %v341_v52 }
 0x105   : > { %v306_v57 = vpop.permute.xlu1 %305  ;;  %v320_v58 = vpop.permute.xlu0 %319  ;;  %v579_v59 = vld [vmem:[#allocation2 + $0x9] sm:$0xff] }
 0x106   : > { %380 = vst.msk [vmem:[#allocation2 + $0x4b] sm:$0xff] %vm353_vm0, %v367_v55  ;;  %373 = vst.msk [vmem:[#allocation2 + $0x13] sm:$0xff] %vm353_vm0, %v360_v56  ;;  %v342_v60 = vmax.bf16 %v306_v57, %v277_v26  ;;  %v349_v61 = vmax.bf16 %v320_v58, %v284_v29  ;;  %v591_v62 = vpack.c.bf16 %v579_v59, %v578_v53  ;;  %v558_v40 = vld [vmem:[#allocation2 + $0x8] sm:$0xff] }
 0x107   : > { %v2793_v45 = vld [vmem:[#allocation2 + $0xa] sm:$0xff] }
 0x108   : > { %v361_v0 = vunpack.c.l.bf16 %v342_v60  ;;  %v368_v1 = vunpack.c.l.bf16 %v349_v61  ;;  %2337 = vmatmul.mubr.msk.bf16.vlgmr.msra.gmra.mrb[0].mxu0 %vm353_vm0, %v591_v62  ;;  %v838_v47 = vpack.c.bf16 %v2793_v45, %v825_v44 }
 0x109   : > { %v322_v2 = vpop.permute.xlu1 %321  ;;  %v308_v3 = vpop.permute.xlu0 %307  ;;  %2395 = vmatpush3.bf16.msra.mxu0 %v869_v63  ;;  %2340 = vmatprep.mubr.msk.bf16.mxu0 %vm2630_vm3, %v2628_v12  ;;  %v586_v11 = vld [vmem:[#allocation2 + $0x41] sm:$0xff] }
 0x10a   : > { %374 = vst.msk [vmem:[#allocation2 + $0x1b] sm:$0xff] %vm353_vm0, %v361_v0  ;;  %381 = vst.msk [vmem:[#allocation2 + $0x53] sm:$0xff] %vm353_vm0, %v368_v1  ;;  %v350_v4 = vmax.bf16 %v322_v2, %v285_v30  ;;  %v343_v5 = vmax.bf16 %v308_v3, %v278_v33  ;;  %2454 = vmatprep.subr.bf16.mxu0 %v2628_v12 }
 0x10c   : > { %v369_v7 = vunpack.c.l.bf16 %v350_v4  ;;  %v362_v8 = vunpack.c.l.bf16 %v343_v5  ;;  %v565_v4 = vld [vmem:[#allocation2 + $0x40] sm:$0xff] }
 0x10d   : > { %v310_v9 = vpop.permute.xlu1 %309  ;;  %v324_v10 = vpop.permute.xlu0 %323  ;;  %v587_v13 = vld [vmem:[#allocation2 + $0x49] sm:$0xff]  ;;  %v580_v22 = vld [vmem:[#allocation2 + $0x11] sm:$0xff] }
 0x10e   : > { %382 = vst.msk [vmem:[#allocation2 + $0x5b] sm:$0xff] %vm353_vm0, %v369_v7  ;;  %375 = vst.msk [vmem:[#allocation2 + $0x23] sm:$0xff] %vm353_vm0, %v362_v8  ;;  %v344_v14 = vmax.bf16 %v310_v9, %v2725_v34  ;;  %v351_v15 = vmax.bf16 %v324_v10, %v286_v37  ;;  %v595_v16 = vpack.c.bf16 %v587_v13, %v586_v11  ;;  %v559_v50 = vld [vmem:[#allocation2 + $0x10] sm:$0xff]  ;;  %v566_v3 = vld [vmem:[#allocation2 + $0x48] sm:$0xff] }
 0x10f   : > { %v827_v53 = vld [vmem:[#allocation2 + $0x12] sm:$0xff]  ;;  %v574_v5 = vpack.c.bf16 %v566_v3, %v565_v4  ;;  %v2835_v6 = vld [vmem:[#allocation2 + $0x4a] sm:$0xff]  ;;  %v833_v7 = vld [vmem:[#allocation2 + $0x42] sm:$0xff] }
 0x110   : > { %v363_v18 = vunpack.c.l.bf16 %v344_v14  ;;  %v370_v19 = vunpack.c.l.bf16 %v351_v15  ;;  %2353 = vmatmul.mubr.msk.bf16.vlgmr.msra.gmra.mrb[0].mxu1 %vm353_vm0, %v595_v16  ;;  %v842_v8 = vpack.c.bf16 %v2835_v6, %v833_v7 }
 0x111   : > { %v312_v20 = vpop.permute.xlu1 %311  ;;  %v261_v21 = vpop.permute.xlu0 %260  ;;  %v581_v23 = vld [vmem:[#allocation2 + $0x19] sm:$0xff]  ;;  %2365 = vmatpush3.bf16.msra.mxu1 %v735_v17  ;;  %2356 = vmatprep.mubr.msk.bf16.mxu1 %vm2630_vm3, %v2628_v12  ;;  %v588_v28 = vld [vmem:[#allocation2 + $0x51] sm:$0xff] }
 0x112   : > { %376 = vst.msk [vmem:[#allocation2 + $0x2b] sm:$0xff] %vm353_vm0, %v363_v18  ;;  %383 = vst.msk [vmem:[#allocation2 + $0x63] sm:$0xff] %vm353_vm0, %v370_v19  ;;  %v345_v24 = vmax.bf16 %v312_v20, %v2730_v38  ;;  %v2768_v25 = vmax.bf16 %v261_v21, %v2733_v39  ;;  %v592_v26 = vpack.c.bf16 %v581_v23, %v580_v22  ;;  %2424 = vmatprep.subr.bf16.mxu1 %v2628_v12  ;;  %v557_v39 = vld [vmem:[#allocation2] sm:$0xff]  ;;  %v560_v49 = vld [vmem:[#allocation2 + $0x18] sm:$0xff] }
 0x113   : > { %v570_v42 = vpack.c.bf16 %v558_v40, %v557_v39  ;;  %v571_v51 = vpack.c.bf16 %v560_v49, %v559_v50  ;;  %v2808_v52 = vld [vmem:[#allocation2 + $0x1a] sm:$0xff]  ;;  %v567_v10 = vld [vmem:[#allocation2 + $0x50] sm:$0xff]  ;;  %v2166_v20 = vld [vmem:[%s3545_s1 + $0xa] sm:$0x3]  ;;  %v985_v21 = vpack.c.bf16 %v827_v53, %v2793_v45 }
 0x114   : > { %v364_v27 = vunpack.c.l.bf16 %v345_v24  ;;  %2341 = vmatmul.mubr.msk.bf16.gmra.mrb[4].mxu0 %vm353_vm0, %v592_v26  ;;  %325 = vrot.lane.b32.xlu1 %v2768_v25, %s2629_s24  ;;  %v839_v54 = vpack.c.bf16 %v2808_v52, %v827_v53  ;;  %v835_v14 = vld [vmem:[#allocation2 + $0x52] sm:$0xff]  ;;  %v1310_v22 = vsel %vm621_vm2, %v2166_v20, 0  ;;  %v2174_v24 = vld [vmem:[%s3545_s1 + $0xc] sm:$0x3]  ;;  %v1126_v39 = vld [vmem:[#allocation2 + $0x43] sm:$0xff] }
 0x115   : > { %v589_v29 = vld [vmem:[#allocation2 + $0x59] sm:$0xff]  ;;  %2344 = vmatprep.mubr.msk.bf16.mxu0 %vm2630_vm3, %v2628_v12  ;;  %v582_v31 = vld [vmem:[#allocation2 + $0x21] sm:$0xff]  ;;  %v1119_v26 = vld [vmem:[#allocation2 + $0xb] sm:$0xff]  ;;  %v989_v41 = vpack.c.bf16 %v835_v14, %v2835_v6 }
 0x116   : > { %377 = vst.msk [vmem:[#allocation2 + $0x33] sm:$0xff] %vm353_vm0, %v364_v27  ;;  %v596_v30 = vpack.c.bf16 %v589_v29, %v588_v28  ;;  %v561_v56 = vld [vmem:[#allocation2 + $0x20] sm:$0xff]  ;;  %v568_v9 = vld [vmem:[#allocation2 + $0x58] sm:$0xff]  ;;  %v1457_v28 = vsel %vm621_vm2, %v2174_v24, 0 }
 0x117   : > { %v829_v59 = vld [vmem:[#allocation2 + $0x22] sm:$0xff]  ;;  %v575_v11 = vpack.c.bf16 %v568_v9, %v567_v10  ;;  %v2844_v13 = vld [vmem:[#allocation2 + $0x5a] sm:$0xff]  ;;  %v1420_v10 = vld [vmem:[#allocation2 + $0x4c] sm:$0xff] }
 0x118   : > { %2357 = vmatmul.mubr.msk.bf16.gmra.mrb[4].mxu1 %vm353_vm0, %v596_v30  ;;  %v843_v15 = vpack.c.bf16 %v2844_v13, %v835_v14  ;;  %v1120_v23 = vld [vmem:[#allocation2 + $0x13] sm:$0xff]  ;;  %v986_v29 = vpack.c.bf16 %v829_v59, %v2808_v52  ;;  %v1122_v30 = vld [vmem:[#allocation2 + $0x23] sm:$0xff] }
 0x119   : > { %v583_v32 = vld [vmem:[#allocation2 + $0x29] sm:$0xff]  ;;  %2360 = vmatprep.mubr.msk.bf16.mxu1 %vm2630_vm3, %v2628_v12  ;;  %v590_v34 = vld [vmem:[#allocation2 + $0x61] sm:$0xf]  ;;  %v1132_v27 = vpack.c.bf16 %v1120_v23, %v1119_v26  ;;  %v1275_v14 = vld [vmem:[#allocation2 + $0x54] sm:$0xff] }
 0x11a   : > { %v593_v33 = vpack.c.bf16 %v583_v32, %v582_v31  ;;  %v597_v35 = vpack.c.bf16 %v590_v34, %v590_v34  ;;  %v562_v55 = vld [vmem:[#allocation2 + $0x28] sm:$0xff]  ;;  %v569_v16 = vld [vmem:[#allocation2 + $0x60] sm:$0xf] }
 0x11b   : > { %v572_v57 = vpack.c.bf16 %v562_v55, %v561_v56  ;;  %v2817_v58 = vld [vmem:[#allocation2 + $0x2a] sm:$0xff]  ;;  %v576_v17 = vpack.c.bf16 %v569_v16, %v569_v16  ;;  %v837_v18 = vld [vmem:[#allocation2 + $0x62] sm:$0xf]  ;;  %v1267_v56 = vld [vmem:[#allocation2 + $0x14] sm:$0xff]  ;;  %v1283_v16 = vpack.c.bf16 %v1275_v14, %v1420_v10 }
 0x11c   : > { %2345 = vmatmul.mubr.msk.bf16.gmra.mrb[8].mxu0 %vm353_vm0, %v593_v33  ;;  %v840_v60 = vpack.c.bf16 %v2817_v58, %v829_v59  ;;  %v844_v19 = vpack.c.bf16 %v837_v18, %v837_v18  ;;  %v1121_v31 = vld [vmem:[#allocation2 + $0x1b] sm:$0xff]  ;;  %v1130_v49 = vld [vmem:[#allocation2 + $0x63] sm:$0xff]  ;;  %v2190_v59 = vld [vmem:[%s3545_s1 + $0x10] sm:$0x3] }
 0x11d   : > { %2348 = vmatprep.mubr.msk.bf16.mxu0 %vm2630_vm3, %v2628_v12  ;;  %v584_v36 = vld [vmem:[#allocation2 + $0x31] sm:$0xff]  ;;  %v585_v37 = vld [vmem:[#allocation2 + $0x39] sm:$0xff]  ;;  %v1133_v32 = vpack.c.bf16 %v1122_v30, %v1121_v31  ;;  %v983_v45 = vld [vmem:[#allocation2 + $0x62] sm:$0xff] }
 0x11e   : > { %v594_v38 = vpack.c.bf16 %v585_v37, %v584_v36  ;;  %v563_v61 = vld [vmem:[#allocation2 + $0x30] sm:$0xff]  ;;  %v564_v62 = vld [vmem:[#allocation2 + $0x38] sm:$0xff]  ;;  %v1273_v9 = vld [vmem:[#allocation2 + $0x44] sm:$0xff] }
 0x11f   : > { %v573_v63 = vpack.c.bf16 %v564_v62, %v563_v61  ;;  %v831_v0 = vld [vmem:[#allocation2 + $0x32] sm:$0xff]  ;;  %v2826_v1 = vld [vmem:[#allocation2 + $0x3a] sm:$0xff] }
 0x120   : > { %2361 = vmatmul.mubr.msk.bf16.gmra.mrb[8].mxu1 %vm353_vm0, %v597_v35  ;;  %v841_v2 = vpack.c.bf16 %v2826_v1, %v831_v0  ;;  %v987_v33 = vpack.c.bf16 %v831_v0, %v2817_v58  ;;  %v1124_v34 = vld [vmem:[#allocation2 + $0x33] sm:$0xff]  ;;  %v1123_v35 = vld [vmem:[#allocation2 + $0x2b] sm:$0xff]  ;;  %v988_v37 = vpack.c.bf16 %v833_v7, %v2826_v1  ;;  %v1751_v0 = vsel %vm621_vm2, %v2190_v59, 0  ;;  %v1418_v6 = vld [vmem:[#allocation2 + $0x3c] sm:$0xff] }
 0x121   : > { %2366 = vmatprep.mubr.msk.bf16.mxu1 %vm2630_vm3, %v2628_v12  ;;  %v1134_v36 = vpack.c.bf16 %v1124_v34, %v1123_v35  ;;  %v2182_v58 = vld [vmem:[%s3545_s1 + $0xe] sm:$0x3]  ;;  %v1269_v1 = vld [vmem:[#allocation2 + $0x24] sm:$0xff]  ;;  %v1707_v30 = vld [vmem:[#allocation2 + $0x16] sm:$0xff] }
 0x122   : > { %v1710_v34 = vld [vmem:[#allocation2 + $0x2e] sm:$0xff]  ;;  %v1562_v35 = vld [vmem:[#allocation2 + $0x25] sm:$0xff] }
 0x123   : > { %v1713_v59 = vld [vmem:[#allocation2 + $0x46] sm:$0xff] }
 0x124   : > { %2349 = vmatmul.mubr.msk.bf16.gmra.mrb[12].mxu0 %vm353_vm0, %v594_v38  ;;  %v1125_v38 = vld [vmem:[#allocation2 + $0x3b] sm:$0xff] }
 0x125   : > { %2396 = vmatprep.mubr.msk.bf16.mxu0 %vm2630_vm3, %v2628_v12  ;;  %v1135_v40 = vpack.c.bf16 %v1126_v39, %v1125_v38 }
 0x128   : > { %2367 = vmatmul.mubr.msk.bf16.vlgmr.msra.gmra.mrb[12].mxu1 %vm353_vm0, %v570_v42  ;;  %v1128_v42 = vld [vmem:[#allocation2 + $0x53] sm:$0xff] }
 0x129   : > { %2425 = vmatpush3.bf16.msra.mxu1 %v1016_v43  ;;  %2370 = vmatprep.mubr.msk.bf16.mxu1 %vm2630_vm3, %v2628_v12  ;;  %v1127_v43 = vld [vmem:[#allocation2 + $0x4b] sm:$0xff] }
 0x12a   : > { %2484 = vmatprep.subr.bf16.mxu1 %v2628_v12  ;;  %v1136_v44 = vpack.c.bf16 %v1128_v42, %v1127_v43  ;;  %v1564_v43 = vld [vmem:[#allocation2 + $0x35] sm:$0xff] }
 0x12c   : > { %2397 = vmatmul.mubr.msk.bf16.vlgmr.msra.gmra.mrb[16].mxu0 %vm353_vm0, %v838_v47  ;;  %v990_v47 = vpack.c.bf16 %v983_v45, %v2844_v13  ;;  %v1429_v13 = vpack.c.bf16 %v1420_v10, %v1273_v9  ;;  %v1565_v45 = vld [vmem:[#allocation2 + $0x3d] sm:$0xff] }
 0x12d   : > { %2455 = vmatpush3.bf16.msra.mxu0 %v1163_v48  ;;  %2400 = vmatprep.mubr.msk.bf16.mxu0 %vm2630_vm3, %v2628_v12 }
 0x12e   : > { %2514 = vmatprep.subr.bf16.mxu0 %v2628_v12 }
 0x130   : > { %2371 = vmatmul.mubr.msk.bf16.gmra.mrb[16].mxu1 %vm353_vm0, %v571_v51  ;;  %v1129_v51 = vld [vmem:[#allocation2 + $0x5b] sm:$0xff] }
 0x131   : > { %2374 = vmatprep.mubr.msk.bf16.mxu1 %vm2630_vm3, %v2628_v12  ;;  %v1137_v52 = vpack.c.bf16 %v1130_v49, %v1129_v51 }
 0x134   : > { %2401 = vmatmul.mubr.msk.bf16.gmra.mrb[20].mxu0 %vm353_vm0, %v839_v54 }
 0x135   : > { %2404 = vmatprep.mubr.msk.bf16.mxu0 %vm2630_vm3, %v2628_v12 }
 0x138   : > { %2375 = vmatmul.mubr.msk.bf16.gmra.mrb[20].mxu1 %vm353_vm0, %v572_v57  ;;  %v1414_v57 = vld [vmem:[#allocation2 + $0x1c] sm:$0xff] }
 0x139   : > { %2378 = vmatprep.mubr.msk.bf16.mxu1 %vm2630_vm3, %v2628_v12  ;;  %v1426_v62 = vpack.c.bf16 %v1414_v57, %v1267_v56  ;;  %v1280_v3 = vpack.c.bf16 %v1269_v1, %v1414_v57 }
 0x13c   : > { %2405 = vmatmul.mubr.msk.bf16.gmra.mrb[24].mxu0 %vm353_vm0, %v840_v60  ;;  %v1266_v60 = vld [vmem:[#allocation2 + $0xc] sm:$0xff] }
 0x13d   : > { %2408 = vmatprep.mubr.msk.bf16.mxu0 %vm2630_vm3, %v2628_v12  ;;  %v1279_v61 = vpack.c.bf16 %v1267_v56, %v1266_v60 }
 0x140   : > { %2379 = vmatmul.mubr.msk.bf16.gmra.mrb[24].mxu1 %vm353_vm0, %v573_v63  ;;  %v1604_v63 = vsel %vm621_vm2, %v2182_v58, 0  ;;  %v1566_v58 = vld [vmem:[#allocation2 + $0x45] sm:$0xff] }
 0x141   : > { %2382 = vmatprep.mubr.msk.bf16.mxu1 %vm2630_vm3, %v2628_v12 }
 0x144   : > { %2409 = vmatmul.mubr.msk.bf16.gmra.mrb[28].mxu0 %vm353_vm0, %v841_v2  ;;  %v1416_v2 = vld [vmem:[#allocation2 + $0x2c] sm:$0xff] }
 0x145   : > { %2412 = vmatprep.mubr.msk.bf16.mxu0 %vm2630_vm3, %v2628_v12  ;;  %v1427_v4 = vpack.c.bf16 %v1416_v2, %v1269_v1 }
 0x148   : > { %2383 = vmatmul.mubr.msk.bf16.gmra.mrb[28].mxu1 %vm353_vm0, %v574_v5  ;;  %v1271_v5 = vld [vmem:[#allocation2 + $0x34] sm:$0xff] }
 0x149   : > { %2386 = vmatprep.mubr.msk.bf16.mxu1 %vm2630_vm3, %v2628_v12  ;;  %v1281_v7 = vpack.c.bf16 %v1271_v5, %v1416_v2 }
 0x14c   : > { %2413 = vmatmul.mubr.msk.bf16.gmra.mrb[32].mxu0 %vm353_vm0, %v842_v8  ;;  %v1428_v8 = vpack.c.bf16 %v1418_v6, %v1271_v5  ;;  %v1716_v5 = vld [vmem:[#allocation2 + $0x5e] sm:$0xff] }
 0x14d   : > { %2416 = vmatprep.mubr.msk.bf16.mxu0 %vm2630_vm3, %v2628_v12 }
 0x150   : > { %2387 = vmatmul.mubr.msk.bf16.gmra.mrb[32].mxu1 %vm353_vm0, %v575_v11  ;;  %v1282_v11 = vpack.c.bf16 %v1273_v9, %v1418_v6  ;;  %v1715_v9 = vld [vmem:[#allocation2 + $0x56] sm:$0xff] }
 0x151   : > { %2390 = vmatprep.mubr.msk.bf16.mxu1 %vm2630_vm3, %v2628_v12 }
 0x154   : > { %2417 = vmatmul.mubr.msk.bf16.gmra.mrb[36].mxu0 %vm353_vm0, %v843_v15  ;;  %v1422_v15 = vld [vmem:[#allocation2 + $0x5c] sm:$0xff] }
 0x155   : > { %2420 = vmatprep.mubr.msk.bf16.mxu0 %vm2630_vm3, %v2628_v12 }
 0x158   : > { %2391 = vmatmul.mubr.msk.bf16.gmra.mrb[36].mxu1 %vm353_vm0, %v576_v17  ;;  %v1430_v17 = vpack.c.bf16 %v1422_v15, %v1275_v14 }
 0x159   : > { %2426 = vmatprep.mubr.msk.bf16.mxu1 %vm2630_vm3, %v2628_v12 }
 0x15c   : > { %2421 = vmatmul.mubr.msk.bf16.gmra.mrb[40].mxu0 %vm353_vm0, %v844_v19 }
 0x15d   : > { %2456 = vmatprep.mubr.msk.bf16.mxu0 %vm2630_vm3, %v2628_v12 }
 0x160   : > { %2427 = vmatmul.mubr.msk.bf16.vlgmr.msra.gmra.mrb[40].mxu1 %vm353_vm0, %v985_v21 }
 0x161   : > { %2485 = vmatpush3.bf16.msra.mxu1 %v1310_v22  ;;  %2430 = vmatprep.mubr.msk.bf16.mxu1 %vm2630_vm3, %v2628_v12  ;;  %v1425_v22 = vld [vmem:[#allocation2 + $0x74] sm:$0xf] }
 0x162   : > { %2544 = vmatprep.subr.bf16.mxu1 %v2628_v12  ;;  %v1432_v24 = vpack.c.bf16 %v1425_v22, %v1425_v22 }
 0x164   : > { %2457 = vmatmul.mubr.msk.bf16.vlgmr.msra.gmra.mrb[44].mxu0 %vm353_vm0, %v1132_v27  ;;  %v1561_v27 = vld [vmem:[#allocation2 + $0x1d] sm:$0xff] }
 0x165   : > { %2515 = vmatpush3.bf16.msra.mxu0 %v1457_v28  ;;  %2460 = vmatprep.mubr.msk.bf16.mxu0 %vm2630_vm3, %v2628_v12  ;;  %v1708_v28 = vld [vmem:[#allocation2 + $0x1e] sm:$0xff] }
 0x166   : > { %2574 = vmatprep.subr.bf16.mxu0 %v2628_v12 }
 0x168   : > { %2431 = vmatmul.mubr.msk.bf16.gmra.mrb[44].mxu1 %vm353_vm0, %v986_v29  ;;  %v1560_v29 = vld [vmem:[#allocation2 + $0x15] sm:$0xff] }
 0x169   : > { %2434 = vmatprep.mubr.msk.bf16.mxu1 %vm2630_vm3, %v2628_v12  ;;  %v1573_v31 = vpack.c.bf16 %v1561_v27, %v1560_v29 }
 0x16c   : > { %2461 = vmatmul.mubr.msk.bf16.gmra.mrb[48].mxu0 %vm353_vm0, %v1133_v32  ;;  %v1720_v32 = vpack.c.bf16 %v1708_v28, %v1707_v30 }
 0x16d   : > { %2464 = vmatprep.mubr.msk.bf16.mxu0 %vm2630_vm3, %v2628_v12 }
 0x170   : > { %2435 = vmatmul.mubr.msk.bf16.gmra.mrb[48].mxu1 %vm353_vm0, %v987_v33  ;;  %v1563_v33 = vld [vmem:[#allocation2 + $0x2d] sm:$0xff] }
 0x171   : > { %2438 = vmatprep.mubr.msk.bf16.mxu1 %vm2630_vm3, %v2628_v12  ;;  %v1574_v38 = vpack.c.bf16 %v1563_v33, %v1562_v35  ;;  %v1719_v35 = vld [vmem:[#allocation2 + $0x76] sm:$0xf] }
 0x174   : > { %2465 = vmatmul.mubr.msk.bf16.gmra.mrb[52].mxu0 %vm353_vm0, %v1134_v36  ;;  %v1709_v36 = vld [vmem:[#allocation2 + $0x26] sm:$0xff] }
 0x175   : > { %2468 = vmatprep.mubr.msk.bf16.mxu0 %vm2630_vm3, %v2628_v12  ;;  %v1721_v39 = vpack.c.bf16 %v1710_v34, %v1709_v36  ;;  %v1572_v34 = vld [vmem:[#allocation2 + $0x75] sm:$0xf] }
 0x178   : > { %2439 = vmatmul.mubr.msk.bf16.gmra.mrb[52].mxu1 %vm353_vm0, %v988_v37 }
 0x179   : > { %2442 = vmatprep.mubr.msk.bf16.mxu1 %vm2630_vm3, %v2628_v12 }
 0x17c   : > { %2469 = vmatmul.mubr.msk.bf16.gmra.mrb[56].mxu0 %vm353_vm0, %v1135_v40 }
 0x17d   : > { %2472 = vmatprep.mubr.msk.bf16.mxu0 %vm2630_vm3, %v2628_v12 }
 0x180   : > { %2443 = vmatmul.mubr.msk.bf16.gmra.mrb[56].mxu1 %vm353_vm0, %v989_v41 }
 0x181   : > { %2446 = vmatprep.mubr.msk.bf16.mxu1 %vm2630_vm3, %v2628_v12 }
 0x184   : > { %2473 = vmatmul.mubr.msk.bf16.gmra.mrb[60].mxu0 %vm353_vm0, %v1136_v44  ;;  %v1711_v44 = vld [vmem:[#allocation2 + $0x36] sm:$0xff] }
 0x185   : > { %2476 = vmatprep.mubr.msk.bf16.mxu0 %vm2630_vm3, %v2628_v12 }
 0x186   : > { %v326_v46 = vpop.permute.xlu1 %325 }
 0x187   : > { %v352_v48 = vmax.bf16 %v326_v46, %v2768_v25  ;;  %v1712_v46 = vld [vmem:[#allocation2 + $0x3e] sm:$0xff] }
 0x188   : > { %2447 = vmatmul.mubr.msk.bf16.gmra.mrb[60].mxu1 %vm353_vm0, %v990_v47  ;;  %v1722_v49 = vpack.c.bf16 %v1712_v46, %v1711_v44 }
 0x189   : > { %v371_v50 = vunpack.c.l.bf16 %v352_v48  ;;  %2450 = vmatprep.mubr.msk.bf16.mxu1 %vm2630_vm3, %v2628_v12  ;;  %v1575_v48 = vpack.c.bf16 %v1565_v45, %v1564_v43 }
 0x18b   : > { %385 = vst.msk [vmem:[#allocation2 + $0x6b] sm:$0xf] %vm384_vm4, %v371_v50 }
 0x18c   : > { %2477 = vmatmul.mubr.msk.bf16.gmra.mrb[64].mxu0 %vm353_vm0, %v1137_v52 }
 0x18d   : > { %2480 = vmatprep.mubr.msk.bf16.mxu0 %vm2630_vm3, %v2628_v12 }
 0x192   : > { %v984_v53 = vld [vmem:[#allocation2 + $0x6a] sm:$0xf]  ;;  %v1718_v22 = vld [vmem:[#allocation2 + $0x6e] sm:$0xff] }
 0x193   : > { %v1131_v54 = vld [vmem:[#allocation2 + $0x6b] sm:$0xf]  ;;  %v991_v55 = vpack.c.bf16 %v984_v53, %v984_v53 }
 0x194   : > { %v1138_v25 = vpack.c.bf16 %v1131_v54, %v1131_v54  ;;  %v1277_v18 = vld [vmem:[#allocation2 + $0x64] sm:$0xff]  ;;  %v1424_v19 = vld [vmem:[#allocation2 + $0x6c] sm:$0xff] }
 0x195   : > { %2451 = vmatmul.mubr.msk.bf16.gmra.mrb[64].mxu1 %vm353_vm0, %v991_v55  ;;  %v1284_v20 = vpack.c.bf16 %v1277_v18, %v1422_v15  ;;  %v1431_v21 = vpack.c.bf16 %v1424_v19, %v1277_v18  ;;  %v1278_v23 = vld [vmem:[#allocation2 + $0x6c] sm:$0xf] }
 0x196   : > { %2481 = vmatmul.mubr.msk.bf16.gmra.mrb[68].mxu0 %vm353_vm0, %v1138_v25  ;;  %2486 = vmatprep.mubr.msk.bf16.mxu1 %vm2630_vm3, %v2628_v12  ;;  %v1285_v26 = vpack.c.bf16 %v1278_v23, %v1278_v23  ;;  %v1567_v55 = vld [vmem:[#allocation2 + $0x4d] sm:$0xff]  ;;  %v1570_v18 = vld [vmem:[#allocation2 + $0x65] sm:$0xff] }
 0x197   : > { %2516 = vmatprep.mubr.msk.bf16.mxu0 %vm2630_vm3, %v2628_v12  ;;  %v1714_v25 = vld [vmem:[#allocation2 + $0x4e] sm:$0xff] }
 0x19d   : > { %2487 = vmatmul.mubr.msk.bf16.vlgmr.msra.gmra.mrb[68].mxu1 %vm353_vm0, %v1279_v61  ;;  %v1576_v61 = vpack.c.bf16 %v1567_v55, %v1566_v58 }
 0x19e   : > { %2517 = vmatmul.mubr.msk.bf16.vlgmr.msra.gmra.mrb[72].mxu0 %vm353_vm0, %v1426_v62  ;;  %2545 = vmatpush3.bf16.msra.mxu1 %v1604_v63  ;;  %v1723_v62 = vpack.c.bf16 %v1714_v25, %v1713_v59 }
 0x19f   : > { %2575 = vmatpush3.bf16.msra.mxu0 %v1751_v0  ;;  %2490 = vmatprep.mubr.msk.bf16.mxu1 %vm2630_vm3, %v2628_v12 }
 0x1a0   : > { %2520 = vmatprep.mubr.msk.bf16.mxu0 %vm2630_vm3, %v2628_v12 }
 0x1a5   : > { %2491 = vmatmul.mubr.msk.bf16.gmra.mrb[72].mxu1 %vm353_vm0, %v1280_v3 }
 0x1a6   : > { %2521 = vmatmul.mubr.msk.bf16.gmra.mrb[76].mxu0 %vm353_vm0, %v1427_v4  ;;  %2494 = vmatprep.mubr.msk.bf16.mxu1 %vm2630_vm3, %v2628_v12  ;;  %v1569_v4 = vld [vmem:[#allocation2 + $0x5d] sm:$0xff] }
 0x1a7   : > { %2524 = vmatprep.mubr.msk.bf16.mxu0 %vm2630_vm3, %v2628_v12 }
 0x1ad   : > { %2495 = vmatmul.mubr.msk.bf16.gmra.mrb[76].mxu1 %vm353_vm0, %v1281_v7 }
 0x1ae   : > { %2525 = vmatmul.mubr.msk.bf16.gmra.mrb[80].mxu0 %vm353_vm0, %v1428_v8  ;;  %2498 = vmatprep.mubr.msk.bf16.mxu1 %vm2630_vm3, %v2628_v12  ;;  %v1568_v8 = vld [vmem:[#allocation2 + $0x55] sm:$0xff] }
 0x1af   : > { %2528 = vmatprep.mubr.msk.bf16.mxu0 %vm2630_vm3, %v2628_v12 }
 0x1b5   : > { %2499 = vmatmul.mubr.msk.bf16.gmra.mrb[80].mxu1 %vm353_vm0, %v1282_v11  ;;  %v1577_v11 = vpack.c.bf16 %v1569_v4, %v1568_v8 }
 0x1b6   : > { %2529 = vmatmul.mubr.msk.bf16.gmra.mrb[84].mxu0 %vm353_vm0, %v1429_v13  ;;  %2502 = vmatprep.mubr.msk.bf16.mxu1 %vm2630_vm3, %v2628_v12  ;;  %v1724_v13 = vpack.c.bf16 %v1716_v5, %v1715_v9 }
 0x1b7   : > { %2532 = vmatprep.mubr.msk.bf16.mxu0 %vm2630_vm3, %v2628_v12 }
 0x1bd   : > { %2503 = vmatmul.mubr.msk.bf16.gmra.mrb[84].mxu1 %vm353_vm0, %v1283_v16 }
 0x1be   : > { %2533 = vmatmul.mubr.msk.bf16.gmra.mrb[88].mxu0 %vm353_vm0, %v1430_v17  ;;  %2506 = vmatprep.mubr.msk.bf16.mxu1 %vm2630_vm3, %v2628_v12 }
 0x1bf   : > { %2536 = vmatprep.mubr.msk.bf16.mxu0 %vm2630_vm3, %v2628_v12 }
 0x1c5   : > { %2507 = vmatmul.mubr.msk.bf16.gmra.mrb[88].mxu1 %vm353_vm0, %v1284_v20  ;;  %v1571_v20 = vld [vmem:[#allocation2 + $0x6d] sm:$0xff] }
 0x1c6   : > { %2537 = vmatmul.mubr.msk.bf16.gmra.mrb[92].mxu0 %vm353_vm0, %v1431_v21  ;;  %2510 = vmatprep.mubr.msk.bf16.mxu1 %vm2630_vm3, %v2628_v12  ;;  %v1717_v21 = vld [vmem:[#allocation2 + $0x66] sm:$0xff]  ;;  %v1578_v27 = vpack.c.bf16 %v1571_v20, %v1570_v18 }
 0x1c7   : > { %2540 = vmatprep.mubr.msk.bf16.mxu0 %vm2630_vm3, %v2628_v12  ;;  %v1725_v28 = vpack.c.bf16 %v1718_v22, %v1717_v21 }
 0x1cd   : > { %2511 = vmatmul.mubr.msk.bf16.gmra.mrb[92].mxu1 %vm353_vm0, %v1285_v26 }
 0x1ce   : > { %2541 = vmatmul.mubr.msk.bf16.gmra.mrb[96].mxu0 %vm353_vm0, %v1432_v24  ;;  %2546 = vmatprep.mubr.msk.bf16.mxu1 %vm2630_vm3, %v2628_v12 }
 0x1cf   : > { %2576 = vmatprep.mubr.msk.bf16.mxu0 %vm2630_vm3, %v2628_v12 }
 0x1d5   : > { %2547 = vmatmul.mubr.msk.bf16.vlgmr.msra.gmra.mrb[96].mxu1 %vm353_vm0, %v1573_v31 }
 0x1d6   : > { %2577 = vmatmul.mubr.msk.bf16.vlgmr.msra.gmra.mrb[100].mxu0 %vm353_vm0, %v1720_v32  ;;  %2550 = vmatprep.mubr.msk.bf16.mxu1 %vm2630_vm3, %v2628_v12 }
 0x1d7   : > { %2580 = vmatprep.mubr.msk.bf16.mxu0 %vm2630_vm3, %v2628_v12 }
 0x1db   : > { %v2974_v37 = vpop.f32.mrb[0].mxu0 }
 0x1dc   : > { %v2338_v40 = vpop.f32.mrb[1].mxu0 }
 0x1dd   : > { %v2976_v41 = vpop.f32.mrb[2].mxu0  ;;  %2551 = vmatmul.mubr.msk.bf16.gmra.mrb[100].mxu1 %vm353_vm0, %v1574_v38  ;;  %v1579_v40 = vpack.c.bf16 %v1572_v34, %v1572_v34 }
 0x1de   : > { %2581 = vmatmul.mubr.msk.bf16.gmra.mrb[104].mxu0 %vm353_vm0, %v1721_v39  ;;  %v2339_v42 = vpop.f32.mrb[3].mxu0  ;;  %2554 = vmatprep.mubr.msk.bf16.mxu1 %vm2630_vm3, %v2628_v12 }
 0x1df   : > { %2584 = vmatprep.mubr.msk.bf16.mxu0 %vm2630_vm3, %v2628_v12  ;;  %v1726_v42 = vpack.c.bf16 %v1719_v35, %v1719_v35 }
 0x1e3   : > { %v2984_v47 = vpop.f32.mrb[0].mxu1 }
 0x1e4   : > { %v2354_v50 = vpop.f32.mrb[1].mxu1 }
 0x1e5   : > { %v2986_v51 = vpop.f32.mrb[2].mxu1  ;;  %2555 = vmatmul.mubr.msk.bf16.gmra.mrb[104].mxu1 %vm353_vm0, %v1575_v48 }
 0x1e6   : > { %2585 = vmatmul.mubr.msk.bf16.gmra.mrb[108].mxu0 %vm353_vm0, %v1722_v49  ;;  %v2355_v52 = vpop.f32.mrb[3].mxu1  ;;  %2558 = vmatprep.mubr.msk.bf16.mxu1 %vm2630_vm3, %v2628_v12 }
 0x1e7   : > { %2588 = vmatprep.mubr.msk.bf16.mxu0 %vm2630_vm3, %v2628_v12  ;;  %v2994_v53 = vpop.f32.mrb[4].mxu0 }
 0x1e8   : > { %v2342_v54 = vpop.f32.mrb[5].mxu0 }
 0x1e9   : > { %v2996_v56 = vpop.f32.mrb[6].mxu0 }
 0x1ea   : > { %v2343_v57 = vpop.f32.mrb[7].mxu0 }
 0x1eb   : > { %v2998_v60 = vpop.f32.mrb[4].mxu1 }
 0x1ec   : > { %v2358_v63 = vpop.f32.mrb[5].mxu1 }
 0x1ed   : > { %v3000_v0 = vpop.f32.mrb[6].mxu1  ;;  %2559 = vmatmul.mubr.msk.bf16.gmra.mrb[108].mxu1 %vm353_vm0, %v1576_v61 }
 0x1ee   : > { %2589 = vmatmul.mubr.msk.bf16.gmra.mrb[112].mxu0 %vm353_vm0, %v1723_v62  ;;  %v2359_v1 = vpop.f32.mrb[7].mxu1  ;;  %2562 = vmatprep.mubr.msk.bf16.mxu1 %vm2630_vm3, %v2628_v12 }
 0x1ef   : > { %2592 = vmatprep.mubr.msk.bf16.mxu0 %vm2630_vm3, %v2628_v12  ;;  %v3008_v2 = vpop.f32.mrb[8].mxu0 }
 0x1f0   : > { %v2346_v3 = vpop.f32.mrb[9].mxu0 }
 0x1f1   : > { %v678_v6 = vpop.f32.mrb[10].mxu0 }
 0x1f2   : > { %v2347_v7 = vpop.f32.mrb[11].mxu0 }
 0x1f3   : > { %v3010_v10 = vpop.f32.mrb[8].mxu1 }
 0x1f4   : > { %v2362_v14 = vpop.f32.mrb[9].mxu1 }
 0x1f5   : > { %v710_v15 = vpop.f32.mrb[10].mxu1  ;;  %2563 = vmatmul.mubr.msk.bf16.gmra.mrb[112].mxu1 %vm353_vm0, %v1577_v11 }
 0x1f6   : > { %2593 = vmatmul.mubr.msk.bf16.gmra.mrb[116].mxu0 %vm353_vm0, %v1724_v13  ;;  %v2363_v16 = vpop.f32.mrb[11].mxu1  ;;  %2566 = vmatprep.mubr.msk.bf16.mxu1 %vm2630_vm3, %v2628_v12 }
 0x1f7   : > { %2596 = vmatprep.mubr.msk.bf16.mxu0 %vm2630_vm3, %v2628_v12  ;;  %v683_v17 = vpop.f32.mrb[12].mxu0 }
 0x1f8   : > { %v2350_v19 = vpop.f32.mrb[13].mxu0 }
 0x1f9   : > { %v686_v23 = vpop.f32.mrb[14].mxu0 }
 0x1fa   : > { %v2351_v24 = vpop.f32.mrb[15].mxu0 }
 0x1fb   : > { %v771_v26 = vpop.f32.mrb[12].mxu1 }
 0x1fc   : > { %v772_v29 = vadd.f32 %v771_v26, %v2974_v37  ;;  %v2368_v30 = vpop.f32.mrb[13].mxu1 }
 0x1fd   : > { %v774_v31 = vpop.f32.mrb[14].mxu1  ;;  %2567 = vmatmul.mubr.msk.bf16.gmra.mrb[116].mxu1 %vm353_vm0, %v1578_v27 }
 0x1fe   : > { %2597 = vmatmul.mubr.msk.bf16.gmra.mrb[120].mxu0 %vm353_vm0, %v1725_v28  ;;  %v775_v32 = vadd.f32 %v774_v31, %v2976_v41  ;;  %v2369_v33 = vpop.f32.mrb[15].mxu1  ;;  %2570 = vmatprep.mubr.msk.bf16.mxu1 %vm2630_vm3, %v2628_v12 }
 0x1ff   : > { %2600 = vmatprep.mubr.msk.bf16.mxu0 %vm2630_vm3, %v2628_v12  ;;  %v905_v36 = vpop.f32.mrb[16].mxu0 }
 0x200   : > { %v3026_v38 = vadd.f32 %v905_v36, %v772_v29  ;;  %v2398_v37 = vpop.f32.mrb[17].mxu0 }
 0x201   : > { %v908_v39 = vpop.f32.mrb[18].mxu0 }
 0x202   : > { %v3028_v43 = vadd.f32 %v908_v39, %v775_v32  ;;  %v2399_v44 = vpop.f32.mrb[19].mxu0 }
 0x203   : > { %v779_v41 = vpop.f32.mrb[16].mxu1 }
 0x204   : > { %v780_v45 = vadd.f32 %v779_v41, %v2994_v53  ;;  %v2372_v46 = vpop.f32.mrb[17].mxu1 }
 0x205   : > { %v782_v48 = vpop.f32.mrb[18].mxu1  ;;  %2571 = vmatmul.mubr.msk.bf16.gmra.mrb[120].mxu1 %vm353_vm0, %v1579_v40 }
 0x206   : > { %2601 = vmatmul.mubr.msk.bf16.gmra.mrb[124].mxu0 %vm353_vm0, %v1726_v42  ;;  %v783_v12 = vadd.f32 %v782_v48, %v2996_v56  ;;  %v2373_v49 = vpop.f32.mrb[19].mxu1 }
 0x207   : > { %v913_v50 = vpop.f32.mrb[20].mxu0 }
 0x208   : > { %v3034_v52 = vadd.f32 %v913_v50, %v780_v45  ;;  %v2402_v54 = vpop.f32.mrb[21].mxu0 }
 0x209   : > { %v916_v55 = vpop.f32.mrb[22].mxu0 }
 0x20a   : > { %v3036_v25 = vadd.f32 %v916_v55, %v783_v12  ;;  %v2403_v57 = vpop.f32.mrb[23].mxu0 }
 0x20b   : > { %v787_v58 = vpop.f32.mrb[20].mxu1 }
 0x20c   : > { %v788_v53 = vadd.f32 %v787_v58, %v3008_v2  ;;  %v2376_v59 = vpop.f32.mrb[21].mxu1 }
 0x20d   : > { %v790_v61 = vpop.f32.mrb[22].mxu1 }
 0x20e   : > { %v791_v62 = vadd.f32 %v790_v61, %v678_v6  ;;  %v2377_v63 = vpop.f32.mrb[23].mxu1 }
 0x20f   : > { %v921_v1 = vpop.f32.mrb[24].mxu0 }
 0x210   : > { %v3039_v3 = vadd.f32 %v921_v1, %v788_v53  ;;  %v2406_v56 = vpop.f32.mrb[25].mxu0 }
 0x211   : > { %v924_v4 = vpop.f32.mrb[26].mxu0 }
 0x212   : > { %v3041_v5 = vadd.f32 %v924_v4, %v791_v62  ;;  %v2407_v7 = vpop.f32.mrb[27].mxu0 }
 0x213   : > { %v795_v8 = vpop.f32.mrb[24].mxu1 }
 0x214   : > { %v796_v9 = vadd.f32 %v795_v8, %v683_v17  ;;  %v2380_v11 = vpop.f32.mrb[25].mxu1 }
 0x215   : > { %v798_v13 = vpop.f32.mrb[26].mxu1 }
 0x216   : > { %v799_v14 = vadd.f32 %v798_v13, %v686_v23  ;;  %v2381_v15 = vpop.f32.mrb[27].mxu1 }
 0x217   : > { %v929_v16 = vpop.f32.mrb[28].mxu0 }
 0x218   : > { %v3043_v2 = vadd.f32 %v929_v16, %v796_v9  ;;  %v2410_v18 = vpop.f32.mrb[29].mxu0 }
 0x219   : > { %v932_v6 = vpop.f32.mrb[30].mxu0 }
 0x21a   : > { %v3045_v19 = vadd.f32 %v932_v6, %v799_v14  ;;  %v2411_v20 = vpop.f32.mrb[31].mxu0 }
 0x21b   : > { %v803_v21 = vpop.f32.mrb[28].mxu1 }
 0x21c   : > { %v804_v22 = vadd.f32 %v803_v21, %v2984_v47  ;;  %v2384_v24 = vpop.f32.mrb[29].mxu1 }
 0x21d   : > { %v806_v26 = vpop.f32.mrb[30].mxu1 }
 0x21e   : > { %v807_v27 = vadd.f32 %v806_v26, %v2986_v51  ;;  %v2385_v17 = vpop.f32.mrb[31].mxu1 }
 0x21f   : > { %v937_v28 = vpop.f32.mrb[32].mxu0 }
 0x220   : > { %v3049_v29 = vadd.f32 %v937_v28, %v804_v22  ;;  %v2414_v23 = vpop.f32.mrb[33].mxu0 }
 0x221   : > { %v940_v30 = vpop.f32.mrb[34].mxu0 }
 0x222   : > { %v3051_v31 = vadd.f32 %v940_v30, %v807_v27  ;;  %v2415_v32 = vpop.f32.mrb[35].mxu0 }
 0x223   : > { %v811_v33 = vpop.f32.mrb[32].mxu1 }
 0x224   : > { %v812_v34 = vadd.f32 %v811_v33, %v2998_v60  ;;  %v2388_v35 = vpop.f32.mrb[33].mxu1 }
 0x225   : > { %v814_v36 = vpop.f32.mrb[34].mxu1 }
 0x226   : > { %v815_v47 = vadd.f32 %v814_v36, %v3000_v0  ;;  %v2389_v37 = vpop.f32.mrb[35].mxu1 }
 0x227   : > { %v945_v39 = vpop.f32.mrb[36].mxu0 }
 0x228   : > { %v3055_v40 = vadd.f32 %v945_v39, %v812_v34  ;;  %v2418_v51 = vpop.f32.mrb[37].mxu0 }
 0x229   : > { %v948_v42 = vpop.f32.mrb[38].mxu0 }
 0x22a   : > { %v3057_v44 = vadd.f32 %v948_v42, %v815_v47  ;;  %v2419_v41 = vpop.f32.mrb[39].mxu0 }
 0x22b   : > { %v819_v45 = vpop.f32.mrb[36].mxu1 }
 0x22c   : > { %v820_v46 = vadd.f32 %v819_v45, %v3010_v10  ;;  %v2392_v48 = vpop.f32.mrb[37].mxu1 }
 0x22d   : > { %v822_v12 = vpop.f32.mrb[38].mxu1 }
 0x22e   : > { %v2393_v49 = vpop.f32.mrb[39].mxu1 }
 0x22f   : > { %v953_v60 = vpop.f32.mrb[40].mxu0 }
 0x230   : > { %v3060_v50 = vadd.f32 %v953_v60, %v820_v46  ;;  %v2422_v54 = vpop.f32.mrb[41].mxu0 }
 0x231   : > { %v956_v0 = vpop.f32.mrb[42].mxu0 }
 0x232   : > { %v2423_v55 = vpop.f32.mrb[43].mxu0 }
 0x233   : > { %v1052_v57 = vpop.f32.mrb[40].mxu1 }
 0x234   : > { %v1106_v58 = vadd.f32 %v1052_v57, %v3026_v38  ;;  %v2428_v53 = vpop.f32.mrb[41].mxu1 }
 0x235   : > { %v1055_v59 = vpop.f32.mrb[42].mxu1 }
 0x236   : > { %v1107_v61 = vadd.f32 %v1055_v59, %v3028_v43  ;;  %v2429_v62 = vpop.f32.mrb[43].mxu1 }
 0x237   : > { %v1199_v63 = vpop.f32.mrb[44].mxu0 }
 0x238   : > { %v3064_v1 = vadd.f32 %v1199_v63, %v1106_v58  ;;  %v2458_v10 = vpop.f32.mrb[45].mxu0 }
 0x239   : > { %v1202_v56 = vpop.f32.mrb[46].mxu0 }
 0x23a   : > { %v3066_v4 = vadd.f32 %v1202_v56, %v1107_v61  ;;  %v2459_v7 = vpop.f32.mrb[47].mxu0 }
 0x23b   : > { %v1060_v8 = vpop.f32.mrb[44].mxu1 }
 0x23c   : > { %v1108_v9 = vadd.f32 %v1060_v8, %v3034_v52  ;;  %v2432_v11 = vpop.f32.mrb[45].mxu1 }
 0x23d   : > { %v1063_v13 = vpop.f32.mrb[46].mxu1 }
 0x23e   : > { %v1109_v38 = vadd.f32 %v1063_v13, %v3036_v25  ;;  %v2433_v14 = vpop.f32.mrb[47].mxu1 }
 0x23f   : > { %v1207_v15 = vpop.f32.mrb[48].mxu0 }
 0x240   : > { %v3070_v16 = vadd.f32 %v1207_v15, %v1108_v9  ;;  %v2462_v43 = vpop.f32.mrb[49].mxu0 }
 0x241   : > { %v1210_v18 = vpop.f32.mrb[50].mxu0 }
 0x242   : > { %v3072_v6 = vadd.f32 %v1210_v18, %v1109_v38  ;;  %v2463_v20 = vpop.f32.mrb[51].mxu0 }
 0x243   : > { %v1068_v21 = vpop.f32.mrb[48].mxu1 }
 0x244   : > { %v1110_v22 = vadd.f32 %v1068_v21, %v3039_v3  ;;  %v2436_v24 = vpop.f32.mrb[49].mxu1 }
 0x245   : > { %v1071_v26 = vpop.f32.mrb[50].mxu1 }
 0x246   : > { %v1111_v52 = vadd.f32 %v1071_v26, %v3041_v5  ;;  %v2437_v27 = vpop.f32.mrb[51].mxu1 }
 0x247   : > { %v1215_v17 = vpop.f32.mrb[52].mxu0 }
 0x248   : > { %v3076_v28 = vadd.f32 %v1215_v17, %v1110_v22  ;;  %v2466_v25 = vpop.f32.mrb[53].mxu0 }
 0x249   : > { %v1218_v23 = vpop.f32.mrb[54].mxu0 }
 0x24a   : > { %v3078_v30 = vadd.f32 %v1218_v23, %v1111_v52  ;;  %v2467_v32 = vpop.f32.mrb[55].mxu0 }
 0x24b   : > { %v1076_v33 = vpop.f32.mrb[52].mxu1 }
 0x24c   : > { %v1112_v34 = vadd.f32 %v1076_v33, %v3043_v2  ;;  %v2440_v35 = vpop.f32.mrb[53].mxu1 }
 0x24d   : > { %v1079_v36 = vpop.f32.mrb[54].mxu1 }
 0x24e   : > { %v1113_v3 = vadd.f32 %v1079_v36, %v3045_v19  ;;  %v2441_v47 = vpop.f32.mrb[55].mxu1 }
 0x24f   : > { %v1223_v37 = vpop.f32.mrb[56].mxu0 }
 0x250   : > { %v3082_v39 = vadd.f32 %v1223_v37, %v1112_v34  ;;  %v2470_v5 = vpop.f32.mrb[57].mxu0 }
 0x251   : > { %v1226_v51 = vpop.f32.mrb[58].mxu0 }
 0x252   : > { %v3084_v42 = vadd.f32 %v1226_v51, %v1113_v3  ;;  %v2471_v41 = vpop.f32.mrb[59].mxu0 }
 0x253   : > { %v1084_v45 = vpop.f32.mrb[56].mxu1 }
 0x254   : > { %v1114_v46 = vadd.f32 %v1084_v45, %v3049_v29  ;;  %v2444_v48 = vpop.f32.mrb[57].mxu1 }
 0x255   : > { %v1087_v12 = vpop.f32.mrb[58].mxu1 }
 0x256   : > { %v1115_v2 = vadd.f32 %v1087_v12, %v3051_v31  ;;  %v2445_v49 = vpop.f32.mrb[59].mxu1 }
 0x257   : > { %v1231_v60 = vpop.f32.mrb[60].mxu0 }
 0x258   : > { %v3088_v54 = vadd.f32 %v1231_v60, %v1114_v46  ;;  %v2474_v19 = vpop.f32.mrb[61].mxu0 }
 0x259   : > { %v1234_v0 = vpop.f32.mrb[62].mxu0 }
 0x25a   : > { %v3090_v55 = vadd.f32 %v1234_v0, %v1115_v2  ;;  %v2475_v57 = vpop.f32.mrb[63].mxu0 }
 0x25b   : > { %v1092_v58 = vpop.f32.mrb[60].mxu1 }
 0x25c   : > { %v1116_v53 = vadd.f32 %v1092_v58, %v3055_v40  ;;  %v2448_v59 = vpop.f32.mrb[61].mxu1 }
 0x25d   : > { %v1095_v61 = vpop.f32.mrb[62].mxu1 }
 0x25e   : > { %v1117_v29 = vadd.f32 %v1095_v61, %v3057_v44  ;;  %v2449_v62 = vpop.f32.mrb[63].mxu1 }
 0x25f   : > { %v1239_v63 = vpop.f32.mrb[64].mxu0 }
 0x260   : > { %v3094_v10 = vadd.f32 %v1239_v63, %v1116_v53  ;;  %v2478_v31 = vpop.f32.mrb[65].mxu0 }
 0x261   : > { %v1242_v56 = vpop.f32.mrb[66].mxu0 }
 0x262   : > { %v3096_v7 = vadd.f32 %v1242_v56, %v1117_v29  ;;  %v2479_v8 = vpop.f32.mrb[67].mxu0 }
 0x268   : > { %v1100_v9 = vpop.f32.mrb[64].mxu1 }
 0x269   : > { %v1247_v11 = vpop.f32.mrb[68].mxu0  ;;  %v1118_v13 = vadd.f32 %v1100_v9, %v3060_v50  ;;  %v2452_v38 = vpop.f32.mrb[65].mxu1 }
 0x26a   : > { %v2482_v14 = vpop.f32.mrb[69].mxu0  ;;  %v1103_v40 = vpop.f32.mrb[66].mxu1 }
 0x26b   : > { %v1250_v15 = vpop.f32.mrb[70].mxu0  ;;  %v3099_v43 = vadd.f32 %v1247_v11, %v1118_v13  ;;  %v2453_v44 = vpop.f32.mrb[67].mxu1 }
 0x26c   : > { %v2483_v18 = vpop.f32.mrb[71].mxu0 }
 0x270   : > { %v1346_v20 = vpop.f32.mrb[68].mxu1 }
 0x271   : > { %v1493_v21 = vpop.f32.mrb[72].mxu0  ;;  %v1400_v22 = vadd.f32 %v1346_v20, %v3064_v1  ;;  %v2488_v24 = vpop.f32.mrb[69].mxu1 }
 0x272   : > { %v2518_v26 = vpop.f32.mrb[73].mxu0  ;;  %v1349_v52 = vpop.f32.mrb[70].mxu1 }
 0x273   : > { %v1496_v27 = vpop.f32.mrb[74].mxu0  ;;  %v3102_v17 = vadd.f32 %v1493_v21, %v1400_v22  ;;  %v1401_v50 = vadd.f32 %v1349_v52, %v3066_v4  ;;  %v2489_v25 = vpop.f32.mrb[71].mxu1 }
 0x274   : > { %v2519_v23 = vpop.f32.mrb[75].mxu0 }
 0x275   : > { %v3105_v32 = vadd.f32 %v1496_v27, %v1401_v50 }
 0x278   : > { %v1354_v33 = vpop.f32.mrb[72].mxu1 }
 0x279   : > { %v1501_v34 = vpop.f32.mrb[76].mxu0  ;;  %v1402_v35 = vadd.f32 %v1354_v33, %v3070_v16  ;;  %v2492_v36 = vpop.f32.mrb[73].mxu1 }
 0x27a   : > { %v2522_v3 = vpop.f32.mrb[77].mxu0  ;;  %v1357_v47 = vpop.f32.mrb[74].mxu1 }
 0x27b   : > { %v1504_v1 = vpop.f32.mrb[78].mxu0  ;;  %v3108_v37 = vadd.f32 %v1501_v34, %v1402_v35  ;;  %v1403_v5 = vadd.f32 %v1357_v47, %v3072_v6  ;;  %v2493_v51 = vpop.f32.mrb[75].mxu1  ;;  %v386_v6 = vlaneseq }
 0x27c   : > { %v2523_v41 = vpop.f32.mrb[79].mxu0 }
 0x27d   : > { %v3111_v45 = vadd.f32 %v1504_v1, %v1403_v5 }
 0x280   : > { %v1362_v4 = vpop.f32.mrb[76].mxu1 }
 0x281   : > { %v1509_v46 = vpop.f32.mrb[80].mxu0  ;;  %v1404_v48 = vadd.f32 %v1362_v4, %v3076_v28  ;;  %v2496_v12 = vpop.f32.mrb[77].mxu1 }
 0x282   : > { %v2526_v2 = vpop.f32.mrb[81].mxu0  ;;  %v1365_v49 = vpop.f32.mrb[78].mxu1 }
 0x283   : > { %v1512_v16 = vpop.f32.mrb[82].mxu0  ;;  %v3114_v60 = vadd.f32 %v1509_v46, %v1404_v48  ;;  %v1405_v19 = vadd.f32 %v1365_v49, %v3078_v30  ;;  %v2497_v0 = vpop.f32.mrb[79].mxu1  ;;  %v3123_v30 = vshrl.u32 %v386_v6, 7 }
 0x284   : > { %v2527_v57 = vpop.f32.mrb[83].mxu0 }
 0x285   : > { %v3117_v58 = vadd.f32 %v1512_v16, %v1405_v19  ;;  %v388_v13 = vadd.s32 8, %v3123_v30  ;;  %v400_v20 = vcvt.s32.f32 %v3123_v30  ;;  %v3136_v50 = vadd.s32 16, %v3123_v30 }
 0x286   : > { %v3139_v33 = vadd.s32 24, %v3123_v30  ;;  %v3142_v34 = vadd.s32 32, %v3123_v30 }
 0x287   : > { %v401_v26 = vcvt.s32.f32 %v388_v13  ;;  %v414_v27 = vmul.f32 0.1, %v400_v20  ;;  %v402_v5 = vcvt.s32.f32 %v3136_v50 }
 0x288   : > { %v1370_v53 = vpop.f32.mrb[80].mxu1  ;;  %v403_v12 = vcvt.s32.f32 %v3139_v33  ;;  %v404_v2 = vcvt.s32.f32 %v3142_v34  ;;  %v3332_v34 = vadd.s32 88, %v3123_v30 }
 0x289   : > { %v1517_v59 = vpop.f32.mrb[84].mxu0  ;;  %v1406_v61 = vadd.f32 %v1370_v53, %v3082_v39  ;;  %v2500_v29 = vpop.f32.mrb[81].mxu1  ;;  %v427_v1 = vfloor.f32 %v414_v27  ;;  %v416_v19 = vmul.f32 0.1, %v402_v5 }
 0x28a   : > { %v2530_v62 = vpop.f32.mrb[85].mxu0  ;;  %v1373_v28 = vpop.f32.mrb[82].mxu1  ;;  %v418_v53 = vmul.f32 0.1, %v404_v2 }
 0x28b   : > { %v1520_v63 = vpop.f32.mrb[86].mxu0  ;;  %v3120_v31 = vadd.f32 %v1517_v59, %v1406_v61  ;;  %v1407_v56 = vadd.f32 %v1373_v28, %v3084_v42  ;;  %v2501_v8 = vpop.f32.mrb[83].mxu1  ;;  %v440_v16 = vmul.f32 10.0, %v427_v1  ;;  %v3163_v28 = vadd.s32 48, %v3123_v30 }
 0x28c   : > { %v2531_v9 = vpop.f32.mrb[87].mxu0  ;;  %vm466_vm5 = vcmp.ge.f32.partialorder %v427_v1, 1.0  ;;  %vm479_vm6 = vcmp.le.f32.partialorder %v427_v1, 8.0 }
 0x28d   : > { %v3125_v11 = vadd.f32 %v1520_v63, %v1407_v56  ;;  %v453_v8 = vsub.f32 %v400_v20, %v440_v16  ;;  %v429_v9 = vfloor.f32 %v416_v19  ;;  %vm492_vm9 = vmand %vm466_vm5, %vm479_vm6  ;;  %v3204_v19 = vadd.s32 64, %v3123_v30 }
 0x28f   : > { %vm505_vm10 = vcmp.ge.f32.partialorder %v453_v8, 1.0  ;;  %vm531_vm14 = vcmp.le.f32.partialorder %v453_v8, 8.0  ;;  %vm468_vm1 = vcmp.ge.f32.partialorder %v429_v9, 1.0  ;;  %vm481_vm2 = vcmp.le.f32.partialorder %v429_v9, 8.0 }
 0x290   : > { %v1378_v38 = vpop.f32.mrb[84].mxu1  ;;  %vm3186_vm13 = vmand %vm492_vm9, %vm505_vm10 }
 0x291   : > { %v1525_v14 = vpop.f32.mrb[88].mxu0  ;;  %v1408_v39 = vadd.f32 %v1378_v38, %v3088_v54  ;;  %v2504_v40 = vpop.f32.mrb[85].mxu1  ;;  %v415_v54 = vmul.f32 0.1, %v401_v26  ;;  %vm544_vm3 = vmand %vm3186_vm13, %vm531_vm14 }
 0x292   : > { %v2534_v15 = vpop.f32.mrb[89].mxu0  ;;  %v1381_v44 = vpop.f32.mrb[86].mxu1  ;;  %v3167_v40 = vfloor.f32 %v418_v53 }
 0x293   : > { %v1528_v18 = vpop.f32.mrb[90].mxu0  ;;  %v3130_v21 = vadd.f32 %v1525_v14, %v1408_v39  ;;  %v1409_v42 = vadd.f32 %v1381_v44, %v3090_v55  ;;  %v2505_v22 = vpop.f32.mrb[87].mxu1  ;;  %v428_v48 = vfloor.f32 %v415_v54  ;;  %v406_v44 = vcvt.s32.f32 %v3163_v28 }
 0x294   : > { %v2535_v24 = vpop.f32.mrb[91].mxu0  ;;  %v444_v50 = vmul.f32 10.0, %v3167_v40  ;;  %vm470_vm10 = vcmp.ge.f32.partialorder %v3167_v40, 1.0 }
 0x295   : > { %v3133_v52 = vadd.f32 %v1528_v18, %v1409_v42  ;;  %v441_v0 = vmul.f32 10.0, %v428_v48  ;;  %vm467_vm7 = vcmp.ge.f32.partialorder %v428_v48, 1.0  ;;  %vm480_vm8 = vcmp.le.f32.partialorder %v428_v48, 8.0 }
 0x296   : > { %v442_v18 = vmul.f32 10.0, %v429_v9  ;;  %vm3172_vm11 = vmand %vm467_vm7, %vm480_vm8  ;;  %v3177_v42 = vadd.s32 56, %v3123_v30 }
 0x297   : > { %v454_v39 = vsub.f32 %v401_v26, %v441_v0  ;;  %v3182_v26 = vld [vmem:[%s3546_s2] ss:$0 sm:$0xff]  ;;  %vm3228_vm7 = vmand %vm468_vm1, %vm481_vm2 }
 0x298   : > { %v1386_v25 = vpop.f32.mrb[88].mxu1  ;;  %v455_v1 = vsub.f32 %v402_v5, %v442_v18  ;;  %v407_v16 = vcvt.s32.f32 %v3177_v42  ;;  %v3213_v5 = vsub.f32 %v404_v2, %v444_v50 }
 0x299   : > { %v1533_v23 = vpop.f32.mrb[92].mxu0  ;;  %v1410_v55 = vadd.f32 %v1386_v25, %v3094_v10  ;;  %v2508_v35 = vpop.f32.mrb[89].mxu1  ;;  %v3154_v10 = vadd.s32 40, %v3123_v30  ;;  %vm506_vm12 = vcmp.ge.f32.partialorder %v454_v39, 1.0  ;;  %vm532_vm0 = vcmp.le.f32.partialorder %v454_v39, 8.0 }
 0x29a   : > { %v2538_v36 = vpop.f32.mrb[93].mxu0  ;;  %v1389_v3 = vpop.f32.mrb[90].mxu1  ;;  %vm3197_vm15 = vmand %vm3172_vm11, %vm506_vm12  ;;  %vm507_vm8 = vcmp.ge.f32.partialorder %v455_v1, 1.0  ;;  %vm533_vm9 = vcmp.le.f32.partialorder %v455_v1, 8.0  ;;  %vm483_vm11 = vcmp.le.f32.partialorder %v3167_v40, 8.0  ;;  %vm535_vm1 = vcmp.le.f32.partialorder %v3213_v5, 8.0 }
 0x29b   : > { %v1536_v47 = vpop.f32.mrb[94].mxu0  ;;  %v3146_v51 = vadd.f32 %v1533_v23, %v1410_v55  ;;  %v1411_v41 = vadd.f32 %v1389_v3, %v3096_v7  ;;  %v2509_v4 = vpop.f32.mrb[91].mxu1  ;;  %v417_v7 = vmul.f32 0.1, %v403_v12  ;;  %v405_v62 = vcvt.s32.f32 %v3154_v10  ;;  %vm3219_vm6 = vmand %vm3197_vm15, %vm532_vm0 }
 0x29c   : > { %v2539_v46 = vpop.f32.mrb[95].mxu0  ;;  %v420_v36 = vmul.f32 0.1, %v406_v44  ;;  %v421_v53 = vmul.f32 0.1, %v407_v16  ;;  %vm509_vm15 = vcmp.ge.f32.partialorder %v3213_v5, 1.0  ;;  %vm3261_vm0 = vmand %vm3228_vm7, %vm507_vm8 }
 0x29d   : > { %v3151_v49 = vadd.f32 %v1536_v47, %v1411_v41  ;;  %v419_v15 = vmul.f32 0.1, %v405_v62  ;;  %v3301_v1 = vadd.s32 80, %v3123_v30  ;;  %v3380_v5 = vadd.s32 96, %v3123_v30 }
 0x29e   : > { %v3224_v33 = vfloor.f32 %v420_v36 }
 0x29f   : > { %v3190_v35 = vfloor.f32 %v419_v15 }
 0x2a0   : > { %v1394_v57 = vpop.f32.mrb[92].mxu1  ;;  %v446_v15 = vmul.f32 10.0, %v3224_v33  ;;  %vm472_vm7 = vcmp.ge.f32.partialorder %v3224_v33, 1.0 }
 0x2a1   : > { %v1541_v6 = vpop.f32.mrb[96].mxu0  ;;  %v1412_v59 = vadd.f32 %v1394_v57, %v3099_v43  ;;  %v2512_v61 = vpop.f32.mrb[93].mxu1  ;;  %v430_v43 = vfloor.f32 %v417_v7  ;;  %v445_v7 = vmul.f32 10.0, %v3190_v35 }
 0x2a2   : > { %v2542_v29 = vpop.f32.mrb[97].mxu0  ;;  %v1397_v63 = vpop.f32.mrb[94].mxu1  ;;  %v3314_v40 = vsub.f32 %v406_v44, %v446_v15 }
 0x2a3   : > { %v1544_v56 = vpop.f32.mrb[98].mxu0  ;;  %v3165_v13 = vadd.f32 %v1541_v6, %v1412_v59  ;;  %v2513_v38 = vpop.f32.mrb[95].mxu1  ;;  %v443_v27 = vmul.f32 10.0, %v430_v43  ;;  %vm469_vm4 = vcmp.ge.f32.partialorder %v430_v43, 1.0  ;;  %vm482_vm5 = vcmp.le.f32.partialorder %v430_v43, 8.0 }
 0x2a4   : > { %v2543_v14 = vpop.f32.mrb[99].mxu0  ;;  %v408_v59 = vcvt.s32.f32 %v3204_v19  ;;  %vm3240_vm12 = vmand %vm469_vm4, %vm482_vm5  ;;  %v3246_v56 = vadd.s32 72, %v3123_v30  ;;  %v3268_v43 = vsub.f32 %v405_v62, %v445_v7  ;;  %vm471_vm4 = vcmp.ge.f32.partialorder %v3190_v35, 1.0 }
 0x2a5   : > { %v456_v0 = vsub.f32 %v403_v12, %v443_v27  ;;  %vm484_vm5 = vcmp.le.f32.partialorder %v3190_v35, 8.0 }
 0x2a7   : > { %vm508_vm13 = vcmp.ge.f32.partialorder %v456_v0, 1.0  ;;  %vm534_vm14 = vcmp.le.f32.partialorder %v456_v0, 8.0 }
 0x2a8   : > { %v1640_v22 = vpop.f32.mrb[96].mxu1  ;;  %vm3275_vm2 = vmand %vm3240_vm12, %vm508_vm13  ;;  %vm536_vm12 = vcmp.le.f32.partialorder %v3268_v43, 8.0 }
 0x2a9   : > { %v1787_v24 = vpop.f32.mrb[100].mxu0  ;;  %v1694_v54 = vadd.f32 %v1640_v22, %v3102_v17  ;;  %v2548_v23 = vpop.f32.mrb[97].mxu1  ;;  %vm3306_vm8 = vmand %vm3275_vm2, %vm534_vm14 }
 0x2aa   : > { %v2578_v55 = vpop.f32.mrb[101].mxu0  ;;  %v1643_v3 = vpop.f32.mrb[98].mxu1  ;;  %v3279_v23 = vfloor.f32 %v421_v53 }
 0x2ab   : > { %v1790_v17 = vpop.f32.mrb[102].mxu0  ;;  %v1841_v41 = vadd.f32 %v1787_v24, %v1694_v54  ;;  %v1695_v4 = vadd.f32 %v1643_v3, %v3105_v32  ;;  %v2549_v46 = vpop.f32.mrb[99].mxu1  ;;  %v422_v55 = vmul.f32 0.1, %v408_v59 }
 0x2ac   : > { %v2579_v48 = vpop.f32.mrb[103].mxu0  ;;  %vm473_vm14 = vcmp.ge.f32.partialorder %v3279_v23, 1.0  ;;  %vm486_vm2 = vcmp.le.f32.partialorder %v3279_v23, 8.0 }
 0x2ad   : > { %v1861_v32 = vadd.f32 %v3182_v26, %v1841_v41  ;;  %v1842_v6 = vadd.f32 %v1790_v17, %v1695_v4  ;;  %v447_v48 = vmul.f32 10.0, %v3279_v23  ;;  %v3319_v0 = vfloor.f32 %v422_v55 }
 0x2af   : > { %v1900_v12 = vsel %vm544_vm3, %v1861_v32, 0.0  ;;  %v1862_v2 = vadd.f32 %v3182_v26, %v1842_v6  ;;  %vm546_vm3 = vmand %vm3261_vm0, %vm533_vm9  ;;  %vm510_vm9 = vcmp.ge.f32.partialorder %v3268_v43, 1.0 }
 0x2b0   : > { %v1648_v61 = vpop.f32.mrb[100].mxu1  ;;  %v2000_v18 = vmul.f32 %v1900_v12, %v1900_v12 }
 0x2b1   : > { %v1795_v29 = vpop.f32.mrb[104].mxu0  ;;  %v1901_v8 = vsel %vm3219_vm6, %v1862_v2, 0.0  ;;  %v1696_v9 = vadd.f32 %v1648_v61, %v3108_v37  ;;  %v2552_v14 = vpop.f32.mrb[101].mxu1  ;;  %vm3295_vm6 = vmand %vm470_vm10, %vm483_vm11  ;;  %vm485_vm10 = vcmp.le.f32.partialorder %v3224_v33, 8.0 }
 0x2b2   : > { %v2582_v39 = vpop.f32.mrb[105].mxu0  ;;  %v2230_v37 = vpack.c.bf16 %v1901_v8, %v1900_v12  ;;  %v1979_v20 = vadd.f32 %v1901_v8, %v1900_v12  ;;  %v2001_v22 = vmul.f32 %v1901_v8, %v1901_v8  ;;  %v1651_v24 = vpop.f32.mrb[102].mxu1  ;;  %vm3325_vm11 = vmand %vm471_vm4, %vm484_vm5  ;;  %vm511_vm4 = vcmp.ge.f32.partialorder %v3314_v40, 1.0 }
 0x2b3   : > { %v1798_v27 = vpop.f32.mrb[106].mxu0  ;;  %v1843_v50 = vadd.f32 %v1795_v29, %v1696_v9  ;;  %v1697_v54 = vadd.f32 %v1651_v24, %v3111_v45  ;;  %v2553_v10 = vpop.f32.mrb[103].mxu1  ;;  %v409_v45 = vcvt.s32.f32 %v3246_v56  ;;  %vm3341_vm13 = vmand %vm3295_vm6, %vm509_vm15  ;;  %v410_v29 = vcvt.s32.f32 %v3301_v1 }
 0x2b4   : > { %v2583_v62 = vpop.f32.mrb[107].mxu0  ;;  %2231 = vst [vmem:[%s3253_s22] sm:$0xff] %v2230_v37   ;;  %v2013_v36 = vadd.f32 %v2001_v22, %v2000_v18  ;;  %vm3352_vm15 = vmand %vm3325_vm11, %vm510_vm9  ;;  %v460_v22 = vsub.f32 %v407_v16, %v447_v48  ;;  %v448_v24 = vmul.f32 10.0, %v3319_v0  ;;  %vm537_vm5 = vcmp.le.f32.partialorder %v3314_v40, 8.0 }
 0x2b5   : > { %v1863_v3 = vadd.f32 %v3182_v26, %v1843_v50  ;;  %v1844_v47 = vadd.f32 %v1798_v27, %v1697_v54  ;;  %v423_v44 = vmul.f32 0.1, %v409_v45  ;;  %vm548_vm0 = vmand %vm3341_vm13, %vm535_vm1  ;;  %v411_v50 = vcvt.s32.f32 %v3332_v34 }
 0x2b6   : > { %v424_v16 = vmul.f32 0.1, %v410_v29  ;;  %vm3386_vm1 = vmand %vm3352_vm15, %vm536_vm12  ;;  %vm474_vm6 = vcmp.ge.f32.partialorder %v3319_v0, 1.0  ;;  %v3397_v43 = vsub.f32 %v408_v59, %v448_v24  ;;  %vm538_vm11 = vcmp.le.f32.partialorder %v460_v22, 8.0 }
 0x2b7   : > { %v1902_v4 = vsel %vm546_vm3, %v1863_v3, 0.0  ;;  %v1864_v46 = vadd.f32 %v3182_v26, %v1844_v47  ;;  %vm3373_vm3 = vmand %vm472_vm7, %vm485_vm10  ;;  %vm487_vm7 = vcmp.le.f32.partialorder %v3319_v0, 8.0  ;;  %v425_v41 = vmul.f32 0.1, %v411_v50 }
 0x2b8   : > { %v1980_v32 = vadd.f32 %v1979_v20, %v1902_v4  ;;  %v2002_v57 = vmul.f32 %v1902_v4, %v1902_v4  ;;  %v1656_v6 = vpop.f32.mrb[104].mxu1  ;;  %vm3403_vm9 = vmand %vm473_vm14, %vm486_vm2  ;;  %v3421_v48 = vfloor.f32 %v424_v16 }
 0x2b9   : > { %v1803_v7 = vpop.f32.mrb[108].mxu0  ;;  %v1903_v12 = vsel %vm3306_vm8, %v1864_v46, 0.0  ;;  %v1698_v2 = vadd.f32 %v1656_v6, %v3114_v60  ;;  %v2556_v53 = vpop.f32.mrb[105].mxu1  ;;  %vm512_vm8 = vcmp.ge.f32.partialorder %v460_v22, 1.0  ;;  %vm3417_vm12 = vmand %vm3373_vm3, %vm511_vm4  ;;  %vm513_vm3 = vcmp.ge.f32.partialorder %v3397_v43, 1.0 }
 0x2ba   : > { %v2586_v61 = vpop.f32.mrb[109].mxu0  ;;  %v2014_v63 = vadd.f32 %v2013_v36, %v2002_v57  ;;  %v2235_v8 = vpack.c.bf16 %v1903_v12, %v1902_v4  ;;  %v1981_v9 = vadd.f32 %v1980_v32, %v1903_v12  ;;  %v2003_v38 = vmul.f32 %v1903_v12, %v1903_v12  ;;  %v1659_v60 = vpop.f32.mrb[106].mxu1  ;;  %vm3428_vm10 = vmand %vm3403_vm9, %vm512_vm8 }
 0x2bb   : > { %v1806_v14 = vpop.f32.mrb[110].mxu0  ;;  %v1845_v39 = vadd.f32 %v1803_v7, %v1698_v2  ;;  %v1699_v15 = vadd.f32 %v1659_v60, %v3117_v58  ;;  %v2557_v37 = vpop.f32.mrb[107].mxu1  ;;  %v3365_v58 = vfloor.f32 %v423_v44  ;;  %v412_v32 = vcvt.s32.f32 %v3380_v5  ;;  %vm550_vm14 = vmand %vm3417_vm12, %vm537_vm5 }
 0x2bc   : > { %v2587_v20 = vpop.f32.mrb[111].mxu0  ;;  %2257 = vst [vmem:[%s3253_s22 + $0x8] sm:$0xff] %v2235_v8   ;;  %v2015_v27 = vadd.f32 %v2014_v63, %v2003_v38  ;;  %v438_v8 = vfloor.f32 %v425_v41  ;;  %v450_v40 = vmul.f32 10.0, %v3421_v48  ;;  %vm551_vm2 = vmand %vm3428_vm10, %vm538_vm11  ;;  %vm476_vm4 = vcmp.ge.f32.partialorder %v3421_v48, 1.0 }
 0x2bd   : > { %v1865_v54 = vadd.f32 %v3182_v26, %v1845_v39  ;;  %v1846_v25 = vadd.f32 %v1806_v14, %v1699_v15  ;;  %v449_v17 = vmul.f32 10.0, %v3365_v58  ;;  %vm475_vm13 = vcmp.ge.f32.partialorder %v3365_v58, 1.0 }
 0x2be   : > { %vm488_vm15 = vcmp.le.f32.partialorder %v3365_v58, 8.0  ;;  %v426_v56 = vmul.f32 0.1, %v412_v32  ;;  %vm489_vm5 = vcmp.le.f32.partialorder %v3421_v48, 8.0  ;;  %v451_v20 = vmul.f32 10.0, %v438_v8 }
 0x2bf   : > { %v1904_v33 = vsel %vm548_vm0, %v1865_v54, 0.0  ;;  %v1866_v30 = vadd.f32 %v3182_v26, %v1846_v25  ;;  %vm3446_vm0 = vmand %vm474_vm6, %vm487_vm7  ;;  %v463_v25 = vsub.f32 %v410_v29, %v450_v40  ;;  %vm477_vm11 = vcmp.ge.f32.partialorder %v438_v8, 1.0 }
 0x2c0   : > { %v1982_v62 = vadd.f32 %v1981_v9, %v1904_v33  ;;  %v2004_v55 = vmul.f32 %v1904_v33, %v1904_v33  ;;  %v1664_v36 = vpop.f32.mrb[108].mxu1  ;;  %vm3465_vm6 = vmand %vm475_vm13, %vm488_vm15  ;;  %v439_v42 = vfloor.f32 %v426_v56  ;;  %v464_v29 = vsub.f32 %v411_v50, %v451_v20 }
 0x2c1   : > { %v1811_v3 = vpop.f32.mrb[112].mxu0  ;;  %v1905_v19 = vsel %vm3386_vm1, %v1866_v30, 0.0  ;;  %v1700_v59 = vadd.f32 %v1664_v36, %v3120_v31  ;;  %v2560_v4 = vpop.f32.mrb[109].mxu1  ;;  %vm539_vm1 = vcmp.le.f32.partialorder %v3397_v43, 8.0  ;;  %vm3474_vm8 = vmand %vm3446_vm0, %vm513_vm3  ;;  %vm515_vm0 = vcmp.ge.f32.partialorder %v463_v25, 1.0 }
 0x2c2   : > { %v2590_v46 = vpop.f32.mrb[113].mxu0  ;;  %v2016_v57 = vadd.f32 %v2015_v27, %v2004_v55  ;;  %v2240_v6 = vpack.c.bf16 %v1905_v19, %v1904_v33  ;;  %v1983_v7 = vadd.f32 %v1982_v62, %v1905_v19  ;;  %v2005_v28 = vmul.f32 %v1905_v19, %v1905_v19  ;;  %v1667_v31 = vpop.f32.mrb[110].mxu1  ;;  %vm552_vm10 = vmand %vm3474_vm8, %vm539_vm1 }
 0x2c3   : > { %v1814_v44 = vpop.f32.mrb[114].mxu0  ;;  %v1847_v12 = vadd.f32 %v1811_v3, %v1700_v59  ;;  %v1701_v2 = vadd.f32 %v1667_v31, %v3125_v11  ;;  %v2561_v53 = vpop.f32.mrb[111].mxu1  ;;  %v462_v11 = vsub.f32 %v409_v45, %v449_v17  ;;  %vm3496_vm13 = vmand %vm476_vm4, %vm489_vm5  ;;  %v452_v43 = vmul.f32 10.0, %v439_v42 }
 0x2c4   : > { %v2591_v61 = vpop.f32.mrb[115].mxu0  ;;  %2258 = vst [vmem:[%s3253_s22 + $0x10] sm:$0xff] %v2240_v6   ;;  %v2017_v63 = vadd.f32 %v2016_v57, %v2005_v28  ;;  %vm516_vm1 = vcmp.ge.f32.partialorder %v464_v29, 1.0  ;;  %vm478_vm4 = vcmp.ge.f32.partialorder %v439_v42, 1.0  ;;  %vm3509_vm5 = vmand %vm3496_vm13, %vm515_vm0  ;;  %vm542_vm8 = vcmp.le.f32.partialorder %v464_v29, 8.0 }
 0x2c5   : > { %v1867_v9 = vadd.f32 %v3182_v26, %v1847_v12  ;;  %v1848_v38 = vadd.f32 %v1814_v44, %v1701_v2  ;;  %vm514_vm7 = vcmp.ge.f32.partialorder %v462_v11, 1.0  ;;  %vm540_vm12 = vcmp.le.f32.partialorder %v462_v11, 8.0 }
 0x2c6   : > { %vm527_vm9 = vmand %vm3465_vm6, %vm514_vm7  ;;  %v465_v31 = vsub.f32 %v412_v32, %v452_v43  ;;  %vm491_vm6 = vcmp.le.f32.partialorder %v439_v42, 8.0  ;;  %vm1990_vm0 = vcmask 1043456  }
 0x2c7   : > { %v1906_v45 = vsel %vm550_vm14, %v1867_v9, 0.0  ;;  %v1868_v0 = vadd.f32 %v3182_v26, %v1848_v38  ;;  %vm490_vm14 = vcmp.le.f32.partialorder %v438_v8, 8.0  ;;  %vm553_vm15 = vmand %vm527_vm9, %vm540_vm12 }
 0x2c8   : > { %v1984_v14 = vadd.f32 %v1983_v7, %v1906_v45  ;;  %v2006_v39 = vmul.f32 %v1906_v45, %v1906_v45  ;;  %v1672_v15 = vpop.f32.mrb[112].mxu1  ;;  %vm3502_vm3 = vmand %vm477_vm11, %vm490_vm14  ;;  %vm517_vm11 = vcmp.ge.f32.partialorder %v465_v31, 1.0  ;;  %vm543_vm14 = vcmp.le.f32.partialorder %v465_v31, 8.0 }
 0x2c9   : > { %v1819_v18 = vpop.f32.mrb[116].mxu0  ;;  %v1907_v22 = vsel %vm551_vm2, %v1868_v0, 0.0  ;;  %v1702_v24 = vadd.f32 %v1672_v15, %v3130_v21  ;;  %v2564_v54 = vpop.f32.mrb[113].mxu1  ;;  %vm541_vm2 = vcmp.le.f32.partialorder %v463_v25, 8.0  ;;  %vm529_vm7 = vmand %vm3502_vm3, %vm516_vm1 }
 0x2ca   : > { %v2594_v58 = vpop.f32.mrb[117].mxu0  ;;  %v2018_v16 = vadd.f32 %v2017_v63, %v2006_v39  ;;  %v2245_v10 = vpack.c.bf16 %v1907_v22, %v1906_v45  ;;  %v1985_v33 = vadd.f32 %v1984_v14, %v1907_v22  ;;  %v2007_v30 = vmul.f32 %v1907_v22, %v1907_v22  ;;  %v1675_v21 = vpop.f32.mrb[114].mxu1  ;;  %vm554_vm9 = vmand %vm3509_vm5, %vm541_vm2 }
 0x2cb   : > { %v1822_v62 = vpop.f32.mrb[118].mxu0  ;;  %v1849_v55 = vadd.f32 %v1819_v18, %v1702_v24  ;;  %v1703_v36 = vadd.f32 %v1675_v21, %v3133_v52  ;;  %v2565_v3 = vpop.f32.mrb[115].mxu1  ;;  %vm504_vm12 = vmand %vm478_vm4, %vm491_vm6 }
 0x2cc   : > { %v2595_v47 = vpop.f32.mrb[119].mxu0  ;;  %2259 = vst [vmem:[%s3253_s22 + $0x18] sm:$0xff] %v2245_v10   ;;  %v2019_v1 = vadd.f32 %v2018_v16, %v2007_v30  ;;  %vm3528_vm13 = vmand %vm504_vm12, %vm517_vm11 }
 0x2cd   : > { %v1869_v52 = vadd.f32 %v3182_v26, %v1849_v55  ;;  %v1850_v17 = vadd.f32 %v1822_v62, %v1703_v36 }
 0x2cf   : > { %v1908_v19 = vsel %vm552_vm10, %v1869_v52, 0.0  ;;  %v1870_v34 = vadd.f32 %v3182_v26, %v1850_v17  ;;  %vm555_vm10 = vmand %vm529_vm7, %vm542_vm8 }
 0x2d0   : > { %v1986_v50 = vadd.f32 %v1985_v33, %v1908_v19  ;;  %v2008_v59 = vmul.f32 %v1908_v19, %v1908_v19  ;;  %v1680_v23 = vpop.f32.mrb[116].mxu1 }
 0x2d1   : > { %v1827_v4 = vpop.f32.mrb[120].mxu0  ;;  %v1909_v48 = vsel %vm553_vm15, %v1870_v34, 0.0  ;;  %v1704_v57 = vadd.f32 %v1680_v23, %v3146_v51  ;;  %v2568_v7 = vpop.f32.mrb[117].mxu1  ;;  %vm556_vm15 = vmand %vm3528_vm13, %vm543_vm14 }
 0x2d2   : > { %v2598_v28 = vpop.f32.mrb[121].mxu0  ;;  %v2020_v44 = vadd.f32 %v2019_v1, %v2008_v59  ;;  %v2250_v12 = vpack.c.bf16 %v1909_v48, %v1908_v19  ;;  %v1987_v2 = vadd.f32 %v1986_v50, %v1909_v48  ;;  %v2009_v35 = vmul.f32 %v1909_v48, %v1909_v48  ;;  %v1683_v53 = vpop.f32.mrb[118].mxu1 }
 0x2d3   : > { %v1830_v61 = vpop.f32.mrb[122].mxu0  ;;  %v1851_v51 = vadd.f32 %v1827_v4, %v1704_v57  ;;  %v1705_v63 = vadd.f32 %v1683_v53, %v3151_v49  ;;  %v2569_v11 = vpop.f32.mrb[119].mxu1 }
 0x2d4   : > { %v2599_v8 = vpop.f32.mrb[123].mxu0  ;;  %2260 = vst [vmem:[%s3253_s22 + $0x20] sm:$0xff] %v2250_v12   ;;  %v2021_v5 = vadd.f32 %v2020_v44, %v2009_v35 }
 0x2d5   : > { %v1871_v32 = vadd.f32 %v3182_v26, %v1851_v51  ;;  %v1852_v9 = vadd.f32 %v1830_v61, %v1705_v63 }
 0x2d7   : > { %v1910_v49 = vsel %vm554_vm9, %v1871_v32, 0.0  ;;  %v1872_v38 = vadd.f32 %v3182_v26, %v1852_v9 }
 0x2d8   : > { %v1988_v60 = vadd.f32 %v1987_v2, %v1910_v49  ;;  %v2010_v40 = vmul.f32 %v1910_v49, %v1910_v49  ;;  %v1688_v56 = vpop.f32.mrb[120].mxu1 }
 0x2d9   : > { %v1835_v45 = vpop.f32.mrb[124].mxu0  ;;  %v1911_v0 = vsel %vm555_vm10, %v1872_v38, 0.0  ;;  %v1706_v14 = vadd.f32 %v1688_v56, %v3165_v13  ;;  %v2572_v15 = vpop.f32.mrb[121].mxu1 }
 0x2da   : > { %v2602_v18 = vpop.f32.mrb[125].mxu0  ;;  %v2022_v37 = vadd.f32 %v2021_v5, %v2010_v40  ;;  %v2255_v20 = vpack.c.bf16 %v1911_v0, %v1910_v49  ;;  %v1989_v22 = vadd.f32 %v1988_v60, %v1911_v0  ;;  %v2011_v24 = vmul.f32 %v1911_v0, %v1911_v0  ;;  %v1691_v27 = vpop.f32.mrb[122].mxu1 }
 0x2db   : > { %v1838_v54 = vpop.f32.mrb[126].mxu0  ;;  %v1853_v58 = vadd.f32 %v1835_v45, %v1706_v14  ;;  %v2573_v25 = vpop.f32.mrb[123].mxu1 }
 0x2dc   : > { %v2603_v42 = vpop.f32.mrb[127].mxu0  ;;  %2261 = vst [vmem:[%s3253_s22 + $0x28] sm:$0xff] %v2255_v20   ;;  %v2023_v16 = vadd.f32 %v2022_v37, %v2011_v24 }
 0x2dd   : > { %v1873_v13 = vadd.f32 %v3182_v26, %v1853_v58 }
 0x2df   : > { %v1912_v10 = vsel %vm556_vm15, %v1873_v13, 0.0 }
 0x2e0   : > { %v2226_v33 = vpack.c.bf16 %v1912_v10, %v1912_v10  ;;  %v1991_v30 = vsel %vm1990_vm0, %v1912_v10, 0.0  ;;  %v2012_v21 = vmul.f32 %v1912_v10, %v1912_v10 }
 0x2e1   : > { %v1992_v62 = vadd.f32 %v1991_v30, %v1989_v22 }
 0x2e2   : > { %1978 = vst [vmem:[%s3253_s22 + $0x30] sm:$0x3] %v2226_v33  ;;  %v2024_v55 = vsel %vm1990_vm0, %v2012_v21, 0.0 }
 0x2e3   : > { %v1993_v36 = vrot.slane %v1992_v62, 4  ;;  %v2025_v3 = vadd.f32 %v2024_v55, %v2023_v16 }
 0x2e5   : > { %v1994_v47 = vadd.f32 %v1993_v36, %v1992_v62  ;;  %v2026_v1 = vrot.slane %v2025_v3, 4 }
 0x2e7   : > { %v1995_v29 = vrot.slane %v1994_v47, 2  ;;  %v2027_v52 = vadd.f32 %v2026_v1, %v2025_v3 }
 0x2e9   : > { %v1996_v17 = vadd.f32 %v1995_v29, %v1994_v47  ;;  %v2028_v41 = vrot.slane %v2027_v52, 2 }
 0x2eb   : > { %v1997_v43 = vrot.slane %v1996_v17, 1  ;;  %v2029_v19 = vadd.f32 %v2028_v41, %v2027_v52 }
 0x2ed   : > { %v1998_v26 = vadd.f32 %v1997_v43, %v1996_v17  ;;  %v2030_v34 = vrot.slane %v2029_v19, 1 }
 0x2ef   : > { %1999 = vst [vmem:[%s208_s25] sm:$0x1] %v1998_v26  ;;  %v2031_v50 = vadd.f32 %v2030_v34, %v2029_v19 }
 0x2f1   : > { %2032 = vst [vmem:[%s208_s25 + $0x1] sm:$0x1] %v2031_v50 }
 0x2f2 PF: > { %s15_s15 = sadd.s32 1, %s2625_s15  }
 0x2f3   : > { %p12_p4 = scmp.ge.s32.totalorder %s15_s15, 4  }
 0x2f5   :  { %14 = sbr.rel (!%p12_p4) target bundleno = 1 (0x1), region = 82 }

// kernel: down_forward.4
= control target key start
LH: loop header
LB: loop body
LE: loop exit
PB: predicated region body
PF: predicated region fallthrough
CT: control target
= control target key end

     0   :  { %s3453_s21 = smov 0   ;;  %s4559_s0 = inlined_call_operand.vmem [shape: bf16[2,100,128], index: 0, kind: input, shape index: {}]   ;;  %s4560_s1 = inlined_call_operand.vmem [shape: f32[1,128], index: 1, kind: input, shape index: {}]   ;;  %s4561_s2 = inlined_call_operand.vmem [shape: f32[1,128], index: 2, kind: input, shape index: {}]   ;;  %s4562_s3 = inlined_call_operand.vmem [shape: bf16[9,128,128], index: 3, kind: input, shape index: {}]   ;;  %s4563_s4 = inlined_call_operand.vmem [shape: f32[1,128], index: 4, kind: input, shape index: {}]   ;;  %s4564_s5 = inlined_call_operand.vmem [shape: bf16[2,100,128], index: 5, kind: output, shape index: {0}]   ;;  %s4565_s6 = inlined_call_operand.vmem [shape: f32[2,2,128], index: 6, kind: output, shape index: {1}]  }
   0x1 LB: > { %s2456_s22 = sadd.s32 4294967295, %s3414_s21   ;;  %p2460_p0 = scmp.ge.s32.totalorder %s3414_s21, 1  ;;  %s3414_s21 = sphi %s3453_s21, %s17_s21  }
   0x2   : > { %p215_p1 = scmp.lt.s32.totalorder %s3414_s21, 3 }
   0x4   : > { %p216_p2 = pnand %p2460_p0, %p215_p1 }
   0x5   : > { %v3317_v0 = vld [vmem:[%s4562_s3 + $0x40] sm:$0xff] (!%p216_p2)   ;;  %v264_v1 = vlaneseq (!%p216_p2)  ;;  %v3416_v2 = vmov (!%p216_p2), 0.0   ;;  %v3318_v3 = vld [vmem:[%s4562_s3 + $0x48] sm:$0xff] (!%p216_p2)   ;;  %p249_p3 = scmp.lt.s32.totalorder (!%p216_p2), %s2456_s22, 1  ;;  %vm4566_vm0 = vmmov (!%p216_p2), 0   ;;  %v3319_v7 = vld [vmem:[%s4562_s3 + $0x50] sm:$0xff] (!%p216_p2)  }
   0x6   : > { %219 = sbr.rel (%p216_p2) target bundleno = 535 (0x217), region = 40  ;;  %2894 = vmatprep.subr.bf16.mxu0 (!%p216_p2), %v3416_v2  ;;  %553 = vst [vmem:[#allocation2] sm:$0xff] (!%p216_p2), %v3416_v2  ;;  %554 = vst [vmem:[#allocation2 + $0x8] sm:$0x7] (!%p216_p2), %v3416_v2  ;;  %3290 = vmatprep.subr.bf16.mxu1 (!%p216_p2), %v3416_v2  ;;  %v3502_v11 = vld [vmem:[%s4560_s1] ss:$0 sm:$0xff] (!%p216_p2) }
   0x7   : > { %555 = vst [vmem:[#allocation2 + $0x6f] sm:$0xff] (!%p216_p2), %v3416_v2  ;;  %556 = vst [vmem:[#allocation2 + $0x77] sm:$0x7] (!%p216_p2), %v3416_v2  ;;  %2895 = vmatpush3.bf16.msra.mxu0 (!%p216_p2), %v3317_v0  ;;  %3298 = vmatpush3.bf16.msra.mxu1 (!%p216_p2), %v3317_v0  ;;  %v3475_v4 = vshrl.u32 (!%p216_p2), %v264_v1, 7  ;;  %v3320_v12 = vld [vmem:[%s4562_s3 + $0x58] sm:$0xff] (!%p216_p2)   ;;  %v3321_v28 = vld [vmem:[%s4562_s3 + $0x60] sm:$0xff] (!%p216_p2)  }
   0x8   : > { %2896 = vmatprep.subr.bf16.mxu0 (!%p216_p2), %v3416_v2  ;;  %3291 = vmatprep.subr.bf16.mxu1 (!%p216_p2), %v3416_v2  ;;  %v3521_v23 = vld [vmem:[%s4561_s2] ss:$0 sm:$0xff] (!%p216_p2)  ;;  %v3322_v43 = vld [vmem:[%s4562_s3 + $0x68] sm:$0xff] (!%p216_p2)   ;;  %v3323_v58 = vld [vmem:[%s4562_s3 + $0x70] sm:$0xff] (!%p216_p2)  }
   0x9   : > { %2910 = vmatprep.mubr.msk.bf16.mxu0 (!%p216_p2), %vm4566_vm0, %v3416_v2  ;;  %2926 = vmatprep.mubr.msk.bf16.mxu1 (!%p216_p2), %vm4566_vm0, %v3416_v2  ;;  %v278_v5 = vcvt.s32.f32 (!%p216_p2), %v3475_v4  ;;  %v271_v6 = vadd.s32 (!%p216_p2), 48, %v3475_v4  ;;  %v272_v8 = vadd.s32 (!%p216_p2), 56, %v3475_v4  ;;  %v273_v14 = vadd.s32 (!%p216_p2), 64, %v3475_v4  ;;  %v3325_v59 = vld [vmem:[%s4562_s3] sm:$0xff] (!%p216_p2)  }
   0xa   : > { %v3583_v56 = vadd.s32 (!%p216_p2), 8, %v3475_v4  ;;  %v3599_v60 = vadd.s32 (!%p216_p2), 16, %v3475_v4  ;;  %v3705_v51 = vadd.s32 (!%p216_p2), 24, %v3475_v4  ;;  %v3708_v52 = vadd.s32 (!%p216_p2), 32, %v3475_v4 }
   0xb   : > { %2897 = vmatpush3.bf16.msra.mxu0 (!%p216_p2), %v3318_v3  ;;  %3299 = vmatpush3.bf16.msra.mxu1 (!%p216_p2), %v3318_v3  ;;  %v284_v9 = vcvt.s32.f32 (!%p216_p2), %v271_v6  ;;  %v292_v10 = vmul.f32 (!%p216_p2), 0.1, %v278_v5  ;;  %v285_v15 = vcvt.s32.f32 (!%p216_p2), %v272_v8  ;;  %v286_v24 = vcvt.s32.f32 (!%p216_p2), %v273_v14  ;;  %v3328_v6 = vld [vmem:[%s4562_s3 + $0x88] sm:$0xff] (!%p216_p2)  }
   0xc   : > { %2898 = vmatprep.subr.bf16.mxu0 (!%p216_p2), %v3416_v2  ;;  %3292 = vmatprep.subr.bf16.mxu1 (!%p216_p2), %v3416_v2  ;;  %v279_v3 = vcvt.s32.f32 (!%p216_p2), %v3583_v56 }
   0xd   : > { %s4639_s22 = smov (!%p249_p3, %s2456_s22), 1  ;;  %v298_v16 = vmul.f32 0.1, %v284_v9  ;;  %v305_v18 = vfloor.f32 %v292_v10  ;;  %v299_v25 = vmul.f32 0.1, %v285_v15  ;;  %v3629_v10 = vadd.s32 72, %v3475_v4 }
   0xe   : > { %s3306_s29 = smul.u32 52, %s4639_s22  ;;  %v300_v31 = vmul.f32 0.1, %v286_v24  ;;  %v293_v14 = vmul.f32 0.1, %v279_v3 }
   0xf   : > { %2899 = vmatpush3.bf16.msra.mxu0 %v3319_v7  ;;  %3300 = vmatpush3.bf16.msra.mxu1 %v3319_v7  ;;  %v311_v26 = vfloor.f32 %v298_v16  ;;  %v318_v29 = vmul.f32 10.0, %v305_v18  ;;  %vm344_vm1 = vcmp.ge.f32.partialorder %v305_v18, 1.0  ;;  %vm357_vm2 = vcmp.le.f32.partialorder %v305_v18, 8.0  ;;  %v606_v18 = vld [vmem:[#allocation2 + $0x1] sm:$0xff] }
  0x10   : > { %s3497_s8 = scalar_lea.vmem %s4559_s0, %s3306_s29  ;;  %2900 = vmatprep.subr.bf16.mxu0 %v3416_v2  ;;  %3293 = vmatprep.subr.bf16.mxu1 %v3416_v2  ;;  %v312_v32 = vfloor.f32 %v299_v25  ;;  %vm3528_vm4 = vmand %vm344_vm1, %vm357_vm2  ;;  %v313_v38 = vfloor.f32 %v300_v31  ;;  %v280_v7 = vcvt.s32.f32 %v3599_v60  ;;  %v4598_v25 = vmov 0  ;;  %s4498_s11 = scalar_lea.vmem %s4564_s5, %s3306_s29 }
  0x11   : > { %v3508_v13 = vld [vmem:[%s3497_s8] sm:$0xff]   ;;  %v2751_v17 = vld [vmem:[%s3497_s8 + $0x18] sm:$0xff]   ;;  %v324_v33 = vmul.f32 10.0, %v311_v26  ;;  %vm350_vm3 = vcmp.ge.f32.partialorder %v311_v26, 1.0  ;;  %v331_v34 = vsub.f32 %v278_v5, %v318_v29  ;;  %vm363_vm5 = vcmp.le.f32.partialorder %v311_v26, 8.0  ;;  %v3586_v57 = vld [vmem:[%s3497_s8 + $0x8] sm:$0xff]  }
  0x12   : > { %v2697_v19 = vunpack.c.l.bf16 %v3508_v13  ;;  %v2709_v20 = vunpack.c.l.bf16 %v2751_v17  ;;  %v2710_v21 = vunpack.c.h.bf16 %v2751_v17  ;;  %v3514_v22 = vld [vmem:[%s3497_s8 + $0x20] sm:$0xff]   ;;  %v325_v39 = vmul.f32 10.0, %v312_v32  ;;  %vm3540_vm10 = vmand %vm350_vm3, %vm363_vm5  ;;  %v3614_v5 = vld [vmem:[%s3497_s8 + $0x28] sm:$0xff]   ;;  %s2463_s29 = sshll.u32 %s4639_s22, 1 }
  0x13   : > { %v2713_v27 = vunpack.c.l.bf16 %v3514_v22  ;;  %2901 = vmatpush3.bf16.msra.mxu0 %v3320_v12  ;;  %3301 = vmatpush3.bf16.msra.mxu1 %v3320_v12  ;;  %v337_v40 = vsub.f32 %v284_v9, %v324_v33  ;;  %vm351_vm6 = vcmp.ge.f32.partialorder %v312_v32, 1.0  ;;  %vm383_vm7 = vcmp.ge.f32.partialorder %v331_v34, 1.0  ;;  %v3324_v12 = vld [vmem:[%s4562_s3 + $0x78] sm:$0xff]   ;;  %s262_s13 = scalar_lea.vmem %s4565_s6, %s2463_s29 }
  0x14   : > { %v468_v30 = vmul.f32 %v2697_v19, %v3502_v11  ;;  %v474_v37 = vmul.f32 %v2709_v20, %v3502_v11  ;;  %2902 = vmatprep.subr.bf16.mxu0 %v3416_v2  ;;  %3294 = vmatprep.subr.bf16.mxu1 %v3416_v2  ;;  %vm409_vm8 = vcmp.le.f32.partialorder %v331_v34, 8.0  ;;  %vm364_vm9 = vcmp.le.f32.partialorder %v312_v32, 8.0  ;;  %vm396_vm11 = vmand %vm3528_vm4, %vm383_vm7 }
  0x15   : > { %v326_v44 = vmul.f32 10.0, %v313_v38  ;;  %v338_v45 = vsub.f32 %v285_v15, %v325_v39  ;;  %vm352_vm12 = vcmp.ge.f32.partialorder %v313_v38, 1.0  ;;  %vm365_vm13 = vcmp.le.f32.partialorder %v313_v38, 8.0  ;;  %vm3549_vm14 = vmand %vm396_vm11, %vm409_vm8 }
  0x16   : > { %v3533_v36 = vadd.f32 %v3521_v23, %v468_v30  ;;  %vm389_vm15 = vcmp.ge.f32.partialorder %v337_v40, 1.0  ;;  %vm415_vm1 = vcmp.le.f32.partialorder %v337_v40, 8.0  ;;  %v475_v47 = vmul.f32 %v2710_v21, %v3502_v11  ;;  %vm3563_vm2 = vmand %vm351_vm6, %vm364_vm9 }
  0x17   : > { %2903 = vmatpush3.bf16.msra.mxu0 %v3321_v28  ;;  %3302 = vmatpush3.bf16.msra.mxu1 %v3321_v28  ;;  %v476_v48 = vmul.f32 %v2713_v27, %v3502_v11  ;;  %v339_v50 = vsub.f32 %v286_v24, %v326_v44  ;;  %vm390_vm3 = vcmp.ge.f32.partialorder %v338_v45, 1.0  ;;  %vm416_vm4 = vcmp.le.f32.partialorder %v338_v45, 8.0  ;;  %vm3569_vm5 = vmand %vm352_vm12, %vm365_vm13 }
  0x18   : > { %v501_v41 = vmax.f32 %v3533_v36, 0.0  ;;  %2904 = vmatprep.subr.bf16.mxu0 %v3416_v2  ;;  %3295 = vmatprep.subr.bf16.mxu1 %v3416_v2  ;;  %v3574_v53 = vadd.f32 %v3521_v23, %v474_v37  ;;  %v3577_v54 = vadd.f32 %v3521_v23, %v475_v47  ;;  %vm3594_vm7 = vmand %vm3540_vm10, %vm389_vm15  ;;  %v2698_v61 = vunpack.c.h.bf16 %v3508_v13  ;;  %v3326_v37 = vld [vmem:[%s4562_s3 + $0x80] sm:$0xff]   ;;  %v3361_v36 = vld [vmem:[%s4562_s3 + $0x150] sm:$0xff]  }
  0x19   : > { %v3580_v55 = vadd.f32 %v3521_v23, %v476_v48  ;;  %vm391_vm6 = vcmp.ge.f32.partialorder %v339_v50, 1.0  ;;  %vm417_vm8 = vcmp.le.f32.partialorder %v339_v50, 8.0  ;;  %vm3605_vm9 = vmand %vm3563_vm2, %vm390_vm3  ;;  %v2701_v8 = vunpack.c.l.bf16 %v3586_v57 }
  0x1a   : > { %v540_v49 = vsel %vm3549_vm14, %v501_v41, 0.0  ;;  %v507_v63 = vmax.f32 %v3574_v53, 0.0  ;;  %v508_v0 = vmax.f32 %v3577_v54, 0.0  ;;  %vm3621_vm10 = vmand %vm3569_vm5, %vm391_vm6  ;;  %v469_v9 = vmul.f32 %v2698_v61, %v3502_v11 }
  0x1b   : > { %557 = vst [vmem:[#allocation2 + $0xb] sm:$0xff] %v540_v49  ;;  %2905 = vmatpush3.bf16.msra.mxu0 %v3322_v43  ;;  %3303 = vmatpush3.bf16.msra.mxu1 %v3322_v43  ;;  %v509_v1 = vmax.f32 %v3580_v55, 0.0  ;;  %vm3637_vm11 = vmand %vm3594_vm7, %vm415_vm1  ;;  %v4594_v13 = vmov 0  ;;  %v3642_v15 = vadd.s32 80, %v3475_v4  ;;  %v2714_v16 = vunpack.c.h.bf16 %v3514_v22  ;;  %v3332_v43 = vld [vmem:[%s4562_s3 + $0x98] sm:$0xff]  }
  0x1c   : > { %2906 = vmatprep.subr.bf16.mxu0 %v3416_v2  ;;  %3296 = vmatprep.subr.bf16.mxu1 %v3416_v2  ;;  %v4595_v13 = vsel %vm3637_vm11, 4294967295, %v4594_v13  ;;  %v2717_v17 = vunpack.c.l.bf16 %v3614_v5  ;;  %vm3649_vm12 = vmand %vm3605_vm9, %vm416_vm4  ;;  %v4596_v19 = vmov 0  ;;  %v546_v20 = vsel %vm3637_vm11, %v507_v63, 0.0 }
  0x1d   : > { %v4597_v19 = vsel %vm3649_vm12, 4294967295, %v4596_v19  ;;  %v294_v21 = vmul.f32 0.1, %v280_v7  ;;  %v470_v24 = vmul.f32 %v2701_v8, %v3502_v11  ;;  %v3659_v22 = vadd.f32 %v3521_v23, %v469_v9  ;;  %vm3664_vm13 = vmand %vm3621_vm10, %vm417_vm8  ;;  %563 = vst [vmem:[#allocation2 + $0x3b] sm:$0xff] %v546_v20 }
  0x1e   : > { %v4599_v25 = vsel %vm3664_vm13, 4294967295, %v4598_v25  ;;  %v547_v26 = vsel %vm3649_vm12, %v508_v0, 0.0  ;;  %v306_v27 = vfloor.f32 %v293_v14  ;;  %v287_v28 = vcvt.s32.f32 %v3629_v10 }
  0x1f   : > { %2907 = vmatpush3.bf16.msra.mxu0 %v3323_v58  ;;  %3304 = vmatpush3.bf16.msra.mxu1 %v3323_v58  ;;  %v288_v29 = vcvt.s32.f32 %v3642_v15  ;;  %v548_v31 = vsel %vm3664_vm13, %v509_v1, 0.0  ;;  %564 = vst [vmem:[#allocation2 + $0x43] sm:$0xff] %v547_v26  ;;  %v307_v32 = vfloor.f32 %v294_v21  ;;  %v3681_v33 = vadd.f32 %v3521_v23, %v470_v24  ;;  %v3327_v15 = vld [vmem:[%s4562_s3 + $0x8] sm:$0xff]  }
  0x20   : > { %2908 = vmatprep.subr.bf16.mxu0 %v3416_v2  ;;  %3297 = vmatprep.subr.bf16.mxu1 %v3416_v2  ;;  %v502_v34 = vmax.f32 %v3659_v22, 0.0  ;;  %565 = vst [vmem:[#allocation2 + $0x4b] sm:$0xff] %v548_v31  ;;  %v319_v38 = vmul.f32 10.0, %v306_v27  ;;  %vm345_vm15 = vcmp.ge.f32.partialorder %v306_v27, 1.0  ;;  %vm358_vm1 = vcmp.le.f32.partialorder %v306_v27, 8.0  ;;  %v3363_v22 = vld [vmem:[%s4562_s3 + $0x158] sm:$0xff]  }
  0x21   : > { %v320_v39 = vmul.f32 10.0, %v307_v32  ;;  %vm346_vm2 = vcmp.ge.f32.partialorder %v307_v32, 1.0  ;;  %vm359_vm3 = vcmp.le.f32.partialorder %v307_v32, 8.0  ;;  %v503_v40 = vmax.f32 %v3681_v33, 0.0  ;;  %vm3688_vm4 = vmand %vm345_vm15, %vm358_vm1  ;;  %v3365_v33 = vld [vmem:[%s4562_s3 + $0x160] sm:$0xff]  }
  0x22   : > { %v607_v30 = vld [vmem:[#allocation2 + $0x9] sm:$0xff]  ;;  %v332_v42 = vsub.f32 %v279_v3, %v319_v38  ;;  %v301_v44 = vmul.f32 0.1, %v287_v28  ;;  %v302_v45 = vmul.f32 0.1, %v288_v29  ;;  %v477_v47 = vmul.f32 %v2714_v16, %v3502_v11  ;;  %vm3699_vm5 = vmand %vm346_vm2, %vm359_vm3 }
  0x23   : > { %v619_v35 = vpack.c.bf16 %v607_v30, %v606_v18  ;;  %2909 = vmatpush3.bf16.msra.mxu0 %v3324_v12  ;;  %3305 = vmatpush3.bf16.msra.mxu1 %v3324_v12  ;;  %v333_v48 = vsub.f32 %v280_v7, %v320_v39  ;;  %v478_v50 = vmul.f32 %v2717_v17, %v3502_v11  ;;  %v3743_v17 = vld [vmem:[%s3497_s8 + $0x10] sm:$0xff]   ;;  %v281_v31 = vcvt.s32.f32 %v3705_v51 }
  0x24   : > { %2938 = vmatprep.subr.bf16.mxu1 %v3416_v2  ;;  %2982 = vmatprep.subr.bf16.mxu0 %v3416_v2  ;;  %vm384_vm6 = vcmp.ge.f32.partialorder %v332_v42, 1.0  ;;  %vm410_vm7 = vcmp.le.f32.partialorder %v332_v42, 8.0  ;;  %v314_v56 = vfloor.f32 %v301_v44  ;;  %v315_v58 = vfloor.f32 %v302_v45 }
  0x25   : > { %vm385_vm8 = vcmp.ge.f32.partialorder %v333_v48, 1.0  ;;  %vm3715_vm9 = vmand %vm3688_vm4, %vm384_vm6  ;;  %vm411_vm10 = vcmp.le.f32.partialorder %v333_v48, 8.0  ;;  %v3720_v61 = vadd.f32 %v3521_v23, %v477_v47  ;;  %v3723_v62 = vadd.f32 %v3521_v23, %v478_v50 }
  0x26   : > { %2911 = vmatmul.mubr.bf16.vlgmr.msra.gmra.mrb[0].mxu0 %v619_v35  ;;  %v614_v3 = vld [vmem:[#allocation2 + $0x41] sm:$0xff]  ;;  %vm398_vm15 = vmand %vm3699_vm5, %vm385_vm8  ;;  %v327_v7 = vmul.f32 10.0, %v314_v56  ;;  %v328_v8 = vmul.f32 10.0, %v315_v58  ;;  %vm353_vm1 = vcmp.ge.f32.partialorder %v314_v56, 1.0  ;;  %vm354_vm2 = vcmp.ge.f32.partialorder %v315_v58, 1.0 }
  0x27   : > { %2983 = vmatpush3.bf16.msra.mxu0 %v3326_v37  ;;  %2914 = vmatprep.mubr.msk.bf16.mxu0 %vm4566_vm0, %v3416_v2  ;;  %v615_v9 = vld [vmem:[#allocation2 + $0x49] sm:$0xff]  ;;  %vm3736_vm3 = vmand %vm3715_vm9, %vm410_vm7  ;;  %vm366_vm4 = vcmp.le.f32.partialorder %v314_v56, 8.0  ;;  %vm367_vm6 = vcmp.le.f32.partialorder %v315_v58, 8.0  ;;  %v510_v14 = vmax.f32 %v3720_v61, 0.0  ;;  %v511_v16 = vmax.f32 %v3723_v62, 0.0 }
  0x28   : > { %2984 = vmatprep.subr.bf16.mxu0 %v3416_v2  ;;  %v623_v18 = vpack.c.bf16 %v615_v9, %v614_v3  ;;  %vm3746_vm5 = vmand %vm398_vm15, %vm411_vm10  ;;  %v541_v21 = vsel %vm3736_vm3, %v502_v34, 0.0  ;;  %v340_v24 = vsub.f32 %v287_v28, %v327_v7  ;;  %v341_v26 = vsub.f32 %v288_v29, %v328_v8  ;;  %v3330_v28 = vld [vmem:[%s4562_s3 + $0x90] sm:$0xff]   ;;  %v3331_v9 = vld [vmem:[%s4562_s3 + $0x18] sm:$0xff]  }
  0x29   : > { %v542_v27 = vsel %vm3746_vm5, %v503_v40, 0.0  ;;  %558 = vst [vmem:[#allocation2 + $0x13] sm:$0xff] %v541_v21  ;;  %vm3763_vm7 = vmand %vm353_vm1, %vm366_vm4  ;;  %v282_v32 = vcvt.s32.f32 %v3708_v52  ;;  %v2702_v10 = vunpack.c.h.bf16 %v3586_v57  ;;  %v295_v57 = vmul.f32 0.1, %v281_v31  ;;  %v3329_v58 = vld [vmem:[%s4562_s3 + $0x10] sm:$0xff]   ;;  %v3340_v21 = vld [vmem:[%s4562_s3 + $0xb8] sm:$0xff]  }
  0x2a   : > { %2927 = vmatmul.mubr.bf16.vlgmr.msra.gmra.mrb[0].mxu1 %v623_v18  ;;  %559 = vst [vmem:[#allocation2 + $0x1b] sm:$0xff] %v542_v27  ;;  %vm380_vm8 = vmand %vm354_vm2, %vm367_vm6  ;;  %vm392_vm9 = vcmp.ge.f32.partialorder %v340_v24, 1.0  ;;  %vm393_vm10 = vcmp.ge.f32.partialorder %v341_v26, 1.0  ;;  %vm418_vm15 = vcmp.le.f32.partialorder %v340_v24, 8.0  ;;  %vm419_vm1 = vcmp.le.f32.partialorder %v341_v26, 8.0 }
  0x2b   : > { %2985 = vmatpush3.bf16.msra.mxu0 %v3328_v6  ;;  %2939 = vmatpush3.bf16.msra.mxu1 %v3325_v59  ;;  %vm405_vm4 = vmand %vm3763_vm7, %vm392_vm9  ;;  %v296_v29 = vmul.f32 0.1, %v282_v32  ;;  %v2705_v35 = vunpack.c.l.bf16 %v3743_v17  ;;  %v471_v37 = vmul.f32 %v2702_v10, %v3502_v11  ;;  %v3787_v38 = vadd.s32 88, %v3475_v4 }
  0x2c   : > { %2986 = vmatprep.subr.bf16.mxu0 %v3416_v2  ;;  %2940 = vmatprep.subr.bf16.mxu1 %v3416_v2  ;;  %vm406_vm2 = vmand %vm380_vm8, %vm393_vm10  ;;  %v2718_v39 = vunpack.c.h.bf16 %v3614_v5  ;;  %v3791_v42 = vadd.s32 40, %v3475_v4  ;;  %v4612_v44 = vmov 0  ;;  %v308_v45 = vfloor.f32 %v295_v57 }
  0x2d   : > { %2930 = vmatprep.mubr.msk.bf16.mxu1 %vm4566_vm0, %v3416_v2  ;;  %vm3797_vm6 = vmand %vm405_vm4, %vm418_vm15  ;;  %v309_v47 = vfloor.f32 %v296_v29  ;;  %v472_v48 = vmul.f32 %v2705_v35, %v3502_v11  ;;  %v2706_v49 = vunpack.c.h.bf16 %v3743_v17  ;;  %v4614_v5 = vmov 0  ;;  %v3333_v35 = vld [vmem:[%s4562_s3 + $0x20] sm:$0xff]  }
  0x2e   : > { %v4613_v44 = vsel %vm3797_vm6, 4294967295, %v4612_v44  ;;  %vm3804_vm7 = vmand %vm406_vm2, %vm419_vm1  ;;  %v549_v50 = vsel %vm3797_vm6, %v510_v14, 0.0  ;;  %v3813_v51 = vadd.f32 %v3521_v23, %v471_v37  ;;  %v289_v52 = vcvt.s32.f32 %v3787_v38  ;;  %v3338_v38 = vld [vmem:[%s4562_s3 + $0xb0] sm:$0xff]  }
  0x2f   : > { %2987 = vmatpush3.bf16.msra.mxu0 %v3330_v28  ;;  %v4615_v5 = vsel %vm3804_vm7, 4294967295, %v4614_v5  ;;  %v283_v56 = vcvt.s32.f32 %v3791_v42  ;;  %2941 = vmatpush3.bf16.msra.mxu1 %v3327_v15  ;;  %v550_v59 = vsel %vm3804_vm7, %v511_v16, 0.0  ;;  %566 = vst [vmem:[#allocation2 + $0x53] sm:$0xff] %v549_v50  ;;  %v321_v60 = vmul.f32 10.0, %v308_v45  ;;  %v3335_v42 = vld [vmem:[%s4562_s3 + $0x28] sm:$0xff]  }
  0x30   : > { %2988 = vmatprep.subr.bf16.mxu0 %v3416_v2  ;;  %v322_v3 = vmul.f32 10.0, %v309_v47  ;;  %vm347_vm8 = vcmp.ge.f32.partialorder %v308_v45, 1.0  ;;  %v608_v6 = vld [vmem:[#allocation2 + $0x11] sm:$0xff]  ;;  %2942 = vmatprep.subr.bf16.mxu1 %v3416_v2  ;;  %567 = vst [vmem:[#allocation2 + $0x5b] sm:$0xff] %v550_v59  ;;  %vm348_vm9 = vcmp.ge.f32.partialorder %v309_v47, 1.0  ;;  %vm360_vm10 = vcmp.le.f32.partialorder %v308_v45, 8.0 }
  0x31   : > { %vm361_vm15 = vcmp.le.f32.partialorder %v309_v47, 8.0  ;;  %v3827_v7 = vadd.f32 %v3521_v23, %v472_v48  ;;  %v609_v8 = vld [vmem:[#allocation2 + $0x19] sm:$0xff]  ;;  %v334_v17 = vsub.f32 %v281_v31, %v321_v60  ;;  %vm3832_vm1 = vmand %vm347_vm8, %vm360_vm10  ;;  %v303_v24 = vmul.f32 0.1, %v289_v52  ;;  %v3336_v45 = vld [vmem:[%s4562_s3 + $0xa8] sm:$0xff]  }
  0x32   : > { %v335_v18 = vsub.f32 %v282_v32, %v322_v3  ;;  %v479_v26 = vmul.f32 %v2718_v39, %v3502_v11  ;;  %v620_v27 = vpack.c.bf16 %v609_v8, %v608_v6  ;;  %vm3839_vm4 = vmand %vm348_vm9, %vm361_vm15  ;;  %v504_v10 = vmax.f32 %v3813_v51, 0.0  ;;  %v3334_v31 = vld [vmem:[%s4562_s3 + $0xa0] sm:$0xff]   ;;  %v3367_v51 = vld [vmem:[%s4562_s3 + $0x168] sm:$0xff]  }
  0x33   : > { %2989 = vmatpush3.bf16.msra.mxu0 %v3332_v43  ;;  %v297_v32 = vmul.f32 0.1, %v283_v56  ;;  %2943 = vmatpush3.bf16.msra.mxu1 %v3329_v58  ;;  %vm386_vm2 = vcmp.ge.f32.partialorder %v334_v17, 1.0  ;;  %v505_v15 = vmax.f32 %v3827_v7, 0.0  ;;  %v316_v28 = vfloor.f32 %v303_v24  ;;  %v3369_v7 = vld [vmem:[%s4562_s3 + $0x170] sm:$0xff]  }
  0x34   : > { %vm387_vm8 = vcmp.ge.f32.partialorder %v335_v18, 1.0  ;;  %2990 = vmatprep.subr.bf16.mxu0 %v3416_v2  ;;  %2915 = vmatmul.mubr.bf16.gmra.mrb[4].mxu0 %v620_v27  ;;  %vm399_vm9 = vmand %vm3832_vm1, %vm386_vm2  ;;  %vm413_vm15 = vcmp.le.f32.partialorder %v335_v18, 8.0  ;;  %v473_v29 = vmul.f32 %v2706_v49, %v3502_v11  ;;  %v3863_v37 = vadd.f32 %v3521_v23, %v479_v26  ;;  %v3337_v27 = vld [vmem:[%s4562_s3 + $0x30] sm:$0xff]  }
  0x35   : > { %2944 = vmatprep.subr.bf16.mxu1 %v3416_v2  ;;  %v310_v57 = vfloor.f32 %v297_v32  ;;  %2918 = vmatprep.mubr.msk.bf16.mxu0 %vm4566_vm0, %v3416_v2  ;;  %vm400_vm10 = vmand %vm3839_vm4, %vm387_vm8  ;;  %vm4620_vm1 = vcmp.le.f32.partialorder %v334_v17, 8.0  ;;  %v329_v47 = vmul.f32 10.0, %v316_v28  ;;  %vm355_vm4 = vcmp.ge.f32.partialorder %v316_v28, 1.0  ;;  %v3339_v32 = vld [vmem:[%s4562_s3 + $0x38] sm:$0xff]  }
  0x36   : > { %v616_v39 = vld [vmem:[#allocation2 + $0x51] sm:$0xff]  ;;  %vm3866_vm2 = vmand %vm399_vm9, %vm4620_vm1  ;;  %vm368_vm8 = vcmp.le.f32.partialorder %v316_v28, 8.0  ;;  %v3884_v59 = vadd.f32 %v3521_v23, %v473_v29  ;;  %v277_v28 = vadd.s32 96, %v3475_v4  ;;  %v571_v4 = vld [vmem:[#allocation2 + $0x8] sm:$0xff]  ;;  %v3403_v54 = vpack.c.bf16 %v510_v14, %v509_v1 }
  0x37   : > { %2991 = vmatpush3.bf16.msra.mxu0 %v3334_v31  ;;  %v323_v48 = vmul.f32 10.0, %v310_v57  ;;  %2945 = vmatpush3.bf16.msra.mxu1 %v3331_v9  ;;  %v617_v49 = vld [vmem:[#allocation2 + $0x59] sm:$0xff]  ;;  %vm3874_vm0 = vmand %vm400_vm10, %vm413_vm15  ;;  %v543_v58 = vsel %vm3866_vm2, %v504_v10, 0.0  ;;  %vm362_vm1 = vcmp.le.f32.partialorder %v310_v57, 8.0  ;;  %v342_v6 = vsub.f32 %v289_v52, %v329_v47 }
  0x38   : > { %2992 = vmatprep.subr.bf16.mxu0 %v3416_v2  ;;  %v624_v60 = vpack.c.bf16 %v617_v49, %v616_v39  ;;  %v544_v3 = vsel %vm3874_vm0, %v505_v15, 0.0  ;;  %560 = vst [vmem:[#allocation2 + $0x23] sm:$0xff] %v543_v58  ;;  %2946 = vmatprep.subr.bf16.mxu1 %v3416_v2  ;;  %vm381_vm10 = vmand %vm355_vm4, %vm368_vm8  ;;  %v512_v9 = vmax.f32 %v3863_v37, 0.0  ;;  %vm4625_vm7 = vcmp.ge.f32.partialorder %v310_v57, 1.0 }
  0x39   : > { %v336_v8 = vsub.f32 %v283_v56, %v323_v48  ;;  %561 = vst [vmem:[#allocation2 + $0x2b] sm:$0xff] %v544_v3  ;;  %vm394_vm15 = vcmp.ge.f32.partialorder %v342_v6, 1.0  ;;  %vm420_vm9 = vcmp.le.f32.partialorder %v342_v6, 8.0  ;;  %vm375_vm6 = vmand %vm4625_vm7, %vm362_vm1  ;;  %vm4626_vm4 = vmmov 0   ;;  %v915_v48 = vld [vmem:[#allocation2 + $0x2] sm:$0xff] }
  0x3a   : > { %2931 = vmatmul.mubr.bf16.gmra.mrb[4].mxu1 %v624_v60  ;;  %vm407_vm8 = vmand %vm381_vm10, %vm394_vm15  ;;  %v506_v52 = vmax.f32 %v3884_v59, 0.0  ;;  %v583_v58 = vpack.c.bf16 %v571_v4, %v3416_v2  ;;  %v3949_v60 = vld [vmem:[#allocation2 + $0xa] sm:$0xff]  ;;  %v3341_v3 = vld [vmem:[%s4562_s3 + $0xc0] sm:$0xff]   ;;  %v3406_v55 = vpack.c.bf16 %v512_v9, %v511_v16 }
  0x3b   : > { %2993 = vmatpush3.bf16.msra.mxu0 %v3336_v45  ;;  %vm388_vm13 = vcmp.ge.f32.partialorder %v336_v8, 1.0  ;;  %2947 = vmatpush3.bf16.msra.mxu1 %v3333_v35  ;;  %vm414_vm12 = vcmp.le.f32.partialorder %v336_v8, 8.0  ;;  %vm3910_vm7 = vmand %vm407_vm8, %vm420_vm9  ;;  %v290_v45 = vcvt.s32.f32 %v277_v28  ;;  %v3342_v6 = vld [vmem:[%s4562_s3 + $0x100] sm:$0xff]   ;;  %v928_v8 = vpack.c.bf16 %v3949_v60, %v915_v48  ;;  %v447_v4 = vld [vmem:[%s3497_s8 + $0x30] sm:$0x3] }
  0x3c   : > { %2934 = vmatprep.mubr.msk.bf16.mxu1 %vm4626_vm4, %v3416_v2  ;;  %2948 = vmatprep.subr.bf16.mxu1 %v3416_v2  ;;  %v551_v17 = vsel %vm3910_vm7, %v512_v9, 0.0  ;;  %vm401_vm1 = vmand %vm375_vm6, %vm388_vm13  ;;  %v3371_v59 = vld [vmem:[%s4562_s3 + $0x178] sm:$0xff]   ;;  %v3373_v16 = vld [vmem:[%s4562_s3 + $0x1c0] sm:$0xff]  }
  0x3d   : > { %2994 = vmatprep.subr.bf16.mxu0 %v3416_v2  ;;  %568 = vst [vmem:[#allocation2 + $0x63] sm:$0xff] %v551_v17  ;;  %vm3919_vm11 = vmand %vm401_vm1, %vm414_vm12  ;;  %v304_v49 = vmul.f32 0.1, %v290_v45  ;;  %v572_v17 = vld [vmem:[#allocation2 + $0x10] sm:$0xff] }
  0x3e   : > { %v545_v26 = vsel %vm3919_vm11, %v506_v52, 0.0  ;;  %vm3390_vm1 = vmpackc.low %vm3736_vm3, %vm3549_vm14 }
  0x3f   : > { %2995 = vmatpush3.bf16.msra.mxu0 %v3338_v38  ;;  %v610_v24 = vld [vmem:[#allocation2 + $0x21] sm:$0xff]  ;;  %2949 = vmatpush3.bf16.msra.mxu1 %v3335_v42  ;;  %562 = vst [vmem:[#allocation2 + $0x33] sm:$0xff] %v545_v26  ;;  %v317_v42 = vfloor.f32 %v304_v49  ;;  %v3967_v26 = vld [vmem:[#allocation2 + $0x12] sm:$0xff] }
  0x40   : > { %2996 = vmatprep.subr.bf16.mxu0 %v3416_v2  ;;  %v611_v30 = vld [vmem:[#allocation2 + $0x29] sm:$0xff]  ;;  %2950 = vmatprep.subr.bf16.mxu1 %v3416_v2  ;;  %v1660_v37 = vld [vmem:[#allocation2 + $0x1c] sm:$0xff] }
  0x41   : > { %v621_v31 = vpack.c.bf16 %v611_v30, %v610_v24  ;;  %v3343_v38 = vld [vmem:[%s4562_s3 + $0xc8] sm:$0xff]   ;;  %vm356_vm12 = vcmp.ge.f32.partialorder %v317_v42, 1.0  ;;  %vm369_vm13 = vcmp.le.f32.partialorder %v317_v42, 8.0 }
  0x42   : > { %v3344_v24 = vld [vmem:[%s4562_s3 + $0x108] sm:$0xff]   ;;  %vm382_vm6 = vmand %vm356_vm12, %vm369_vm13 }
  0x43   : > { %2997 = vmatpush3.bf16.msra.mxu0 %v3340_v21  ;;  %2951 = vmatpush3.bf16.msra.mxu1 %v3337_v27  ;;  %v573_v21 = vld [vmem:[#allocation2 + $0x18] sm:$0xff]  ;;  %v330_v27 = vmul.f32 10.0, %v317_v42  ;;  %v3998_v49 = vld [vmem:[#allocation2 + $0x22] sm:$0xff]  ;;  %vm3393_vm12 = vmpackc.low %vm3866_vm2, %vm3746_vm5 }
  0x44   : > { %2919 = vmatmul.mubr.bf16.gmra.mrb[8].mxu0 %v621_v31  ;;  %2952 = vmatprep.subr.bf16.mxu1 %v3416_v2  ;;  %v618_v57 = vld [vmem:[#allocation2 + $0x61] sm:$0xf]  ;;  %v584_v30 = vpack.c.bf16 %v573_v21, %v572_v17  ;;  %v3351_v17 = vld [vmem:[%s4562_s3 + $0xe8] sm:$0xff]   ;;  %vm3396_vm13 = vmpackc.low %vm3919_vm11, %vm3874_vm0 }
  0x45   : > { %2922 = vmatprep.mubr.msk.bf16.mxu0 %vm4626_vm4, %v3416_v2  ;;  %3070 = vmatprep.subr.bf16.mxu0 %v3416_v2  ;;  %v625_v29 = vpack.c.bf16 %v618_v57, %v618_v57  ;;  %v3971_v31 = vld [vmem:[#allocation2 + $0x1a] sm:$0xff]  ;;  %v3346_v57 = vld [vmem:[%s4562_s3 + $0x110] sm:$0xff]   ;;  %v1112_v53 = vld [vmem:[#allocation2 + $0x62] sm:$0xff] }
  0x46   : > { %v612_v35 = vld [vmem:[#allocation2 + $0x31] sm:$0xff]  ;;  %v613_v39 = vld [vmem:[#allocation2 + $0x39] sm:$0xff]  ;;  %v929_v28 = vpack.c.bf16 %v3971_v31, %v3967_v26 }
  0x47   : > { %2953 = vmatpush3.bf16.msra.mxu1 %v3339_v32  ;;  %v622_v47 = vpack.c.bf16 %v613_v39, %v612_v35  ;;  %v3345_v32 = vld [vmem:[%s4562_s3 + $0xd0] sm:$0xff]   ;;  %v574_v35 = vld [vmem:[#allocation2 + $0x20] sm:$0xff]  ;;  %v3347_v39 = vld [vmem:[%s4562_s3 + $0xd8] sm:$0xff]  }
  0x48   : > { %2935 = vmatmul.mubr.bf16.gmra.mrb[8].mxu1 %v625_v29  ;;  %3026 = vmatprep.subr.bf16.mxu1 %v3416_v2  ;;  %v343_v29 = vsub.f32 %v290_v45, %v330_v27  ;;  %v3348_v45 = vld [vmem:[%s4562_s3 + $0x118] sm:$0xff]   ;;  %v576_v21 = vld [vmem:[#allocation2 + $0x30] sm:$0xff] }
  0x49   : > { %2954 = vmatprep.mubr.msk.bf16.mxu1 %vm4626_vm4, %v3416_v2  ;;  %v577_v27 = vld [vmem:[#allocation2 + $0x38] sm:$0xff] }
  0x4a   : > { %vm395_vm9 = vcmp.ge.f32.partialorder %v343_v29, 1.0  ;;  %vm421_vm15 = vcmp.le.f32.partialorder %v343_v29, 8.0 }
  0x4b   : > { %vm408_vm10 = vmand %vm382_vm6, %vm395_vm9  ;;  %vm4633_vm6 = vnez %v4595_v13  ;;  %vm4634_vm9 = vnez %v4597_v19 }
  0x4c   : > { %2923 = vmatmul.mubr.bf16.gmra.mrb[12].mxu0 %v622_v47  ;;  %v3986_v47 = vld [vmem:[#allocation2] sm:$0xff]  ;;  %vm4019_vm8 = vmand %vm408_vm10, %vm421_vm15  ;;  %vm4635_vm15 = vnez %v4599_v25 }
  0x4d   : > { %2998 = vmatprep.mubr.msk.bf16.mxu0 %vm4626_vm4, %v3416_v2  ;;  %vm3399_vm10 = vmpackc.low %vm4634_vm9, %vm4633_vm6 }
  0x50   : > { %2955 = vmatmul.mubr.bf16.vlgmr.msra.gmra.mrb[12].mxu1 %v583_v58  ;;  %v4000_v58 = vld [vmem:[#allocation2 + $0x2a] sm:$0xff] }
  0x51   : > { %3027 = vmatpush3.bf16.msra.mxu1 %v3341_v3  ;;  %2958 = vmatprep.mubr.msk.bf16.mxu1 %vm4626_vm4, %v3416_v2  ;;  %v460_v3 = vunpack.c.l.bf16 %v447_v4  ;;  %v930_v42 = vpack.c.bf16 %v4000_v58, %v3998_v49  ;;  %v3354_v4 = vld [vmem:[%s4562_s3 + $0x130] sm:$0xff]  }
  0x52   : > { %3028 = vmatprep.subr.bf16.mxu1 %v3416_v2 }
  0x54   : > { %2999 = vmatmul.mubr.bf16.vlgmr.msra.gmra.mrb[16].mxu0 %v928_v8  ;;  %v3350_v8 = vld [vmem:[%s4562_s3 + $0x120] sm:$0xff]  }
  0x55   : > { %3071 = vmatpush3.bf16.msra.mxu0 %v3342_v6  ;;  %3002 = vmatprep.mubr.msk.bf16.mxu0 %vm4626_vm4, %v3416_v2  ;;  %v3349_v6 = vld [vmem:[%s4562_s3 + $0xe0] sm:$0xff]  }
  0x56   : > { %3029 = vmatpush3.bf16.msra.mxu1 %v3343_v38  ;;  %3072 = vmatprep.subr.bf16.mxu0 %v3416_v2  ;;  %v480_v38 = vmul.f32 %v3502_v11, %v460_v3  ;;  %v4053_v3 = vld [vmem:[#allocation2 + $0x42] sm:$0xff] }
  0x57   : > { %3030 = vmatprep.subr.bf16.mxu1 %v3416_v2  ;;  %v575_v2 = vld [vmem:[#allocation2 + $0x28] sm:$0xff] }
  0x58   : > { %2959 = vmatmul.mubr.bf16.gmra.mrb[16].mxu1 %v584_v30  ;;  %v585_v48 = vpack.c.bf16 %v575_v2, %v574_v35  ;;  %v3353_v35 = vld [vmem:[%s4562_s3 + $0xf0] sm:$0xff]   ;;  %v578_v2 = vld [vmem:[#allocation2 + $0x40] sm:$0xff] }
  0x59   : > { %3073 = vmatpush3.bf16.msra.mxu0 %v3344_v24  ;;  %2962 = vmatprep.mubr.msk.bf16.mxu1 %vm4626_vm4, %v3986_v47  ;;  %v500_v24 = vadd.f32 %v3521_v23, %v480_v38  ;;  %v586_v23 = vpack.c.bf16 %v577_v27, %v576_v21  ;;  %v3356_v38 = vld [vmem:[%s4562_s3 + $0x138] sm:$0xff]  }
  0x5a   : > { %3031 = vmatpush3.bf16.msra.mxu1 %v3345_v32  ;;  %3074 = vmatprep.subr.bf16.mxu0 %v3986_v47  ;;  %v3352_v32 = vld [vmem:[%s4562_s3 + $0x128] sm:$0xff]   ;;  %v581_v21 = vld [vmem:[#allocation2 + $0x58] sm:$0xff] }
  0x5b   : > { %3032 = vmatprep.subr.bf16.mxu1 %v3986_v47  ;;  %v513_v11 = vmax.f32 %v500_v24, 0.0  ;;  %v4071_v27 = vld [vmem:[#allocation2 + $0x52] sm:$0xff] }
  0x5c   : > { %3003 = vmatmul.mubr.bf16.gmra.mrb[20].mxu0 %v929_v28  ;;  %v4030_v28 = vld [vmem:[#allocation2 + $0x32] sm:$0xff] }
  0x5d   : > { %3006 = vmatprep.mubr.msk.bf16.mxu0 %vm4626_vm4, %v3986_v47  ;;  %3075 = vmatpush3.bf16.msra.mxu0 %v3346_v57  ;;  %v4032_v57 = vld [vmem:[#allocation2 + $0x3a] sm:$0xff]  ;;  %v552_v29 = vsel %vm4019_vm8, %v513_v11, 0.0 }
  0x5e   : > { %3033 = vmatpush3.bf16.msra.mxu1 %v3347_v39  ;;  %3076 = vmatprep.subr.bf16.mxu0 %v3986_v47  ;;  %569 = vst [vmem:[#allocation2 + $0x6b] sm:$0xf] %v552_v29  ;;  %v931_v39 = vpack.c.bf16 %v4032_v57, %v4030_v28  ;;  %v4073_v11 = vld [vmem:[#allocation2 + $0x5a] sm:$0xff] }
  0x5f   : > { %3034 = vmatprep.subr.bf16.mxu1 %v3986_v47 }
  0x60   : > { %2963 = vmatmul.mubr.bf16.gmra.mrb[20].mxu1 %v585_v48  ;;  %v3355_v48 = vld [vmem:[%s4562_s3 + $0xf8] sm:$0xff]  }
  0x61   : > { %3077 = vmatpush3.bf16.msra.mxu0 %v3348_v45  ;;  %2966 = vmatprep.mubr.msk.bf16.mxu1 %vm4626_vm4, %v3986_v47  ;;  %v579_v45 = vld [vmem:[#allocation2 + $0x48] sm:$0xff] }
  0x62   : > { %3035 = vmatpush3.bf16.msra.mxu1 %v3349_v6  ;;  %3078 = vmatprep.subr.bf16.mxu0 %v3986_v47  ;;  %v587_v6 = vpack.c.bf16 %v579_v45, %v578_v2  ;;  %v1114_v2 = vpack.c.bf16 %v3967_v26, %v3949_v60  ;;  %v3357_v45 = vld [vmem:[%s4562_s3 + $0x140] sm:$0xff]   ;;  %v3391_v60 = vpack.c.bf16 %v502_v34, %v501_v41  ;;  %v3362_v41 = vld [vmem:[%s4562_s3 + $0x190] sm:$0xff]  }
  0x63   : > { %3036 = vmatprep.subr.bf16.mxu1 %v3986_v47  ;;  %v1115_v26 = vpack.c.bf16 %v3998_v49, %v3971_v31  ;;  %v3394_v34 = vpack.c.bf16 %v504_v10, %v503_v40  ;;  %v1116_v31 = vpack.c.bf16 %v4030_v28, %v4000_v58  ;;  %v3364_v49 = vld [vmem:[%s4562_s3 + $0x198] sm:$0xff]   ;;  %v3366_v40 = vld [vmem:[%s4562_s3 + $0x1a0] sm:$0xff]   ;;  %v3397_v10 = vpack.c.bf16 %v506_v52, %v505_v15  ;;  %v3368_v28 = vld [vmem:[%s4562_s3 + $0x1a8] sm:$0xff]  }
  0x64   : > { %3007 = vmatmul.mubr.bf16.gmra.mrb[24].mxu0 %v930_v42  ;;  %v1117_v58 = vpack.c.bf16 %v4053_v3, %v4032_v57  ;;  %v3370_v15 = vld [vmem:[%s4562_s3 + $0x1b0] sm:$0xff]   ;;  %v3400_v52 = vpack.c.bf16 %v508_v0, %v507_v63  ;;  %v1119_v63 = vpack.c.bf16 %v1112_v53, %v4073_v11 }
  0x65   : > { %3010 = vmatprep.mubr.msk.bf16.mxu0 %vm4626_vm4, %v3986_v47  ;;  %3079 = vmatpush3.bf16.msra.mxu0 %v3350_v8  ;;  %v4057_v8 = vld [vmem:[#allocation2 + $0x4a] sm:$0xff] }
  0x66   : > { %3037 = vmatpush3.bf16.msra.mxu1 %v3351_v17  ;;  %3080 = vmatprep.subr.bf16.mxu0 %v3986_v47  ;;  %v932_v42 = vpack.c.bf16 %v4057_v8, %v4053_v3  ;;  %v580_v17 = vld [vmem:[#allocation2 + $0x50] sm:$0xff]  ;;  %v1118_v57 = vpack.c.bf16 %v4071_v27, %v4057_v8  ;;  %v3372_v3 = vld [vmem:[%s4562_s3 + $0x1b8] sm:$0xff]   ;;  %v1113_v0 = vld [vmem:[#allocation2 + $0x6a] sm:$0xf] }
  0x67   : > { %3038 = vmatprep.subr.bf16.mxu1 %v3986_v47  ;;  %v588_v24 = vpack.c.bf16 %v581_v21, %v580_v17  ;;  %v1120_v1 = vpack.c.bf16 %v1113_v0, %v1113_v0  ;;  %v1299_v61 = vld [vmem:[#allocation2 + $0x6b] sm:$0xf]  ;;  %v1845_v0 = vld [vmem:[#allocation2 + $0x15] sm:$0xff] }
  0x68   : > { %2967 = vmatmul.mubr.bf16.gmra.mrb[24].mxu1 %v586_v23  ;;  %v582_v23 = vld [vmem:[#allocation2 + $0x60] sm:$0xf]  ;;  %v1306_v14 = vpack.c.bf16 %v1299_v61, %v1299_v61  ;;  %v1473_v8 = vld [vmem:[#allocation2 + $0xc] sm:$0xff]  ;;  %v1476_v17 = vld [vmem:[#allocation2 + $0x24] sm:$0xff] }
  0x69   : > { %3081 = vmatpush3.bf16.msra.mxu0 %v3352_v32  ;;  %2970 = vmatprep.mubr.msk.bf16.mxu1 %vm4626_vm4, %v3986_v47  ;;  %v933_v32 = vpack.c.bf16 %v4073_v11, %v4071_v27  ;;  %v589_v29 = vpack.c.bf16 %v582_v23, %v582_v23  ;;  %v3375_v21 = vld [vmem:[%s4562_s3 + $0x1c8] sm:$0xff]   ;;  %v2031_v61 = vld [vmem:[#allocation2 + $0x16] sm:$0xff] }
  0x6a   : > { %3039 = vmatpush3.bf16.msra.mxu1 %v3353_v35  ;;  %3082 = vmatprep.subr.bf16.mxu0 %v3986_v47  ;;  %v927_v35 = vld [vmem:[#allocation2 + $0x62] sm:$0xf]  ;;  %v1662_v27 = vld [vmem:[#allocation2 + $0x2c] sm:$0xff] }
  0x6b   : > { %3040 = vmatprep.subr.bf16.mxu1 %v3986_v47  ;;  %v3376_v11 = vld [vmem:[%s4562_s3 + $0x208] sm:$0xff]   ;;  %v1673_v23 = vpack.c.bf16 %v1662_v27, %v1476_v17 }
  0x6c   : > { %3011 = vmatmul.mubr.bf16.gmra.mrb[28].mxu0 %v931_v39  ;;  %v934_v39 = vpack.c.bf16 %v927_v35, %v927_v35  ;;  %v1478_v35 = vld [vmem:[#allocation2 + $0x34] sm:$0xff] }
  0x6d   : > { %3014 = vmatprep.mubr.msk.bf16.mxu0 %vm4626_vm4, %v3986_v47  ;;  %3083 = vmatpush3.bf16.msra.mxu0 %v3354_v4  ;;  %v3358_v4 = vld [vmem:[%s4562_s3 + $0x180] sm:$0xff]  }
  0x6e   : > { %3041 = vmatpush3.bf16.msra.mxu1 %v3355_v48  ;;  %3084 = vmatprep.subr.bf16.mxu0 %v3986_v47  ;;  %v3359_v48 = vld [vmem:[%s4562_s3 + $0x148] sm:$0xff]  }
  0x6f   : > { %3114 = vmatprep.subr.bf16.mxu1 %v3986_v47 }
  0x70   : > { %2971 = vmatmul.mubr.bf16.gmra.mrb[28].mxu1 %v587_v6  ;;  %v3360_v6 = vld [vmem:[%s4562_s3 + $0x188] sm:$0xff]  }
  0x71   : > { %3085 = vmatpush3.bf16.msra.mxu0 %v3356_v38  ;;  %2974 = vmatprep.mubr.msk.bf16.mxu1 %vm4626_vm4, %v3986_v47  ;;  %v1474_v38 = vld [vmem:[#allocation2 + $0x14] sm:$0xff] }
  0x72   : > { %3158 = vmatprep.subr.bf16.mxu0 %v3986_v47  ;;  %v1486_v62 = vpack.c.bf16 %v1474_v38, %v1473_v8  ;;  %v1672_v9 = vpack.c.bf16 %v1660_v37, %v1474_v38 }
  0x74   : > { %3015 = vmatmul.mubr.bf16.gmra.mrb[32].mxu0 %v932_v42  ;;  %v3374_v42 = vld [vmem:[%s4562_s3 + $0x200] sm:$0xff]  }
  0x75   : > { %3018 = vmatprep.mubr.msk.bf16.mxu0 %vm4626_vm4, %v3986_v47 }
  0x78   : > { %2975 = vmatmul.mubr.bf16.gmra.mrb[32].mxu1 %v588_v24  ;;  %v1487_v24 = vpack.c.bf16 %v1476_v17, %v1660_v37  ;;  %v1848_v37 = vld [vmem:[#allocation2 + $0x2d] sm:$0xff] }
  0x79   : > { %2978 = vmatprep.mubr.msk.bf16.mxu1 %vm4626_vm4, %v3986_v47 }
  0x7c   : > { %3019 = vmatmul.mubr.bf16.gmra.mrb[36].mxu0 %v933_v32  ;;  %v3377_v32 = vld [vmem:[%s4562_s3 + $0x1d0] sm:$0xff]  }
  0x7d   : > { %3022 = vmatprep.mubr.msk.bf16.mxu0 %vm4626_vm4, %v3986_v47 }
  0x80   : > { %2979 = vmatmul.mubr.bf16.gmra.mrb[36].mxu1 %v589_v29  ;;  %v3378_v29 = vld [vmem:[%s4562_s3 + $0x210] sm:$0xff]  }
  0x81   : > { %3042 = vmatprep.mubr.msk.bf16.mxu1 %vm4626_vm4, %v3986_v47 }
  0x84   : > { %3023 = vmatmul.mubr.bf16.gmra.mrb[40].mxu0 %v934_v39  ;;  %v3379_v39 = vld [vmem:[%s4562_s3 + $0x1d8] sm:$0xff]  }
  0x85   : > { %3086 = vmatprep.mubr.msk.bf16.mxu0 %vm4626_vm4, %v3986_v47 }
  0x88   : > { %3043 = vmatmul.mubr.bf16.vlgmr.msra.gmra.mrb[40].mxu1 %v1114_v2  ;;  %v1488_v2 = vpack.c.bf16 %v1478_v35, %v1662_v27 }
  0x89   : > { %3115 = vmatpush3.bf16.msra.mxu1 %v3357_v45  ;;  %3046 = vmatprep.mubr.msk.bf16.mxu1 %vm4626_vm4, %v3986_v47  ;;  %v1664_v45 = vld [vmem:[#allocation2 + $0x3c] sm:$0xff] }
  0x8a   : > { %3116 = vmatprep.subr.bf16.mxu1 %v3986_v47 }
  0x8c   : > { %3392 = vmatmul.mubr.msk.bf16.vlgmr.msra.gmra.mrb[44].mxu0 %vm3390_vm1, %v3391_v60  ;;  %vm4636_vm1 = vnez %v4613_v44  ;;  %v1674_v60 = vpack.c.bf16 %v1664_v45, %v1478_v35  ;;  %v1849_v35 = vld [vmem:[#allocation2 + $0x35] sm:$0xff] }
  0x8d   : > { %3159 = vmatpush3.bf16.msra.mxu0 %v3358_v4  ;;  %3090 = vmatprep.mubr.msk.bf16.mxu0 %vm4626_vm4, %v3986_v47  ;;  %v3380_v4 = vld [vmem:[%s4562_s3 + $0x218] sm:$0xff]  }
  0x8e   : > { %3117 = vmatpush3.bf16.msra.mxu1 %v3359_v48  ;;  %3160 = vmatprep.subr.bf16.mxu0 %v3986_v47  ;;  %v3381_v48 = vld [vmem:[%s4562_s3 + $0x1e0] sm:$0xff]  }
  0x8f   : > { %3118 = vmatprep.subr.bf16.mxu1 %v3986_v47 }
  0x90   : > { %3047 = vmatmul.mubr.bf16.gmra.mrb[44].mxu1 %v1115_v26  ;;  %v3382_v26 = vld [vmem:[%s4562_s3 + $0x220] sm:$0xff]  }
  0x91   : > { %3161 = vmatpush3.bf16.msra.mxu0 %v3360_v6  ;;  %3050 = vmatprep.mubr.msk.bf16.mxu1 %vm4626_vm4, %v3986_v47  ;;  %v1480_v6 = vld [vmem:[#allocation2 + $0x44] sm:$0xff] }
  0x92   : > { %3119 = vmatpush3.bf16.msra.mxu1 %v3361_v36  ;;  %3162 = vmatprep.subr.bf16.mxu0 %v3986_v47  ;;  %v3383_v36 = vld [vmem:[%s4562_s3 + $0x1e8] sm:$0xff]  }
  0x93   : > { %3120 = vmatprep.subr.bf16.mxu1 %v3986_v47 }
  0x94   : > { %3395 = vmatmul.mubr.msk.bf16.gmra.mrb[48].mxu0 %vm3393_vm12, %v3394_v34  ;;  %vm3402_vm12 = vmpackc.low %vm4636_vm1, %vm4635_vm15  ;;  %v3384_v34 = vld [vmem:[%s4562_s3 + $0x228] sm:$0xff]  }
  0x95   : > { %3094 = vmatprep.mubr.msk.bf16.mxu0 %vm4626_vm4, %v3986_v47  ;;  %3163 = vmatpush3.bf16.msra.mxu0 %v3362_v41  ;;  %v1489_v41 = vpack.c.bf16 %v1480_v6, %v1664_v45  ;;  %v2035_v45 = vld [vmem:[#allocation2 + $0x36] sm:$0xff] }
  0x96   : > { %3121 = vmatpush3.bf16.msra.mxu1 %v3363_v22  ;;  %3164 = vmatprep.subr.bf16.mxu0 %v3986_v47  ;;  %v1666_v22 = vld [vmem:[#allocation2 + $0x4c] sm:$0xff] }
  0x97   : > { %3122 = vmatprep.subr.bf16.mxu1 %v3986_v47 }
  0x98   : > { %3051 = vmatmul.mubr.bf16.gmra.mrb[48].mxu1 %v1116_v31  ;;  %v3385_v31 = vld [vmem:[%s4562_s3 + $0x1f0] sm:$0xff]  }
  0x99   : > { %3165 = vmatpush3.bf16.msra.mxu0 %v3364_v49  ;;  %3054 = vmatprep.mubr.msk.bf16.mxu1 %vm4626_vm4, %v3986_v47  ;;  %v1675_v49 = vpack.c.bf16 %v1666_v22, %v1480_v6 }
  0x9a   : > { %3123 = vmatpush3.bf16.msra.mxu1 %v3365_v33  ;;  %3166 = vmatprep.subr.bf16.mxu0 %v3986_v47  ;;  %v3386_v33 = vld [vmem:[%s4562_s3 + $0x230] sm:$0xff]  }
  0x9b   : > { %3124 = vmatprep.subr.bf16.mxu1 %v3986_v47 }
  0x9c   : > { %3398 = vmatmul.mubr.msk.bf16.gmra.mrb[52].mxu0 %vm3396_vm13, %v3397_v10  ;;  %vm4637_vm13 = vnez %v4615_v5 }
  0x9d   : > { %3098 = vmatprep.mubr.msk.bf16.mxu0 %vm4626_vm4, %v3986_v47  ;;  %3167 = vmatpush3.bf16.msra.mxu0 %v3366_v40  ;;  %v1482_v40 = vld [vmem:[#allocation2 + $0x54] sm:$0xff] }
  0x9e   : > { %3125 = vmatpush3.bf16.msra.mxu1 %v3367_v51  ;;  %3168 = vmatprep.subr.bf16.mxu0 %v3986_v47  ;;  %v3387_v51 = vld [vmem:[%s4562_s3 + $0x1f8] sm:$0xff]   ;;  %v1490_v10 = vpack.c.bf16 %v1482_v40, %v1666_v22 }
  0x9f   : > { %3126 = vmatprep.subr.bf16.mxu1 %v3986_v47 }
  0xa0   : > { %3055 = vmatmul.mubr.bf16.gmra.mrb[52].mxu1 %v1117_v58  ;;  %v1668_v58 = vld [vmem:[#allocation2 + $0x5c] sm:$0xff] }
  0xa1   : > { %3169 = vmatpush3.bf16.msra.mxu0 %v3368_v28  ;;  %3058 = vmatprep.mubr.msk.bf16.mxu1 %vm4626_vm4, %v3986_v47  ;;  %v3388_v28 = vld [vmem:[%s4562_s3 + $0x238] sm:$0xff]  }
  0xa2   : > { %3127 = vmatpush3.bf16.msra.mxu1 %v3369_v7  ;;  %3170 = vmatprep.subr.bf16.mxu0 %v3986_v47  ;;  %v1676_v7 = vpack.c.bf16 %v1668_v58, %v1482_v40 }
  0xa3   : > { %3128 = vmatprep.subr.bf16.mxu1 %v3986_v47 }
  0xa4   : > { %3401 = vmatmul.mubr.msk.bf16.gmra.mrb[56].mxu0 %vm3399_vm10, %v3400_v52  ;;  %vm3405_vm10 = vmpackc.low %vm3910_vm7, %vm4637_vm13  ;;  %v1670_v52 = vld [vmem:[#allocation2 + $0x6c] sm:$0xff] }
  0xa5   : > { %3102 = vmatprep.mubr.msk.bf16.mxu0 %vm4626_vm4, %v3986_v47  ;;  %3171 = vmatpush3.bf16.msra.mxu0 %v3370_v15  ;;  %v1484_v15 = vld [vmem:[#allocation2 + $0x64] sm:$0xff] }
  0xa6   : > { %3129 = vmatpush3.bf16.msra.mxu1 %v3371_v59  ;;  %3172 = vmatprep.subr.bf16.mxu0 %v3986_v47  ;;  %v1491_v59 = vpack.c.bf16 %v1484_v15, %v1668_v58 }
  0xa7   : > { %3202 = vmatprep.subr.bf16.mxu1 %v3986_v47 }
  0xa8   : > { %3059 = vmatmul.mubr.bf16.gmra.mrb[56].mxu1 %v1118_v57  ;;  %v1677_v57 = vpack.c.bf16 %v1670_v52, %v1484_v15  ;;  %v2040_v52 = vld [vmem:[#allocation2 + $0x5e] sm:$0xff] }
  0xa9   : > { %3173 = vmatpush3.bf16.msra.mxu0 %v3372_v3  ;;  %3062 = vmatprep.mubr.msk.bf16.mxu1 %vm4626_vm4, %v3986_v47  ;;  %v1485_v3 = vld [vmem:[#allocation2 + $0x6c] sm:$0xf] }
  0xaa   : > { %3246 = vmatprep.subr.bf16.mxu0 %v3986_v47  ;;  %v1492_v53 = vpack.c.bf16 %v1485_v3, %v1485_v3 }
  0xac   : > { %3404 = vmatmul.mubr.msk.bf16.gmra.mrb[60].mxu0 %vm3402_vm12, %v3403_v54  ;;  %v1671_v54 = vld [vmem:[#allocation2 + $0x74] sm:$0xf] }
  0xad   : > { %3106 = vmatprep.mubr.msk.bf16.mxu0 %vm4626_vm4, %v3986_v47 }
  0xb0   : > { %3063 = vmatmul.mubr.bf16.gmra.mrb[60].mxu1 %v1119_v63  ;;  %v1678_v63 = vpack.c.bf16 %v1671_v54, %v1671_v54 }
  0xb1   : > { %3066 = vmatprep.mubr.msk.bf16.mxu1 %vm4626_vm4, %v3986_v47 }
  0xb4   : > { %3407 = vmatmul.mubr.msk.bf16.gmra.mrb[64].mxu0 %vm3405_vm10, %v3406_v55  ;;  %v1846_v55 = vld [vmem:[#allocation2 + $0x1d] sm:$0xff] }
  0xb5   : > { %3110 = vmatprep.mubr.msk.bf16.mxu0 %vm4626_vm4, %v3986_v47 }
  0xb8   : > { %3067 = vmatmul.mubr.bf16.gmra.mrb[64].mxu1 %v1120_v1  ;;  %v1858_v1 = vpack.c.bf16 %v1846_v55, %v1845_v0  ;;  %v1855_v0 = vld [vmem:[#allocation2 + $0x65] sm:$0xff]  ;;  %v1856_v55 = vld [vmem:[#allocation2 + $0x6d] sm:$0xff] }
  0xb9   : > { %3130 = vmatprep.mubr.msk.bf16.mxu1 %vm4626_vm4, %v3986_v47 }
  0xbc   : > { %3111 = vmatmul.mubr.bf16.gmra.mrb[68].mxu0 %v1306_v14  ;;  %v2032_v14 = vld [vmem:[#allocation2 + $0x1e] sm:$0xff] }
  0xbd   : > { %3174 = vmatprep.mubr.msk.bf16.mxu0 %vm4626_vm4, %v3986_v47  ;;  %v2044_v8 = vpack.c.bf16 %v2032_v14, %v2031_v61  ;;  %v1863_v14 = vpack.c.bf16 %v1856_v55, %v1855_v0 }
  0xc0   : > { %3131 = vmatmul.mubr.bf16.vlgmr.msra.gmra.mrb[68].mxu1 %v1486_v62  ;;  %v1847_v62 = vld [vmem:[#allocation2 + $0x25] sm:$0xff] }
  0xc1   : > { %3203 = vmatpush3.bf16.msra.mxu1 %v3373_v16  ;;  %3134 = vmatprep.mubr.msk.bf16.mxu1 %vm4626_vm4, %v3986_v47  ;;  %v1859_v17 = vpack.c.bf16 %v1848_v37, %v1847_v62  ;;  %v2042_v62 = vld [vmem:[#allocation2 + $0x6e] sm:$0xff] }
  0xc2   : > { %3204 = vmatprep.subr.bf16.mxu1 %v3986_v47 }
  0xc4   : > { %3175 = vmatmul.mubr.bf16.vlgmr.msra.gmra.mrb[72].mxu0 %v1672_v9 }
  0xc5   : > { %3247 = vmatpush3.bf16.msra.mxu0 %v3374_v42  ;;  %3178 = vmatprep.mubr.msk.bf16.mxu0 %vm4626_vm4, %v3986_v47 }
  0xc6   : > { %3205 = vmatpush3.bf16.msra.mxu1 %v3375_v21  ;;  %3248 = vmatprep.subr.bf16.mxu0 %v3986_v47  ;;  %v2033_v21 = vld [vmem:[#allocation2 + $0x26] sm:$0xff] }
  0xc7   : > { %3206 = vmatprep.subr.bf16.mxu1 %v3986_v47 }
  0xc8   : > { %3135 = vmatmul.mubr.bf16.gmra.mrb[72].mxu1 %v1487_v24  ;;  %v2034_v24 = vld [vmem:[#allocation2 + $0x2e] sm:$0xff] }
  0xc9   : > { %3249 = vmatpush3.bf16.msra.mxu0 %v3376_v11  ;;  %3138 = vmatprep.mubr.msk.bf16.mxu1 %vm4626_vm4, %v3986_v47 }
  0xca   : > { %3207 = vmatpush3.bf16.msra.mxu1 %v3377_v32  ;;  %3250 = vmatprep.subr.bf16.mxu0 %v3986_v47  ;;  %v2045_v32 = vpack.c.bf16 %v2034_v24, %v2033_v21 }
  0xcb   : > { %3208 = vmatprep.subr.bf16.mxu1 %v3986_v47 }
  0xcc   : > { %3179 = vmatmul.mubr.bf16.gmra.mrb[76].mxu0 %v1673_v23 }
  0xcd   : > { %3182 = vmatprep.mubr.msk.bf16.mxu0 %vm4626_vm4, %v3986_v47  ;;  %3251 = vmatpush3.bf16.msra.mxu0 %v3378_v29 }
  0xce   : > { %3209 = vmatpush3.bf16.msra.mxu1 %v3379_v39  ;;  %3252 = vmatprep.subr.bf16.mxu0 %v3986_v47  ;;  %v1850_v39 = vld [vmem:[#allocation2 + $0x3d] sm:$0xff] }
  0xcf   : > { %3210 = vmatprep.subr.bf16.mxu1 %v3986_v47 }
  0xd0   : > { %3139 = vmatmul.mubr.bf16.gmra.mrb[76].mxu1 %v1488_v2  ;;  %v1860_v2 = vpack.c.bf16 %v1850_v39, %v1849_v35 }
  0xd1   : > { %3253 = vmatpush3.bf16.msra.mxu0 %v3380_v4  ;;  %3142 = vmatprep.mubr.msk.bf16.mxu1 %vm4626_vm4, %v3986_v47  ;;  %v2036_v4 = vld [vmem:[#allocation2 + $0x3e] sm:$0xff] }
  0xd2   : > { %3211 = vmatpush3.bf16.msra.mxu1 %v3381_v48  ;;  %3254 = vmatprep.subr.bf16.mxu0 %v3986_v47  ;;  %v2046_v48 = vpack.c.bf16 %v2036_v4, %v2035_v45  ;;  %v2043_v45 = vld [vmem:[#allocation2 + $0x76] sm:$0xf] }
  0xd3   : > { %3212 = vmatprep.subr.bf16.mxu1 %v3986_v47 }
  0xd4   : > { %3183 = vmatmul.mubr.bf16.gmra.mrb[80].mxu0 %v1674_v60 }
  0xd5   : > { %3186 = vmatprep.mubr.msk.bf16.mxu0 %vm4626_vm4, %v3986_v47  ;;  %3255 = vmatpush3.bf16.msra.mxu0 %v3382_v26 }
  0xd6   : > { %3213 = vmatpush3.bf16.msra.mxu1 %v3383_v36  ;;  %3256 = vmatprep.subr.bf16.mxu0 %v3986_v47  ;;  %v1851_v36 = vld [vmem:[#allocation2 + $0x45] sm:$0xff] }
  0xd7   : > { %3214 = vmatprep.subr.bf16.mxu1 %v3986_v47 }
  0xd8   : > { %3143 = vmatmul.mubr.bf16.gmra.mrb[80].mxu1 %v1489_v41  ;;  %v1852_v41 = vld [vmem:[#allocation2 + $0x4d] sm:$0xff] }
  0xd9   : > { %3257 = vmatpush3.bf16.msra.mxu0 %v3384_v34  ;;  %3146 = vmatprep.mubr.msk.bf16.mxu1 %vm4626_vm4, %v3986_v47  ;;  %v1861_v34 = vpack.c.bf16 %v1852_v41, %v1851_v36 }
  0xda   : > { %3215 = vmatpush3.bf16.msra.mxu1 %v3385_v31  ;;  %3258 = vmatprep.subr.bf16.mxu0 %v3986_v47  ;;  %v2037_v31 = vld [vmem:[#allocation2 + $0x46] sm:$0xff] }
  0xdb   : > { %3216 = vmatprep.subr.bf16.mxu1 %v3986_v47 }
  0xdc   : > { %3187 = vmatmul.mubr.bf16.gmra.mrb[84].mxu0 %v1675_v49  ;;  %v2038_v49 = vld [vmem:[#allocation2 + $0x4e] sm:$0xff] }
  0xdd   : > { %3190 = vmatprep.mubr.msk.bf16.mxu0 %vm4626_vm4, %v3986_v47  ;;  %3259 = vmatpush3.bf16.msra.mxu0 %v3386_v33 }
  0xde   : > { %3217 = vmatpush3.bf16.msra.mxu1 %v3387_v51  ;;  %3260 = vmatprep.subr.bf16.mxu0 %v3986_v47  ;;  %v2047_v51 = vpack.c.bf16 %v2038_v49, %v2037_v31 }
  0xe0   : > { %3147 = vmatmul.mubr.bf16.gmra.mrb[84].mxu1 %v1490_v10 }
  0xe1   : > { %3261 = vmatpush3.bf16.msra.mxu0 %v3388_v28  ;;  %3150 = vmatprep.mubr.msk.bf16.mxu1 %vm4626_vm4, %v3986_v47  ;;  %v1853_v28 = vld [vmem:[#allocation2 + $0x55] sm:$0xff] }
  0xe4   : > { %3191 = vmatmul.mubr.bf16.gmra.mrb[88].mxu0 %v1676_v7  ;;  %v1854_v7 = vld [vmem:[#allocation2 + $0x5d] sm:$0xff] }
  0xe5   : > { %3194 = vmatprep.mubr.msk.bf16.mxu0 %vm4626_vm4, %v3986_v47  ;;  %v1862_v15 = vpack.c.bf16 %v1854_v7, %v1853_v28 }
  0xe8   : > { %3151 = vmatmul.mubr.bf16.gmra.mrb[88].mxu1 %v1491_v59  ;;  %v2039_v59 = vld [vmem:[#allocation2 + $0x56] sm:$0xff] }
  0xe9   : > { %3154 = vmatprep.mubr.msk.bf16.mxu1 %vm4626_vm4, %v3986_v47 }
  0xec   : > { %3195 = vmatmul.mubr.bf16.gmra.mrb[92].mxu0 %v1677_v57 }
  0xed   : > { %3198 = vmatprep.mubr.msk.bf16.mxu0 %vm4626_vm4, %v3986_v47 }
  0xf0   : > { %3155 = vmatmul.mubr.bf16.gmra.mrb[92].mxu1 %v1492_v53  ;;  %v2048_v53 = vpack.c.bf16 %v2040_v52, %v2039_v59 }
  0xf1   : > { %3218 = vmatprep.mubr.msk.bf16.mxu1 %vm4626_vm4, %v3986_v47 }
  0xf4   : > { %3199 = vmatmul.mubr.bf16.gmra.mrb[96].mxu0 %v1678_v63 }
  0xf5   : > { %3262 = vmatprep.mubr.msk.bf16.mxu0 %vm4626_vm4, %v3986_v47 }
  0xf8   : > { %3219 = vmatmul.mubr.bf16.vlgmr.msra.gmra.mrb[96].mxu1 %v1858_v1 }
  0xf9   : > { %v4326_v38 = vpop.f32.mrb[0].mxu0  ;;  %3222 = vmatprep.mubr.msk.bf16.mxu1 %vm4626_vm4, %v3986_v47 }
  0xfa   : > { %v2912_v16 = vpop.f32.mrb[1].mxu0 }
  0xfb   : > { %v4330_v9 = vpop.f32.mrb[2].mxu0 }
  0xfc   : > { %3263 = vmatmul.mubr.bf16.vlgmr.msra.gmra.mrb[100].mxu0 %v2044_v8  ;;  %v2913_v42 = vpop.f32.mrb[3].mxu0  ;;  %v2041_v8 = vld [vmem:[#allocation2 + $0x66] sm:$0xff] }
  0xfd   : > { %3266 = vmatprep.mubr.msk.bf16.mxu0 %vm4626_vm4, %v3986_v47  ;;  %v4334_v27 = vpop.f32.mrb[0].mxu1  ;;  %v2049_v21 = vpack.c.bf16 %v2042_v62, %v2041_v8 }
  0xfe   : > { %v2928_v11 = vpop.f32.mrb[1].mxu1 }
  0xff   : > { %v4336_v23 = vpop.f32.mrb[2].mxu1 }
 0x100   : > { %3223 = vmatmul.mubr.bf16.gmra.mrb[100].mxu1 %v1859_v17  ;;  %v2929_v29 = vpop.f32.mrb[3].mxu1 }
 0x101   : > { %3226 = vmatprep.mubr.msk.bf16.mxu1 %vm4626_vm4, %v3986_v47 }
 0x104   : > { %3267 = vmatmul.mubr.bf16.gmra.mrb[104].mxu0 %v2045_v32  ;;  %v1857_v32 = vld [vmem:[#allocation2 + $0x75] sm:$0xf] }
 0x105   : > { %3270 = vmatprep.mubr.msk.bf16.mxu0 %vm4626_vm4, %v3986_v47 }
 0x107   : > { %v4342_v60 = vpop.f32.mrb[4].mxu0 }
 0x108   : > { %3227 = vmatmul.mubr.bf16.gmra.mrb[104].mxu1 %v1860_v2  ;;  %v2916_v26 = vpop.f32.mrb[5].mxu0  ;;  %v1864_v2 = vpack.c.bf16 %v1857_v32, %v1857_v32 }
 0x109   : > { %v4344_v6 = vpop.f32.mrb[6].mxu0  ;;  %3230 = vmatprep.mubr.msk.bf16.mxu1 %vm4626_vm4, %v3986_v47 }
 0x10a   : > { %v2917_v22 = vpop.f32.mrb[7].mxu0 }
 0x10c   : > { %3271 = vmatmul.mubr.bf16.gmra.mrb[108].mxu0 %v2046_v48 }
 0x10d   : > { %3274 = vmatprep.mubr.msk.bf16.mxu0 %vm4626_vm4, %v3986_v47  ;;  %v4350_v33 = vpop.f32.mrb[4].mxu1 }
 0x10e   : > { %v2932_v40 = vpop.f32.mrb[5].mxu1 }
 0x10f   : > { %v4352_v10 = vpop.f32.mrb[6].mxu1 }
 0x110   : > { %3231 = vmatmul.mubr.bf16.gmra.mrb[108].mxu1 %v1861_v34  ;;  %v2933_v58 = vpop.f32.mrb[7].mxu1  ;;  %v2050_v34 = vpack.c.bf16 %v2043_v45, %v2043_v45 }
 0x111   : > { %3234 = vmatprep.mubr.msk.bf16.mxu1 %vm4626_vm4, %v3986_v47 }
 0x114   : > { %3275 = vmatmul.mubr.bf16.gmra.mrb[112].mxu0 %v2047_v51 }
 0x115   : > { %3278 = vmatprep.mubr.msk.bf16.mxu0 %vm4626_vm4, %v3986_v47 }
 0x117   : > { %v741_v57 = vpop.f32.mrb[8].mxu0 }
 0x118   : > { %v2920_v3 = vpop.f32.mrb[9].mxu0  ;;  %3235 = vmatmul.mubr.bf16.gmra.mrb[112].mxu1 %v1862_v15 }
 0x119   : > { %v744_v54 = vpop.f32.mrb[10].mxu0  ;;  %3238 = vmatprep.mubr.msk.bf16.mxu1 %vm4626_vm4, %v3986_v47 }
 0x11a   : > { %v2921_v63 = vpop.f32.mrb[11].mxu0 }
 0x11b   : > { %v4360_v1 = vpop.f32.mrb[8].mxu1 }
 0x11c   : > { %3279 = vmatmul.mubr.bf16.gmra.mrb[116].mxu0 %v2048_v53  ;;  %v2936_v61 = vpop.f32.mrb[9].mxu1 }
 0x11d   : > { %3282 = vmatprep.mubr.msk.bf16.mxu0 %vm4626_vm4, %v3986_v47  ;;  %v776_v37 = vpop.f32.mrb[10].mxu1 }
 0x11e   : > { %v2937_v42 = vpop.f32.mrb[11].mxu1 }
 0x11f   : > { %v749_v16 = vpop.f32.mrb[12].mxu0 }
 0x120   : > { %v2924_v17 = vpop.f32.mrb[13].mxu0  ;;  %3239 = vmatmul.mubr.bf16.gmra.mrb[116].mxu1 %v1863_v14 }
 0x121   : > { %v752_v24 = vpop.f32.mrb[14].mxu0  ;;  %3242 = vmatprep.mubr.msk.bf16.mxu1 %vm4626_vm4, %v3986_v47 }
 0x122   : > { %v2925_v11 = vpop.f32.mrb[15].mxu0 }
 0x123   : > { %v861_v29 = vpop.f32.mrb[12].mxu1 }
 0x124   : > { %3283 = vmatmul.mubr.bf16.gmra.mrb[120].mxu0 %v2049_v21  ;;  %v862_v35 = vadd.f32 %v861_v29, %v4326_v38  ;;  %v2956_v39 = vpop.f32.mrb[13].mxu1 }
 0x125   : > { %3286 = vmatprep.mubr.msk.bf16.mxu0 %vm4626_vm4, %v3986_v47  ;;  %v864_v4 = vpop.f32.mrb[14].mxu1 }
 0x126   : > { %v865_v26 = vadd.f32 %v864_v4, %v4330_v9  ;;  %v2957_v36 = vpop.f32.mrb[15].mxu1 }
 0x127   : > { %v1034_v48 = vpop.f32.mrb[16].mxu0 }
 0x128   : > { %v4370_v41 = vadd.f32 %v1034_v48, %v862_v35  ;;  %v3000_v22 = vpop.f32.mrb[17].mxu0  ;;  %3243 = vmatmul.mubr.bf16.gmra.mrb[120].mxu1 %v1864_v2 }
 0x129   : > { %v1037_v31 = vpop.f32.mrb[18].mxu0 }
 0x12a   : > { %v4372_v49 = vadd.f32 %v1037_v31, %v865_v26  ;;  %v3001_v38 = vpop.f32.mrb[19].mxu0 }
 0x12b   : > { %v869_v40 = vpop.f32.mrb[16].mxu1 }
 0x12c   : > { %3287 = vmatmul.mubr.bf16.gmra.mrb[124].mxu0 %v2050_v34  ;;  %v870_v47 = vadd.f32 %v869_v40, %v4342_v60  ;;  %v2960_v51 = vpop.f32.mrb[17].mxu1 }
 0x12d   : > { %v872_v58 = vpop.f32.mrb[18].mxu1 }
 0x12e   : > { %v873_v7 = vadd.f32 %v872_v58, %v4344_v6  ;;  %v2961_v9 = vpop.f32.mrb[19].mxu1 }
 0x12f   : > { %v1042_v28 = vpop.f32.mrb[20].mxu0 }
 0x130   : > { %v4376_v15 = vadd.f32 %v1042_v28, %v870_v47  ;;  %v3004_v59 = vpop.f32.mrb[21].mxu0 }
 0x131   : > { %v1045_v52 = vpop.f32.mrb[22].mxu0 }
 0x132   : > { %v4378_v3 = vadd.f32 %v1045_v52, %v873_v7  ;;  %v3005_v53 = vpop.f32.mrb[23].mxu0 }
 0x133   : > { %v877_v63 = vpop.f32.mrb[20].mxu1 }
 0x134   : > { %v878_v0 = vadd.f32 %v877_v63, %v741_v57  ;;  %v2964_v55 = vpop.f32.mrb[21].mxu1 }
 0x135   : > { %v880_v61 = vpop.f32.mrb[22].mxu1 }
 0x136   : > { %v881_v8 = vadd.f32 %v880_v61, %v744_v54  ;;  %v2965_v60 = vpop.f32.mrb[23].mxu1 }
 0x137   : > { %v1050_v14 = vpop.f32.mrb[24].mxu0 }
 0x138   : > { %v4380_v62 = vadd.f32 %v1050_v14, %v878_v0  ;;  %v3008_v37 = vpop.f32.mrb[25].mxu0 }
 0x139   : > { %v1053_v42 = vpop.f32.mrb[26].mxu0 }
 0x13a   : > { %v4382_v6 = vadd.f32 %v1053_v42, %v881_v8  ;;  %v3009_v17 = vpop.f32.mrb[27].mxu0 }
 0x13b   : > { %v885_v21 = vpop.f32.mrb[24].mxu1 }
 0x13c   : > { %v886_v11 = vadd.f32 %v885_v21, %v749_v16  ;;  %v2968_v32 = vpop.f32.mrb[25].mxu1 }
 0x13d   : > { %v888_v29 = vpop.f32.mrb[26].mxu1 }
 0x13e   : > { %v889_v39 = vadd.f32 %v888_v29, %v752_v24  ;;  %v2969_v2 = vpop.f32.mrb[27].mxu1 }
 0x13f   : > { %v1058_v35 = vpop.f32.mrb[28].mxu0 }
 0x140   : > { %v4384_v57 = vadd.f32 %v1058_v35, %v886_v11  ;;  %v3012_v45 = vpop.f32.mrb[29].mxu0 }
 0x141   : > { %v1061_v4 = vpop.f32.mrb[30].mxu0 }
 0x142   : > { %v4386_v54 = vadd.f32 %v1061_v4, %v889_v39  ;;  %v3013_v48 = vpop.f32.mrb[31].mxu0 }
 0x143   : > { %v893_v26 = vpop.f32.mrb[28].mxu1 }
 0x144   : > { %v894_v36 = vadd.f32 %v893_v26, %v4334_v27  ;;  %v2972_v22 = vpop.f32.mrb[29].mxu1 }
 0x145   : > { %v896_v34 = vpop.f32.mrb[30].mxu1 }
 0x146   : > { %v897_v16 = vadd.f32 %v896_v34, %v4336_v23  ;;  %v2973_v38 = vpop.f32.mrb[31].mxu1 }
 0x147   : > { %v1066_v31 = vpop.f32.mrb[32].mxu0 }
 0x148   : > { %v4390_v40 = vadd.f32 %v1066_v31, %v894_v36  ;;  %v3016_v24 = vpop.f32.mrb[33].mxu0 }
 0x149   : > { %v1069_v47 = vpop.f32.mrb[34].mxu0 }
 0x14a   : > { %v4392_v51 = vadd.f32 %v1069_v47, %v897_v16  ;;  %v3017_v58 = vpop.f32.mrb[35].mxu0 }
 0x14b   : > { %v901_v28 = vpop.f32.mrb[32].mxu1 }
 0x14c   : > { %v902_v7 = vadd.f32 %v901_v28, %v4350_v33  ;;  %v2976_v9 = vpop.f32.mrb[33].mxu1 }
 0x14d   : > { %v904_v59 = vpop.f32.mrb[34].mxu1 }
 0x14e   : > { %v905_v27 = vadd.f32 %v904_v59, %v4352_v10  ;;  %v2977_v53 = vpop.f32.mrb[35].mxu1 }
 0x14f   : > { %v1074_v52 = vpop.f32.mrb[36].mxu0 }
 0x150   : > { %v4396_v63 = vadd.f32 %v1074_v52, %v902_v7  ;;  %v3020_v23 = vpop.f32.mrb[37].mxu0 }
 0x151   : > { %v1077_v0 = vpop.f32.mrb[38].mxu0 }
 0x152   : > { %v4398_v55 = vadd.f32 %v1077_v0, %v905_v27  ;;  %v3021_v61 = vpop.f32.mrb[39].mxu0 }
 0x153   : > { %v909_v14 = vpop.f32.mrb[36].mxu1 }
 0x154   : > { %v910_v8 = vadd.f32 %v909_v14, %v4360_v1  ;;  %v2980_v60 = vpop.f32.mrb[37].mxu1 }
 0x155   : > { %v912_v37 = vpop.f32.mrb[38].mxu1 }
 0x156   : > { %v2981_v33 = vpop.f32.mrb[39].mxu1 }
 0x157   : > { %v1082_v42 = vpop.f32.mrb[40].mxu0 }
 0x158   : > { %v4401_v17 = vadd.f32 %v1082_v42, %v910_v8  ;;  %v3024_v21 = vpop.f32.mrb[41].mxu0 }
 0x159   : > { %v1085_v11 = vpop.f32.mrb[42].mxu0 }
 0x15a   : > { %v3025_v10 = vpop.f32.mrb[43].mxu0 }
 0x15b   : > { %v1220_v32 = vpop.f32.mrb[40].mxu1 }
 0x15c   : > { %v1274_v29 = vadd.f32 %v1220_v32, %v4370_v41  ;;  %v3044_v35 = vpop.f32.mrb[41].mxu1 }
 0x15d   : > { %v1223_v39 = vpop.f32.mrb[42].mxu1 }
 0x15e   : > { %v1275_v45 = vadd.f32 %v1223_v39, %v4372_v49  ;;  %v3045_v4 = vpop.f32.mrb[43].mxu1 }
 0x15f   : > { %v1406_v2 = vpop.f32.mrb[44].mxu0 }
 0x160   : > { %v4405_v48 = vadd.f32 %v1406_v2, %v1274_v29  ;;  %v3088_v1 = vpop.f32.mrb[45].mxu0 }
 0x161   : > { %v1409_v26 = vpop.f32.mrb[46].mxu0 }
 0x162   : > { %v4407_v36 = vadd.f32 %v1409_v26, %v1275_v45  ;;  %v3089_v22 = vpop.f32.mrb[47].mxu0 }
 0x163   : > { %v1228_v34 = vpop.f32.mrb[44].mxu1 }
 0x164   : > { %v1276_v31 = vadd.f32 %v1228_v34, %v4376_v15  ;;  %v3048_v16 = vpop.f32.mrb[45].mxu1 }
 0x165   : > { %v1231_v38 = vpop.f32.mrb[46].mxu1 }
 0x166   : > { %v1277_v41 = vadd.f32 %v1231_v38, %v4378_v3  ;;  %v3049_v47 = vpop.f32.mrb[47].mxu1 }
 0x167   : > { %v1414_v24 = vpop.f32.mrb[48].mxu0 }
 0x168   : > { %v4411_v58 = vadd.f32 %v1414_v24, %v1276_v31  ;;  %v3092_v49 = vpop.f32.mrb[49].mxu0 }
 0x169   : > { %v1417_v28 = vpop.f32.mrb[50].mxu0 }
 0x16a   : > { %v4413_v7 = vadd.f32 %v1417_v28, %v1277_v41  ;;  %v3093_v9 = vpop.f32.mrb[51].mxu0 }
 0x16b   : > { %v1236_v59 = vpop.f32.mrb[48].mxu1 }
 0x16c   : > { %v1278_v52 = vadd.f32 %v1236_v59, %v4380_v62  ;;  %v3052_v27 = vpop.f32.mrb[49].mxu1 }
 0x16d   : > { %v1239_v53 = vpop.f32.mrb[50].mxu1 }
 0x16e   : > { %v1279_v15 = vadd.f32 %v1239_v53, %v4382_v6  ;;  %v3053_v0 = vpop.f32.mrb[51].mxu1 }
 0x16f   : > { %v1422_v23 = vpop.f32.mrb[52].mxu0 }
 0x170   : > { %v4417_v61 = vadd.f32 %v1422_v23, %v1278_v52  ;;  %v3096_v3 = vpop.f32.mrb[53].mxu0 }
 0x171   : > { %v1425_v14 = vpop.f32.mrb[54].mxu0 }
 0x172   : > { %v4419_v8 = vadd.f32 %v1425_v14, %v1279_v15  ;;  %v3097_v60 = vpop.f32.mrb[55].mxu0 }
 0x173   : > { %v1244_v37 = vpop.f32.mrb[52].mxu1 }
 0x174   : > { %v1280_v42 = vadd.f32 %v1244_v37, %v4384_v57  ;;  %v3056_v33 = vpop.f32.mrb[53].mxu1 }
 0x175   : > { %v1247_v21 = vpop.f32.mrb[54].mxu1 }
 0x176   : > { %v1281_v62 = vadd.f32 %v1247_v21, %v4386_v54  ;;  %v3057_v10 = vpop.f32.mrb[55].mxu1 }
 0x177   : > { %v1430_v11 = vpop.f32.mrb[56].mxu0 }
 0x178   : > { %v4423_v32 = vadd.f32 %v1430_v11, %v1280_v42  ;;  %v3100_v6 = vpop.f32.mrb[57].mxu0 }
 0x179   : > { %v1433_v29 = vpop.f32.mrb[58].mxu0 }
 0x17a   : > { %v4425_v35 = vadd.f32 %v1433_v29, %v1281_v62  ;;  %v3101_v39 = vpop.f32.mrb[59].mxu0 }
 0x17b   : > { %v1252_v2 = vpop.f32.mrb[56].mxu1 }
 0x17c   : > { %v1282_v45 = vadd.f32 %v1252_v2, %v4390_v40  ;;  %v3060_v4 = vpop.f32.mrb[57].mxu1 }
 0x17d   : > { %v1255_v1 = vpop.f32.mrb[58].mxu1 }
 0x17e   : > { %v1283_v57 = vadd.f32 %v1255_v1, %v4392_v51  ;;  %v3061_v22 = vpop.f32.mrb[59].mxu1 }
 0x17f   : > { %v1438_v26 = vpop.f32.mrb[60].mxu0 }
 0x180   : > { %v4429_v34 = vadd.f32 %v1438_v26, %v1282_v45  ;;  %v3104_v54 = vpop.f32.mrb[61].mxu0 }
 0x181   : > { %v1441_v31 = vpop.f32.mrb[62].mxu0 }
 0x182   : > { %v4431_v16 = vadd.f32 %v1441_v31, %v1283_v57  ;;  %v3105_v38 = vpop.f32.mrb[63].mxu0 }
 0x183   : > { %v1260_v24 = vpop.f32.mrb[60].mxu1 }
 0x184   : > { %v1284_v41 = vadd.f32 %v1260_v24, %v4396_v63  ;;  %v3064_v47 = vpop.f32.mrb[61].mxu1 }
 0x185   : > { %v1263_v49 = vpop.f32.mrb[62].mxu1 }
 0x186   : > { %v1285_v40 = vadd.f32 %v1263_v49, %v4398_v55  ;;  %v3065_v9 = vpop.f32.mrb[63].mxu1 }
 0x187   : > { %v1446_v28 = vpop.f32.mrb[64].mxu0 }
 0x188   : > { %v4435_v59 = vadd.f32 %v1446_v28, %v1284_v41  ;;  %v3108_v51 = vpop.f32.mrb[65].mxu0 }
 0x189   : > { %v1449_v52 = vpop.f32.mrb[66].mxu0 }
 0x18a   : > { %v4437_v27 = vadd.f32 %v1449_v52, %v1285_v40  ;;  %v3109_v53 = vpop.f32.mrb[67].mxu0 }
 0x18b   : > { %v1268_v23 = vpop.f32.mrb[64].mxu1 }
 0x18c   : > { %v1286_v15 = vadd.f32 %v1268_v23, %v4401_v17  ;;  %v3068_v0 = vpop.f32.mrb[65].mxu1 }
 0x18d   : > { %v1271_v3 = vpop.f32.mrb[66].mxu1 }
 0x18e   : > { %v3069_v63 = vpop.f32.mrb[67].mxu1 }
 0x18f   : > { %v1454_v14 = vpop.f32.mrb[68].mxu0 }
 0x190   : > { %v4440_v60 = vadd.f32 %v1454_v14, %v1286_v15  ;;  %v3112_v37 = vpop.f32.mrb[69].mxu0 }
 0x191   : > { %v1457_v42 = vpop.f32.mrb[70].mxu0 }
 0x192   : > { %v3113_v55 = vpop.f32.mrb[71].mxu0 }
 0x193   : > { %v1592_v33 = vpop.f32.mrb[68].mxu1 }
 0x194   : > { %v1646_v21 = vadd.f32 %v1592_v33, %v4405_v48  ;;  %v3132_v11 = vpop.f32.mrb[69].mxu1 }
 0x195   : > { %v1595_v62 = vpop.f32.mrb[70].mxu1 }
 0x196   : > { %v1647_v6 = vadd.f32 %v1595_v62, %v4407_v36  ;;  %v3133_v29 = vpop.f32.mrb[71].mxu1 }
 0x197   : > { %v1778_v10 = vpop.f32.mrb[72].mxu0 }
 0x198   : > { %v4444_v39 = vadd.f32 %v1778_v10, %v1646_v21  ;;  %v3176_v17 = vpop.f32.mrb[73].mxu0 }
 0x199   : > { %v1781_v2 = vpop.f32.mrb[74].mxu0 }
 0x19a   : > { %v4446_v45 = vadd.f32 %v1781_v2, %v1647_v6  ;;  %v3177_v4 = vpop.f32.mrb[75].mxu0 }
 0x19b   : > { %v1600_v1 = vpop.f32.mrb[72].mxu1 }
 0x19c   : > { %v1648_v26 = vadd.f32 %v1600_v1, %v4411_v58  ;;  %v3136_v57 = vpop.f32.mrb[73].mxu1 }
 0x19d   : > { %v1603_v22 = vpop.f32.mrb[74].mxu1 }
 0x19e   : > { %v1649_v48 = vadd.f32 %v1603_v22, %v4413_v7  ;;  %v3137_v31 = vpop.f32.mrb[75].mxu1 }
 0x19f   : > { %v1786_v54 = vpop.f32.mrb[76].mxu0 }
 0x1a0   : > { %v4450_v38 = vadd.f32 %v1786_v54, %v1648_v26  ;;  %v3180_v36 = vpop.f32.mrb[77].mxu0 }
 0x1a1   : > { %v1789_v24 = vpop.f32.mrb[78].mxu0 }
 0x1a2   : > { %v4452_v41 = vadd.f32 %v1789_v24, %v1649_v48  ;;  %v3181_v47 = vpop.f32.mrb[79].mxu0 }
 0x1a3   : > { %v1608_v49 = vpop.f32.mrb[76].mxu1 }
 0x1a4   : > { %v1650_v28 = vadd.f32 %v1608_v49, %v4417_v61  ;;  %v3140_v40 = vpop.f32.mrb[77].mxu1 }
 0x1a5   : > { %v1611_v9 = vpop.f32.mrb[78].mxu1 }
 0x1a6   : > { %v1651_v58 = vadd.f32 %v1611_v9, %v4419_v8  ;;  %v3141_v52 = vpop.f32.mrb[79].mxu1 }
 0x1a7   : > { %v1794_v51 = vpop.f32.mrb[80].mxu0 }
 0x1a8   : > { %v4456_v53 = vadd.f32 %v1794_v51, %v1650_v28  ;;  %v3184_v7 = vpop.f32.mrb[81].mxu0 }
 0x1a9   : > { %v1797_v23 = vpop.f32.mrb[82].mxu0 }
 0x1aa   : > { %v4458_v15 = vadd.f32 %v1797_v23, %v1651_v58  ;;  %v3185_v0 = vpop.f32.mrb[83].mxu0 }
 0x1ab   : > { %v1616_v3 = vpop.f32.mrb[80].mxu1 }
 0x1ac   : > { %v1652_v14 = vadd.f32 %v1616_v3, %v4423_v32  ;;  %v3144_v63 = vpop.f32.mrb[81].mxu1 }
 0x1ad   : > { %v1619_v37 = vpop.f32.mrb[82].mxu1 }
 0x1ae   : > { %v1653_v61 = vadd.f32 %v1619_v37, %v4425_v35  ;;  %v3145_v55 = vpop.f32.mrb[83].mxu1 }
 0x1af   : > { %v1802_v42 = vpop.f32.mrb[84].mxu0 }
 0x1b0   : > { %v4462_v33 = vadd.f32 %v1802_v42, %v1652_v14  ;;  %v3188_v8 = vpop.f32.mrb[85].mxu0 }
 0x1b1   : > { %v1805_v21 = vpop.f32.mrb[86].mxu0 }
 0x1b2   : > { %v4464_v11 = vadd.f32 %v1805_v21, %v1653_v61  ;;  %v3189_v62 = vpop.f32.mrb[87].mxu0 }
 0x1b3   : > { %v1624_v10 = vpop.f32.mrb[84].mxu1 }
 0x1b4   : > { %v1654_v6 = vadd.f32 %v1624_v10, %v4429_v34  ;;  %v3148_v29 = vpop.f32.mrb[85].mxu1 }
 0x1b5   : > { %v1627_v17 = vpop.f32.mrb[86].mxu1 }
 0x1b6   : > { %v1655_v32 = vadd.f32 %v1627_v17, %v4431_v16  ;;  %v3149_v4 = vpop.f32.mrb[87].mxu1 }
 0x1b7   : > { %v1810_v2 = vpop.f32.mrb[88].mxu0 }
 0x1b8   : > { %v4468_v1 = vadd.f32 %v1810_v2, %v1654_v6  ;;  %v3192_v35 = vpop.f32.mrb[89].mxu0 }
 0x1b9   : > { %v1813_v26 = vpop.f32.mrb[90].mxu0 }
 0x1ba   : > { %v4470_v57 = vadd.f32 %v1813_v26, %v1655_v32  ;;  %v3193_v22 = vpop.f32.mrb[91].mxu0 }
 0x1bb   : > { %v1632_v54 = vpop.f32.mrb[88].mxu1 }
 0x1bc   : > { %v1656_v48 = vadd.f32 %v1632_v54, %v4435_v59  ;;  %v3152_v31 = vpop.f32.mrb[89].mxu1 }
 0x1bd   : > { %v1635_v36 = vpop.f32.mrb[90].mxu1 }
 0x1be   : > { %v1657_v34 = vadd.f32 %v1635_v36, %v4437_v27  ;;  %v3153_v47 = vpop.f32.mrb[91].mxu1 }
 0x1bf   : > { %v1818_v24 = vpop.f32.mrb[92].mxu0 }
 0x1c0   : > { %v4474_v49 = vadd.f32 %v1818_v24, %v1656_v48  ;;  %v3196_v16 = vpop.f32.mrb[93].mxu0 }
 0x1c1   : > { %v1821_v28 = vpop.f32.mrb[94].mxu0 }
 0x1c2   : > { %v4476_v40 = vadd.f32 %v1821_v28, %v1657_v34  ;;  %v3197_v9 = vpop.f32.mrb[95].mxu0 }
 0x1c3   : > { %v1640_v51 = vpop.f32.mrb[92].mxu1 }
 0x1c4   : > { %v1658_v58 = vadd.f32 %v1640_v51, %v4440_v60  ;;  %v3156_v52 = vpop.f32.mrb[93].mxu1  ;;  %v4485_v60 = vld [vmem:[%s4563_s4] ss:$0 sm:$0xff] }
 0x1c5   : > { %v1643_v7 = vpop.f32.mrb[94].mxu1 }
 0x1c6   : > { %v3157_v59 = vpop.f32.mrb[95].mxu1 }
 0x1c7   : > { %v1826_v23 = vpop.f32.mrb[96].mxu0 }
 0x1c8   : > { %v4479_v0 = vadd.f32 %v1826_v23, %v1658_v58  ;;  %v3200_v3 = vpop.f32.mrb[97].mxu0 }
 0x1c9   : > { %v1829_v14 = vpop.f32.mrb[98].mxu0 }
 0x1ca   : > { %v3201_v27 = vpop.f32.mrb[99].mxu0 }
 0x1cb   : > { %v1964_v63 = vpop.f32.mrb[96].mxu1 }
 0x1cc   : > { %v2018_v37 = vadd.f32 %v1964_v63, %v4444_v39  ;;  %v3220_v42 = vpop.f32.mrb[97].mxu1 }
 0x1cd   : > { %v1967_v61 = vpop.f32.mrb[98].mxu1 }
 0x1ce   : > { %v2019_v8 = vadd.f32 %v1967_v61, %v4446_v45  ;;  %v3221_v21 = vpop.f32.mrb[99].mxu1 }
 0x1cf   : > { %v2150_v55 = vpop.f32.mrb[100].mxu0 }
 0x1d0   : > { %v2204_v62 = vadd.f32 %v2150_v55, %v2018_v37  ;;  %v3264_v10 = vpop.f32.mrb[101].mxu0 }
 0x1d1   : > { %v2153_v6 = vpop.f32.mrb[102].mxu0 }
 0x1d2   : > { %v2224_v29 = vadd.f32 %v4485_v60, %v2204_v62  ;;  %v2205_v17 = vadd.f32 %v2153_v6, %v2019_v8  ;;  %v3265_v2 = vpop.f32.mrb[103].mxu0 }
 0x1d3   : > { %v1972_v4 = vpop.f32.mrb[100].mxu1 }
 0x1d4   : > { %v2237_v39 = vsel %vm3549_vm14, %v2224_v29, 0.0  ;;  %v2225_v32 = vadd.f32 %v4485_v60, %v2205_v17  ;;  %v2020_v35 = vadd.f32 %v1972_v4, %v4450_v38  ;;  %v3224_v26 = vpop.f32.mrb[101].mxu1 }
 0x1d5   : > { %v2337_v22 = vmul.f32 %v2237_v39, %v2237_v39  ;;  %v1975_v54 = vpop.f32.mrb[102].mxu1 }
 0x1d6   : > { %v2238_v45 = vsel %vm3736_vm3, %v2225_v32, 0.0  ;;  %v2021_v24 = vadd.f32 %v1975_v54, %v4452_v41  ;;  %v3225_v38 = vpop.f32.mrb[103].mxu1 }
 0x1d7   : > { %v2722_v46 = vpack.c.bf16 %v2238_v45, %v2237_v39  ;;  %v2316_v48 = vadd.f32 %v2238_v45, %v2237_v39  ;;  %v2338_v31 = vmul.f32 %v2238_v45, %v2238_v45  ;;  %v2158_v36 = vpop.f32.mrb[104].mxu0 }
 0x1d8   : > { %v2206_v34 = vadd.f32 %v2158_v36, %v2020_v35  ;;  %v3268_v47 = vpop.f32.mrb[105].mxu0 }
 0x1d9   : > { %2723 = vst [vmem:[%s4498_s11] sm:$0xff] %v2722_v46   ;;  %v2350_v16 = vadd.f32 %v2338_v31, %v2337_v22  ;;  %v2161_v28 = vpop.f32.mrb[106].mxu0 }
 0x1da   : > { %v2226_v9 = vadd.f32 %v4485_v60, %v2206_v34  ;;  %v2207_v51 = vadd.f32 %v2161_v28, %v2021_v24  ;;  %v3269_v58 = vpop.f32.mrb[107].mxu0 }
 0x1db   : > { %v1980_v7 = vpop.f32.mrb[104].mxu1 }
 0x1dc   : > { %v2239_v12 = vsel %vm3746_vm5, %v2226_v9, 0.0  ;;  %v2227_v52 = vadd.f32 %v4485_v60, %v2207_v51  ;;  %v2022_v41 = vadd.f32 %v1980_v7, %v4456_v53  ;;  %v3228_v3 = vpop.f32.mrb[105].mxu1 }
 0x1dd   : > { %v2317_v23 = vadd.f32 %v2316_v48, %v2239_v12  ;;  %v2339_v59 = vmul.f32 %v2239_v12, %v2239_v12  ;;  %v1983_v27 = vpop.f32.mrb[106].mxu1 }
 0x1de   : > { %v2240_v14 = vsel %vm3866_vm2, %v2227_v52, 0.0  ;;  %v3229_v20 = vpop.f32.mrb[107].mxu1  ;;  %v2023_v62 = vadd.f32 %v1983_v27, %v4458_v15 }
 0x1df   : > { %v2351_v63 = vadd.f32 %v2350_v16, %v2339_v59  ;;  %v2727_v37 = vpack.c.bf16 %v2240_v14, %v2239_v12  ;;  %v2318_v42 = vadd.f32 %v2317_v23, %v2240_v14  ;;  %v2340_v61 = vmul.f32 %v2240_v14, %v2240_v14  ;;  %v2166_v55 = vpop.f32.mrb[108].mxu0 }
 0x1e0   : > { %v2208_v8 = vadd.f32 %v2166_v55, %v2022_v41  ;;  %v3272_v21 = vpop.f32.mrb[109].mxu0 }
 0x1e1   : > { %2754 = vst [vmem:[%s4498_s11 + $0x8] sm:$0xff] %v2727_v37   ;;  %v2352_v10 = vadd.f32 %v2351_v63, %v2340_v61  ;;  %v2169_v6 = vpop.f32.mrb[110].mxu0 }
 0x1e2   : > { %v2228_v53 = vadd.f32 %v4485_v60, %v2208_v8  ;;  %v2209_v29 = vadd.f32 %v2169_v6, %v2023_v62  ;;  %v3273_v17 = vpop.f32.mrb[111].mxu0 }
 0x1e3   : > { %v1988_v39 = vpop.f32.mrb[108].mxu1 }
 0x1e4   : > { %v2241_v43 = vsel %vm3874_vm0, %v2228_v53, 0.0  ;;  %v2229_v2 = vadd.f32 %v4485_v60, %v2209_v29  ;;  %v2024_v35 = vadd.f32 %v1988_v39, %v4462_v33  ;;  %v3232_v26 = vpop.f32.mrb[109].mxu1  ;;  %vm2327_vm0 = vcmask 1043456  }
 0x1e5   : > { %v2319_v32 = vadd.f32 %v2318_v42, %v2241_v43  ;;  %v2341_v4 = vmul.f32 %v2241_v43, %v2241_v43  ;;  %v1991_v22 = vpop.f32.mrb[110].mxu1 }
 0x1e6   : > { %v2242_v15 = vsel %vm3919_vm11, %v2229_v2, 0.0  ;;  %v3233_v50 = vpop.f32.mrb[111].mxu1  ;;  %v2025_v38 = vadd.f32 %v1991_v22, %v4464_v11 }
 0x1e7   : > { %v2353_v45 = vadd.f32 %v2352_v10, %v2341_v4  ;;  %v2732_v54 = vpack.c.bf16 %v2242_v15, %v2241_v43  ;;  %v2320_v46 = vadd.f32 %v2319_v32, %v2242_v15  ;;  %v2342_v48 = vmul.f32 %v2242_v15, %v2242_v15  ;;  %v2174_v31 = vpop.f32.mrb[112].mxu0 }
 0x1e8   : > { %v2210_v36 = vadd.f32 %v2174_v31, %v2024_v35  ;;  %v3276_v24 = vpop.f32.mrb[113].mxu0 }
 0x1e9   : > { %2755 = vst [vmem:[%s4498_s11 + $0x10] sm:$0xff] %v2732_v54   ;;  %v2354_v34 = vadd.f32 %v2353_v45, %v2342_v48  ;;  %v2177_v47 = vpop.f32.mrb[114].mxu0 }
 0x1ea   : > { %v2230_v33 = vadd.f32 %v4485_v60, %v2210_v36  ;;  %v2211_v16 = vadd.f32 %v2177_v47, %v2025_v38  ;;  %v3277_v28 = vpop.f32.mrb[115].mxu0 }
 0x1eb   : > { %v1996_v51 = vpop.f32.mrb[112].mxu1 }
 0x1ec   : > { %v2243_v18 = vsel %vm4633_vm6, %v2230_v33, 0.0  ;;  %v2231_v9 = vadd.f32 %v4485_v60, %v2211_v16  ;;  %v2026_v52 = vadd.f32 %v1996_v51, %v4468_v1  ;;  %v3236_v7 = vpop.f32.mrb[113].mxu1 }
 0x1ed   : > { %v2321_v58 = vadd.f32 %v2320_v46, %v2243_v18  ;;  %v2343_v12 = vmul.f32 %v2243_v18, %v2243_v18  ;;  %v1999_v23 = vpop.f32.mrb[114].mxu1 }
 0x1ee   : > { %v2244_v11 = vsel %vm4634_vm9, %v2231_v9, 0.0  ;;  %v3237_v13 = vpop.f32.mrb[115].mxu1  ;;  %v2027_v42 = vadd.f32 %v1999_v23, %v4470_v57 }
 0x1ef   : > { %v2355_v59 = vadd.f32 %v2354_v34, %v2343_v12  ;;  %v2737_v41 = vpack.c.bf16 %v2244_v11, %v2243_v18  ;;  %v2322_v3 = vadd.f32 %v2321_v58, %v2244_v11  ;;  %v2344_v14 = vmul.f32 %v2244_v11, %v2244_v11  ;;  %v2182_v27 = vpop.f32.mrb[116].mxu0 }
 0x1f0   : > { %v2212_v63 = vadd.f32 %v2182_v27, %v2026_v52  ;;  %v3280_v37 = vpop.f32.mrb[117].mxu0 }
 0x1f1   : > { %2756 = vst [vmem:[%s4498_s11 + $0x18] sm:$0xff] %v2737_v41   ;;  %v2356_v61 = vadd.f32 %v2355_v59, %v2344_v14  ;;  %v2185_v55 = vpop.f32.mrb[118].mxu0 }
 0x1f2   : > { %v2232_v1 = vadd.f32 %v4485_v60, %v2212_v63  ;;  %v2213_v20 = vadd.f32 %v2185_v55, %v2027_v42  ;;  %v3281_v8 = vpop.f32.mrb[119].mxu0 }
 0x1f3   : > { %v2004_v62 = vpop.f32.mrb[116].mxu1 }
 0x1f4   : > { %v2245_v19 = vsel %vm4635_vm15, %v2232_v1, 0.0  ;;  %v2233_v21 = vadd.f32 %v4485_v60, %v2213_v20  ;;  %v2028_v53 = vadd.f32 %v2004_v62, %v4474_v49  ;;  %v3240_v29 = vpop.f32.mrb[117].mxu1 }
 0x1f5   : > { %v2323_v10 = vadd.f32 %v2322_v3, %v2245_v19  ;;  %v2345_v6 = vmul.f32 %v2245_v19, %v2245_v19  ;;  %v2007_v17 = vpop.f32.mrb[118].mxu1 }
 0x1f6   : > { %v2246_v57 = vsel %vm4636_vm1, %v2233_v21, 0.0  ;;  %v3241_v25 = vpop.f32.mrb[119].mxu1  ;;  %v2029_v15 = vadd.f32 %v2007_v17, %v4476_v40 }
 0x1f7   : > { %v2357_v43 = vadd.f32 %v2356_v61, %v2345_v6  ;;  %v2742_v2 = vpack.c.bf16 %v2246_v57, %v2245_v19  ;;  %v2324_v39 = vadd.f32 %v2323_v10, %v2246_v57  ;;  %v2346_v32 = vmul.f32 %v2246_v57, %v2246_v57  ;;  %v2190_v4 = vpop.f32.mrb[120].mxu0 }
 0x1f8   : > { %v2214_v35 = vadd.f32 %v2190_v4, %v2028_v53  ;;  %v3284_v26 = vpop.f32.mrb[121].mxu0 }
 0x1f9   : > { %2757 = vst [vmem:[%s4498_s11 + $0x20] sm:$0xff] %v2742_v2   ;;  %v2358_v22 = vadd.f32 %v2357_v43, %v2346_v32  ;;  %v2193_v45 = vpop.f32.mrb[122].mxu0 }
 0x1fa   : > { %v2234_v49 = vadd.f32 %v4485_v60, %v2214_v35  ;;  %v2215_v54 = vadd.f32 %v2193_v45, %v2029_v15  ;;  %v3285_v46 = vpop.f32.mrb[123].mxu0 }
 0x1fb   : > { %v2012_v31 = vpop.f32.mrb[120].mxu1 }
 0x1fc   : > { %v2247_v44 = vsel %vm4637_vm13, %v2234_v49, 0.0  ;;  %v2235_v48 = vadd.f32 %v4485_v60, %v2215_v54  ;;  %v2030_v24 = vadd.f32 %v2012_v31, %v4479_v0  ;;  %v3244_v38 = vpop.f32.mrb[121].mxu1 }
 0x1fd   : > { %v2325_v50 = vadd.f32 %v2324_v39, %v2247_v44  ;;  %v2347_v36 = vmul.f32 %v2247_v44, %v2247_v44  ;;  %v2015_v34 = vpop.f32.mrb[122].mxu1 }
 0x1fe   : > { %v2248_v40 = vsel %vm3910_vm7, %v2235_v48, 0.0  ;;  %v3245_v18 = vpop.f32.mrb[123].mxu1 }
 0x1ff   : > { %v2359_v47 = vadd.f32 %v2358_v22, %v2347_v36  ;;  %v2747_v33 = vpack.c.bf16 %v2248_v40, %v2247_v44  ;;  %v2326_v16 = vadd.f32 %v2325_v50, %v2248_v40  ;;  %v2348_v28 = vmul.f32 %v2248_v40, %v2248_v40  ;;  %v2198_v5 = vpop.f32.mrb[124].mxu0 }
 0x200   : > { %v2216_v9 = vadd.f32 %v2198_v5, %v2030_v24  ;;  %v3288_v51 = vpop.f32.mrb[125].mxu0 }
 0x201   : > { %2758 = vst [vmem:[%s4498_s11 + $0x28] sm:$0xff] %v2747_v33   ;;  %v2360_v58 = vadd.f32 %v2359_v47, %v2348_v28  ;;  %v2201_v12 = vpop.f32.mrb[126].mxu0 }
 0x202   : > { %v2236_v52 = vadd.f32 %v4485_v60, %v2216_v9  ;;  %v3289_v0 = vpop.f32.mrb[127].mxu0 }
 0x204   : > { %v2249_v56 = vsel %vm4019_vm8, %v2236_v52, 0.0 }
 0x205   : > { %v2694_v7 = vpack.c.bf16 %v2249_v56, %v2249_v56  ;;  %v2328_v11 = vsel %vm2327_vm0, %v2249_v56, 0.0  ;;  %v2349_v23 = vmul.f32 %v2249_v56, %v2249_v56 }
 0x206   : > { %v2329_v59 = vadd.f32 %v2328_v11, %v2326_v16 }
 0x207   : > { %2315 = vst [vmem:[%s4498_s11 + $0x30] sm:$0x3] %v2694_v7  ;;  %v2361_v41 = vsel %vm2327_vm0, %v2349_v23, 0.0 }
 0x208   : > { %v2330_v3 = vrot.slane %v2329_v59, 4  ;;  %v2362_v14 = vadd.f32 %v2361_v41, %v2360_v58 }
 0x20a   : > { %v2331_v27 = vadd.f32 %v2330_v3, %v2329_v59  ;;  %v2363_v13 = vrot.slane %v2362_v14, 4 }
 0x20c   : > { %v2332_v63 = vrot.slane %v2331_v27, 2  ;;  %v2364_v37 = vadd.f32 %v2363_v13, %v2362_v14 }
 0x20e   : > { %v2333_v60 = vadd.f32 %v2332_v63, %v2331_v27  ;;  %v2365_v42 = vrot.slane %v2364_v37, 2 }
 0x210   : > { %v2334_v61 = vrot.slane %v2333_v60, 1  ;;  %v2366_v55 = vadd.f32 %v2365_v42, %v2364_v37 }
 0x212   : > { %v2335_v30 = vadd.f32 %v2334_v61, %v2333_v60  ;;  %v2367_v1 = vrot.slane %v2366_v55, 1 }
 0x214   : > { %2336 = vst [vmem:[%s262_s13] sm:$0x1] %v2335_v30  ;;  %v2368_v20 = vadd.f32 %v2367_v1, %v2366_v55 }
 0x216   : > { %2369 = vst [vmem:[%s262_s13 + $0x1] sm:$0x1] %v2368_v20 }
 0x217 PF: > { %s17_s21 = sadd.s32 1, %s3414_s21  }
 0x218   : > { %p14_p4 = scmp.ge.s32.totalorder %s17_s21, 4  }
 0x21a   :  { %16 = sbr.rel (!%p14_p4) target bundleno = 1 (0x1), region = 90 }

</bundles_post_ra>
